<compile_context>
chip_gen: v5e
topology: v5e:2x2
jax: 0.10.0
libtpu: 0.0.40
codegen_flags: <defaults>
</compile_context>

<pallas_src>
import jax
import jax.numpy as jnp
import numpy as np
from jax.experimental import pallas as pl
from jax.experimental.pallas import tpu as pltpu


# ---------------------------------------------------------------------------
# Fused forward kernel: one grid step == B images.
# ---------------------------------------------------------------------------
def _fused_forward_kernel(x_ref, m1_ref, b1_ref, s1_ref, r_ref, m2_ref, b2_ref,
                          s2_ref, g_ref, bf1_ref, wf2_ref, bf2_ref,
                          out_ref, a1_scr):
    f32, bf16 = jnp.float32, jnp.bfloat16
    GS = out_ref.shape[1]                       # 8-aligned fc row group (>= B)

    def mm(a, b):
        # MXU matmul: bf16 operands, f32 accumulation.
        return jnp.dot(a, b, preferred_element_type=f32)

    # ---- conv1 (3x3, 3->16, valid): even/odd output-column band matmuls
    # (W-half of the 2x2 pool is folded into m1), bias + ReLU, W-pair max.
    # Staged through VMEM scratch to keep vreg pressure bounded.
    x0 = x_ref[0].astype(bf16)                  # (B*28, 90) window kh=0
    x1 = x_ref[1].astype(bf16)                  # kh=1
    x2 = x_ref[2].astype(bf16)                  # kh=2
    b1 = b1_ref[...]
    even1 = mm(x0, m1_ref[0]) + mm(x1, m1_ref[1]) + mm(x2, m1_ref[2])
    a1_scr[...] = jnp.maximum(even1 + b1, 0.0)
    odd1 = mm(x0, m1_ref[3]) + mm(x1, m1_ref[4]) + mm(x2, m1_ref[5])
    a1_scr[...] = jnp.maximum(a1_scr[...], jnp.maximum(odd1 + b1, 0.0))

    # ---- H-direction pool-1: exact 0/1 row-pair selectors (block-diag in B).
    a1 = a1_scr[...].astype(bf16)                                   # (B*28, 224)
    p1 = jnp.maximum(mm(s1_ref[0], a1), mm(s1_ref[1], a1)).astype(bf16)  # (B*14, 224)

    # ---- conv2 (3x3, 16->32, valid): kh row windows via 0/1 selectors,
    # then even/odd output-column band matmuls (W-pool folded in).
    lhs0 = mm(r_ref[0], p1).astype(bf16)                            # (B*12, 224)
    lhs1 = mm(r_ref[1], p1).astype(bf16)
    lhs2 = mm(r_ref[2], p1).astype(bf16)
    b2 = b2_ref[...]
    even2 = mm(lhs0, m2_ref[0]) + mm(lhs1, m2_ref[1]) + mm(lhs2, m2_ref[2])
    odd2 = mm(lhs0, m2_ref[3]) + mm(lhs1, m2_ref[4]) + mm(lhs2, m2_ref[5])
    a2 = jnp.maximum(jnp.maximum(even2 + b2, 0.0),
                     jnp.maximum(odd2 + b2, 0.0)).astype(bf16)      # (B*12, 192)

    # ---- H-direction pool-2, output rows h-grouped: row = h*GS + b.
    p2 = jnp.maximum(mm(s2_ref[0], a2), mm(s2_ref[1], a2))          # (6*GS, 192)

    # ---- flatten per image to (GS, 1152) with lane order (h, w, c); the
    # PyTorch NCHW view(-1, 32*6*6) order is pre-folded into g's rows.
    flat = jnp.concatenate([p2[h * GS:(h + 1) * GS, :] for h in range(6)],
                           axis=1).astype(bf16)                     # (GS, 1152)

    f1 = jnp.maximum(mm(flat, g_ref[...]) + bf1_ref[...], 0.0)      # (GS, 128)
    out = mm(f1.astype(bf16), wf2_ref[...]) + bf2_ref[...]          # (GS, 128)
    out_ref[0] = out.astype(out_ref.dtype)      # lanes 10.. are zero padding


# ---------------------------------------------------------------------------
# One-time parameter preparation (all weight-layout work hoisted here).
# ---------------------------------------------------------------------------
def prepare_params(params, batch_block=4):
    f32, bf16 = jnp.float32, jnp.bfloat16
    B = batch_block
    GS = ((B + 7) // 8) * 8                     # 8-aligned fc row group

    def band_matrices(w_oihw, w_in):
        """Banded conv matrices with the W-direction pool selection folded in.

        Returns (2*KH, Win*Cin, (OW//2)*Cout); index p*KH+kh is the matrix for
        output-column parity p (0 even, 1 odd) and kernel row kh, so that
            conv_p[oh, :] == sum_kh X[oh+kh, :] @ M[p*KH + kh]
        on (H, W*C) lane-packed activations.
        """
        w_hwio = jnp.transpose(w_oihw, (2, 3, 1, 0)).astype(f32)    # (KH,KW,Cin,Cout)
        kh_n, kw_n, cin, cout = w_hwio.shape
        ow = w_in - kw_n + 1
        full = jnp.stack([
            sum(jnp.kron(jnp.eye(w_in, ow, k=-kw, dtype=f32), w_hwio[kh, kw])
                for kw in range(kw_n))
            for kh in range(kh_n)])                                 # (KH, Win*Cin, OW*Cout)
        full = full.reshape(kh_n, w_in * cin, ow, cout)
        halves = jnp.stack([full[:, :, 0::2, :], full[:, :, 1::2, :]])
        return halves.reshape(2 * kh_n, w_in * cin, (ow // 2) * cout).astype(bf16)

    def onehot_rows(col_targets, n_cols, valid=None):
        m = (jnp.arange(n_cols)[None, :] == col_targets[:, None]).astype(f32)
        if valid is not None:
            m = m * valid[:, None]
        return m.astype(bf16)

    # stage-1 H-pool selectors: output row b*14+i <- conv1 rows b*28+2i (/ +1)
    i1 = jnp.arange(B * 14)
    base1 = (i1 // 14) * 28 + 2 * (i1 % 14)
    s1 = jnp.stack([onehot_rows(base1, B * 28),
                    onehot_rows(base1 + 1, B * 28)])                # (2, B*14, B*28)

    # conv2 kh row-window selectors: output row b*12+r <- pooled-1 row b*14+r+kh
    i2 = jnp.arange(B * 12)
    wbase = (i2 // 12) * 14 + (i2 % 12)
    r = jnp.stack([onehot_rows(wbase + kh, B * 14) for kh in range(3)])  # (3, B*12, B*14)

    # stage-2 H-pool selectors, h-grouped / 8-padded: row h*GS+b <- conv2 row b*12+2h (/ +1)
    i3 = jnp.arange(6 * GS)
    h3, b3 = i3 // GS, i3 % GS
    valid3 = (b3 < B).astype(f32)
    base3 = jnp.minimum(b3, B - 1) * 12 + 2 * h3
    s2 = jnp.stack([onehot_rows(base3, B * 12, valid3),
                    onehot_rows(base3 + 1, B * 12, valid3)])        # (2, 6*GS, B*12)

    # fc1: fold PyTorch's NCHW view(-1, 32*6*6) flatten order into a single
    # (1152, 128) matrix whose rows match the kernel's (h, w, c) lane order.
    g = jnp.transpose(params["wf1"].reshape(128, 32, 6, 6), (2, 3, 1, 0))
    g = g.reshape(6 * 6 * 32, 128).astype(bf16)                     # (1152, 128)

    return dict(
        m1=band_matrices(params["w1"], 30),                         # (6,  90, 224)
        b1=jnp.tile(params["b1"].astype(f32), 14)[None, :],         # (1, 224)
        s1=s1,
        r=r,
        m2=band_matrices(params["w2"], 14),                         # (6, 224, 192)
        b2=jnp.tile(params["b2"].astype(f32), 6)[None, :],          # (1, 192)
        s2=s2,
        g=g,
        bf1=params["bf1"].astype(f32)[None, :],                     # (1, 128)
        wf2=jnp.pad(params["wf2"].T.astype(bf16), ((0, 0), (0, 118))),   # (128, 128)
        bf2=jnp.pad(params["bf2"].astype(f32), (0, 118))[None, :],  # (1, 128)
    )


# ---------------------------------------------------------------------------
# Forward pass: single fused pallas_call over the batch.
# ---------------------------------------------------------------------------
def custom_model_forward(prepped, x_nchw):
    p = prepped
    B = p["s1"].shape[1] // 14           # images per grid step (static)
    GS = p["s2"].shape[1] // 6           # 8-aligned fc row group (static)
    n = x_nchw.shape[0]
    n_pad = ((n + B - 1) // B) * B
    steps = n_pad // B

    # NCHW -> NHWC -> (N, 30, 90): H on sublanes, (W, C) packed into lanes.
    x = jnp.transpose(x_nchw, (0, 2, 3, 1)).reshape(n, 30, 30 * 3)
    if n_pad != n:
        x = jnp.pad(x, ((0, n_pad - n), (0, 0), (0, 0)))
    # Pre-extract the three kh-shifted conv1 row windows (wrapper-side slices),
    # so the kernel's conv dots see contiguous (B*28, 90) tiles per image group.
    x_sh = jnp.stack([x[:, kh:kh + 28, :] for kh in range(3)])      # (3, n_pad, 28, 90)
    x_sh = x_sh.reshape(3, n_pad * 28, 90)

    weights = (p["m1"], p["b1"], p["s1"], p["r"], p["m2"], p["b2"],
               p["s2"], p["g"], p["bf1"], p["wf2"], p["bf2"])

    def whole(a):  # full-array block, grid-invariant -> stays VMEM-resident
        nd = a.ndim
        return pl.BlockSpec(a.shape, lambda i: (0,) * nd)

    out = pl.pallas_call(
        _fused_forward_kernel,
        out_shape=jax.ShapeDtypeStruct((steps, GS, 128), jnp.float32),
        grid=(steps,),
        in_specs=[pl.BlockSpec((3, B * 28, 90), lambda i: (0, i, 0))]
                 + [whole(a) for a in weights],
        out_specs=pl.BlockSpec((1, GS, 128), lambda i: (i, 0, 0)),
        scratch_shapes=[pltpu.VMEM((B * 28, 224), jnp.float32)],   # conv1 staging
        compiler_params=pltpu.CompilerParams(
            dimension_semantics=("parallel",)),
    )(x_sh, *weights)

    return out[:, :B, :].reshape(steps * B, 128)[:n, :10]


# ---------------------------------------------------------------------------
# Params, pure-JAX reference, main.
# ---------------------------------------------------------------------------
def init_params(key):
    """Deterministic synthetic params in PyTorch layouts (OIHW, (out, in))."""
    ks = jax.random.split(key, 8)

    def u(k, shape, fan_in):
        bound = 1.0 / jnp.sqrt(float(fan_in))
        return jax.random.uniform(k, shape, jnp.float32, -bound, bound)

    return dict(
        w1=u(ks[0], (16, 3, 3, 3), 3 * 9),    b1=u(ks[1], (16,), 3 * 9),
        w2=u(ks[2], (32, 16, 3, 3), 16 * 9),  b2=u(ks[3], (32,), 16 * 9),
        wf1=u(ks[4], (128, 32 * 6 * 6), 32 * 6 * 6),
        bf1=u(ks[5], (128,), 32 * 6 * 6),
        wf2=u(ks[6], (10, 128), 128),         bf2=u(ks[7], (10,), 128),
    )


def reference_forward(params, x):
    """Pure-JAX reference mirroring the PyTorch module (sanity check)."""
    dn = ("NCHW", "OIHW", "NCHW")
    y = jax.lax.conv_general_dilated(x, params["w1"], (1, 1), "VALID",
                                     dimension_numbers=dn)
    y = jax.nn.relu(y + params["b1"][None, :, None, None])
    y = jax.lax.reduce_window(y, -jnp.inf, jax.lax.max,
                              (1, 1, 2, 2), (1, 1, 2, 2), "VALID")
    y = jax.lax.conv_general_dilated(y, params["w2"], (1, 1), "VALID",
                                     dimension_numbers=dn)
    y = jax.nn.relu(y + params["b2"][None, :, None, None])
    y = jax.lax.reduce_window(y, -jnp.inf, jax.lax.max,
                              (1, 1, 2, 2), (1, 1, 2, 2), "VALID")
    y = y.reshape(y.shape[0], -1)
    y = jax.nn.relu(y @ params["wf1"].T + params["bf1"])
    return y @ params["wf2"].T + params["bf2"]


if __name__ == "__main__":
    key = jax.random.PRNGKey(0)
    pkey, xkey = jax.random.split(key)
    params = init_params(pkey)

    # 30x30 input so the spatial path is 30 -> 28 -> 14 -> 12 -> 6, matching
    # the module's fc1 = Linear(32*6*6, 128).  N=8 with B=4 images per grid
    # step -> grid=(2,), so both v7x TensorCores get work.
    x = jax.random.normal(xkey, (8, 3, 30, 30), jnp.float32)

    prepped = prepare_params(params, batch_block=4)   # one-time layout hoisting
    fwd = jax.jit(custom_model_forward)
    out = jax.block_until_ready(fwd(prepped, x))
    assert out.shape == (8, 10) and out.dtype == jnp.float32

    # Loose tolerance: the kernel uses bf16 MXU operands with f32 accumulation.
    ref = reference_forward(params, x)
    np.testing.assert_allclose(np.asarray(out), np.asarray(ref),
                               rtol=1e-1, atol=1e-1)
    print("KERNEL_OK")
</pallas_src>

<mosaic_0001>
module attributes {stable_mosaic.version = 11 : i64} {
  func.func @_fused_forward_kernel(%arg0: i32, %arg1: memref<3x112x90xf32, #tpu.memory_space<vmem>>, %arg2: memref<6x90x224xbf16, #tpu.memory_space<vmem>>, %arg3: memref<1x224xf32, #tpu.memory_space<vmem>>, %arg4: memref<2x56x112xbf16, #tpu.memory_space<vmem>>, %arg5: memref<3x48x56xbf16, #tpu.memory_space<vmem>>, %arg6: memref<6x224x192xbf16, #tpu.memory_space<vmem>>, %arg7: memref<1x192xf32, #tpu.memory_space<vmem>>, %arg8: memref<2x48x48xbf16, #tpu.memory_space<vmem>>, %arg9: memref<1152x128xbf16, #tpu.memory_space<vmem>>, %arg10: memref<1x128xf32, #tpu.memory_space<vmem>>, %arg11: memref<128x128xbf16, #tpu.memory_space<vmem>>, %arg12: memref<1x128xf32, #tpu.memory_space<vmem>>, %arg13: memref<1x8x128xf32, #tpu.memory_space<vmem>>, %arg14: memref<112x224xf32, #tpu.memory_space<vmem>>) attributes {dimension_semantics = [#tpu.dimension_semantics<parallel>], iteration_bounds = array<i64: 2>, scalar_prefetch = 0 : i64, scratch_operands = 1 : i64, tpu.core_type = #tpu.core_type<tc>, window_params = [{transform_indices = @transform_0, window_bounds = array<i64: 3, 112, 90>}, {pipeline_mode = #tpu.pipeline_mode<synchronous>, transform_indices = @transform_1, window_bounds = array<i64: 6, 90, 224>}, {pipeline_mode = #tpu.pipeline_mode<synchronous>, transform_indices = @transform_2, window_bounds = array<i64: 1, 224>}, {pipeline_mode = #tpu.pipeline_mode<synchronous>, transform_indices = @transform_3, window_bounds = array<i64: 2, 56, 112>}, {pipeline_mode = #tpu.pipeline_mode<synchronous>, transform_indices = @transform_4, window_bounds = array<i64: 3, 48, 56>}, {pipeline_mode = #tpu.pipeline_mode<synchronous>, transform_indices = @transform_5, window_bounds = array<i64: 6, 224, 192>}, {pipeline_mode = #tpu.pipeline_mode<synchronous>, transform_indices = @transform_6, window_bounds = array<i64: 1, 192>}, {pipeline_mode = #tpu.pipeline_mode<synchronous>, transform_indices = @transform_7, window_bounds = array<i64: 2, 48, 48>}, {pipeline_mode = #tpu.pipeline_mode<synchronous>, transform_indices = @transform_8, window_bounds = array<i64: 1152, 128>}, {pipeline_mode = #tpu.pipeline_mode<synchronous>, transform_indices = @transform_9, window_bounds = array<i64: 1, 128>}, {pipeline_mode = #tpu.pipeline_mode<synchronous>, transform_indices = @transform_10, window_bounds = array<i64: 128, 128>}, {pipeline_mode = #tpu.pipeline_mode<synchronous>, transform_indices = @transform_11, window_bounds = array<i64: 1, 128>}, {transform_indices = @transform_12, window_bounds = array<i64: 1, 8, 128>}]} {
    %c0 = arith.constant 0 : index
    %c0_0 = arith.constant 0 : index
    %c0_1 = arith.constant 0 : index
    %0 = vector.load %arg1[%c0, %c0_0, %c0_1] : memref<3x112x90xf32, #tpu.memory_space<vmem>>, vector<1x112x90xf32>
    %1 = vector.shape_cast %0 : vector<1x112x90xf32> to vector<112x90xf32>
    %2 = arith.truncf %1 : vector<112x90xf32> to vector<112x90xbf16>
    %c1 = arith.constant 1 : index
    %c0_2 = arith.constant 0 : index
    %c0_3 = arith.constant 0 : index
    %3 = vector.load %arg1[%c1, %c0_2, %c0_3] : memref<3x112x90xf32, #tpu.memory_space<vmem>>, vector<1x112x90xf32>
    %4 = vector.shape_cast %3 : vector<1x112x90xf32> to vector<112x90xf32>
    %5 = arith.truncf %4 : vector<112x90xf32> to vector<112x90xbf16>
    %c2 = arith.constant 2 : index
    %c0_4 = arith.constant 0 : index
    %c0_5 = arith.constant 0 : index
    %6 = vector.load %arg1[%c2, %c0_4, %c0_5] : memref<3x112x90xf32, #tpu.memory_space<vmem>>, vector<1x112x90xf32>
    %7 = vector.shape_cast %6 : vector<1x112x90xf32> to vector<112x90xf32>
    %8 = arith.truncf %7 : vector<112x90xf32> to vector<112x90xbf16>
    %c0_6 = arith.constant 0 : index
    %c0_7 = arith.constant 0 : index
    %9 = vector.load %arg3[%c0_6, %c0_7] : memref<1x224xf32, #tpu.memory_space<vmem>>, vector<1x224xf32>
    %c0_8 = arith.constant 0 : index
    %c0_9 = arith.constant 0 : index
    %c0_10 = arith.constant 0 : index
    %10 = vector.load %arg2[%c0_8, %c0_9, %c0_10] : memref<6x90x224xbf16, #tpu.memory_space<vmem>>, vector<1x90x224xbf16>
    %11 = vector.shape_cast %10 : vector<1x90x224xbf16> to vector<90x224xbf16>
    %cst = arith.constant dense<0.000000e+00> : vector<112x224xf32>
    %12 = tpu.matmul %2, %11, %cst {dimension_numbers = #tpu.dot_dimension_numbers<[1], [0], [0], [1], [0, 0, 1, 1], [], []>} : vector<112x90xbf16>, vector<90x224xbf16>, vector<112x224xf32> -> vector<112x224xf32>
    %c1_11 = arith.constant 1 : index
    %c0_12 = arith.constant 0 : index
    %c0_13 = arith.constant 0 : index
    %13 = vector.load %arg2[%c1_11, %c0_12, %c0_13] : memref<6x90x224xbf16, #tpu.memory_space<vmem>>, vector<1x90x224xbf16>
    %14 = vector.shape_cast %13 : vector<1x90x224xbf16> to vector<90x224xbf16>
    %cst_14 = arith.constant dense<0.000000e+00> : vector<112x224xf32>
    %15 = tpu.matmul %5, %14, %cst_14 {dimension_numbers = #tpu.dot_dimension_numbers<[1], [0], [0], [1], [0, 0, 1, 1], [], []>} : vector<112x90xbf16>, vector<90x224xbf16>, vector<112x224xf32> -> vector<112x224xf32>
    %16 = arith.addf %12, %15 : vector<112x224xf32>
    %c2_15 = arith.constant 2 : index
    %c0_16 = arith.constant 0 : index
    %c0_17 = arith.constant 0 : index
    %17 = vector.load %arg2[%c2_15, %c0_16, %c0_17] : memref<6x90x224xbf16, #tpu.memory_space<vmem>>, vector<1x90x224xbf16>
    %18 = vector.shape_cast %17 : vector<1x90x224xbf16> to vector<90x224xbf16>
    %cst_18 = arith.constant dense<0.000000e+00> : vector<112x224xf32>
    %19 = tpu.matmul %8, %18, %cst_18 {dimension_numbers = #tpu.dot_dimension_numbers<[1], [0], [0], [1], [0, 0, 1, 1], [], []>} : vector<112x90xbf16>, vector<90x224xbf16>, vector<112x224xf32> -> vector<112x224xf32>
    %20 = arith.addf %16, %19 : vector<112x224xf32>
    %21 = vector.broadcast %9 : vector<1x224xf32> to vector<112x224xf32>
    %22 = arith.addf %20, %21 : vector<112x224xf32>
    %cst_19 = arith.constant 0.000000e+00 : f32
    %23 = vector.broadcast %cst_19 : f32 to vector<112x224xf32>
    %24 = arith.maximumf %22, %23 : vector<112x224xf32>
    %c0_20 = arith.constant 0 : index
    %c0_21 = arith.constant 0 : index
    %25 = vector.load %arg14[%c0_20, %c0_21] : memref<112x224xf32, #tpu.memory_space<vmem>>, vector<112x224xf32>
    tpu.vector_store %arg14[%c0_20, %c0_21], %24 {strides = array<i32>} : memref<112x224xf32, #tpu.memory_space<vmem>>, vector<112x224xf32>,
    %c3 = arith.constant 3 : index
    %c0_22 = arith.constant 0 : index
    %c0_23 = arith.constant 0 : index
    %26 = vector.load %arg2[%c3, %c0_22, %c0_23] : memref<6x90x224xbf16, #tpu.memory_space<vmem>>, vector<1x90x224xbf16>
    %27 = vector.shape_cast %26 : vector<1x90x224xbf16> to vector<90x224xbf16>
    %cst_24 = arith.constant dense<0.000000e+00> : vector<112x224xf32>
    %28 = tpu.matmul %2, %27, %cst_24 {dimension_numbers = #tpu.dot_dimension_numbers<[1], [0], [0], [1], [0, 0, 1, 1], [], []>} : vector<112x90xbf16>, vector<90x224xbf16>, vector<112x224xf32> -> vector<112x224xf32>
    %c4 = arith.constant 4 : index
    %c0_25 = arith.constant 0 : index
    %c0_26 = arith.constant 0 : index
    %29 = vector.load %arg2[%c4, %c0_25, %c0_26] : memref<6x90x224xbf16, #tpu.memory_space<vmem>>, vector<1x90x224xbf16>
    %30 = vector.shape_cast %29 : vector<1x90x224xbf16> to vector<90x224xbf16>
    %cst_27 = arith.constant dense<0.000000e+00> : vector<112x224xf32>
    %31 = tpu.matmul %5, %30, %cst_27 {dimension_numbers = #tpu.dot_dimension_numbers<[1], [0], [0], [1], [0, 0, 1, 1], [], []>} : vector<112x90xbf16>, vector<90x224xbf16>, vector<112x224xf32> -> vector<112x224xf32>
    %32 = arith.addf %28, %31 : vector<112x224xf32>
    %c5 = arith.constant 5 : index
    %c0_28 = arith.constant 0 : index
    %c0_29 = arith.constant 0 : index
    %33 = vector.load %arg2[%c5, %c0_28, %c0_29] : memref<6x90x224xbf16, #tpu.memory_space<vmem>>, vector<1x90x224xbf16>
    %34 = vector.shape_cast %33 : vector<1x90x224xbf16> to vector<90x224xbf16>
    %cst_30 = arith.constant dense<0.000000e+00> : vector<112x224xf32>
    %35 = tpu.matmul %8, %34, %cst_30 {dimension_numbers = #tpu.dot_dimension_numbers<[1], [0], [0], [1], [0, 0, 1, 1], [], []>} : vector<112x90xbf16>, vector<90x224xbf16>, vector<112x224xf32> -> vector<112x224xf32>
    %36 = arith.addf %32, %35 : vector<112x224xf32>
    %c0_31 = arith.constant 0 : index
    %c0_32 = arith.constant 0 : index
    %37 = vector.load %arg14[%c0_31, %c0_32] : memref<112x224xf32, #tpu.memory_space<vmem>>, vector<112x224xf32>
    %38 = vector.broadcast %9 : vector<1x224xf32> to vector<112x224xf32>
    %39 = arith.addf %36, %38 : vector<112x224xf32>
    %cst_33 = arith.constant 0.000000e+00 : f32
    %40 = vector.broadcast %cst_33 : f32 to vector<112x224xf32>
    %41 = arith.maximumf %39, %40 : vector<112x224xf32>
    %42 = arith.maximumf %37, %41 : vector<112x224xf32>
    %c0_34 = arith.constant 0 : index
    %c0_35 = arith.constant 0 : index
    %43 = vector.load %arg14[%c0_34, %c0_35] : memref<112x224xf32, #tpu.memory_space<vmem>>, vector<112x224xf32>
    tpu.vector_store %arg14[%c0_34, %c0_35], %42 {strides = array<i32>} : memref<112x224xf32, #tpu.memory_space<vmem>>, vector<112x224xf32>,
    %c0_36 = arith.constant 0 : index
    %c0_37 = arith.constant 0 : index
    %44 = vector.load %arg14[%c0_36, %c0_37] : memref<112x224xf32, #tpu.memory_space<vmem>>, vector<112x224xf32>
    %45 = arith.truncf %44 : vector<112x224xf32> to vector<112x224xbf16>
    %c0_38 = arith.constant 0 : index
    %c0_39 = arith.constant 0 : index
    %c0_40 = arith.constant 0 : index
    %46 = vector.load %arg4[%c0_38, %c0_39, %c0_40] : memref<2x56x112xbf16, #tpu.memory_space<vmem>>, vector<1x56x112xbf16>
    %47 = vector.shape_cast %46 : vector<1x56x112xbf16> to vector<56x112xbf16>
    %cst_41 = arith.constant dense<0.000000e+00> : vector<56x224xf32>
    %48 = tpu.matmul %47, %45, %cst_41 {dimension_numbers = #tpu.dot_dimension_numbers<[1], [0], [0], [1], [0, 0, 1, 1], [], []>} : vector<56x112xbf16>, vector<112x224xbf16>, vector<56x224xf32> -> vector<56x224xf32>
    %c1_42 = arith.constant 1 : index
    %c0_43 = arith.constant 0 : index
    %c0_44 = arith.constant 0 : index
    %49 = vector.load %arg4[%c1_42, %c0_43, %c0_44] : memref<2x56x112xbf16, #tpu.memory_space<vmem>>, vector<1x56x112xbf16>
    %50 = vector.shape_cast %49 : vector<1x56x112xbf16> to vector<56x112xbf16>
    %cst_45 = arith.constant dense<0.000000e+00> : vector<56x224xf32>
    %51 = tpu.matmul %50, %45, %cst_45 {dimension_numbers = #tpu.dot_dimension_numbers<[1], [0], [0], [1], [0, 0, 1, 1], [], []>} : vector<56x112xbf16>, vector<112x224xbf16>, vector<56x224xf32> -> vector<56x224xf32>
    %52 = arith.maximumf %48, %51 : vector<56x224xf32>
    %53 = arith.truncf %52 : vector<56x224xf32> to vector<56x224xbf16>
    %c0_46 = arith.constant 0 : index
    %c0_47 = arith.constant 0 : index
    %c0_48 = arith.constant 0 : index
    %54 = vector.load %arg5[%c0_46, %c0_47, %c0_48] : memref<3x48x56xbf16, #tpu.memory_space<vmem>>, vector<1x48x56xbf16>
    %55 = vector.shape_cast %54 : vector<1x48x56xbf16> to vector<48x56xbf16>
    %cst_49 = arith.constant dense<0.000000e+00> : vector<48x224xf32>
    %56 = tpu.matmul %55, %53, %cst_49 {dimension_numbers = #tpu.dot_dimension_numbers<[1], [0], [0], [1], [0, 0, 1, 1], [], []>} : vector<48x56xbf16>, vector<56x224xbf16>, vector<48x224xf32> -> vector<48x224xf32>
    %57 = arith.truncf %56 : vector<48x224xf32> to vector<48x224xbf16>
    %c1_50 = arith.constant 1 : index
    %c0_51 = arith.constant 0 : index
    %c0_52 = arith.constant 0 : index
    %58 = vector.load %arg5[%c1_50, %c0_51, %c0_52] : memref<3x48x56xbf16, #tpu.memory_space<vmem>>, vector<1x48x56xbf16>
    %59 = vector.shape_cast %58 : vector<1x48x56xbf16> to vector<48x56xbf16>
    %cst_53 = arith.constant dense<0.000000e+00> : vector<48x224xf32>
    %60 = tpu.matmul %59, %53, %cst_53 {dimension_numbers = #tpu.dot_dimension_numbers<[1], [0], [0], [1], [0, 0, 1, 1], [], []>} : vector<48x56xbf16>, vector<56x224xbf16>, vector<48x224xf32> -> vector<48x224xf32>
    %61 = arith.truncf %60 : vector<48x224xf32> to vector<48x224xbf16>
    %c2_54 = arith.constant 2 : index
    %c0_55 = arith.constant 0 : index
    %c0_56 = arith.constant 0 : index
    %62 = vector.load %arg5[%c2_54, %c0_55, %c0_56] : memref<3x48x56xbf16, #tpu.memory_space<vmem>>, vector<1x48x56xbf16>
    %63 = vector.shape_cast %62 : vector<1x48x56xbf16> to vector<48x56xbf16>
    %cst_57 = arith.constant dense<0.000000e+00> : vector<48x224xf32>
    %64 = tpu.matmul %63, %53, %cst_57 {dimension_numbers = #tpu.dot_dimension_numbers<[1], [0], [0], [1], [0, 0, 1, 1], [], []>} : vector<48x56xbf16>, vector<56x224xbf16>, vector<48x224xf32> -> vector<48x224xf32>
    %65 = arith.truncf %64 : vector<48x224xf32> to vector<48x224xbf16>
    %c0_58 = arith.constant 0 : index
    %c0_59 = arith.constant 0 : index
    %66 = vector.load %arg7[%c0_58, %c0_59] : memref<1x192xf32, #tpu.memory_space<vmem>>, vector<1x192xf32>
    %c0_60 = arith.constant 0 : index
    %c0_61 = arith.constant 0 : index
    %c0_62 = arith.constant 0 : index
    %67 = vector.load %arg6[%c0_60, %c0_61, %c0_62] : memref<6x224x192xbf16, #tpu.memory_space<vmem>>, vector<1x224x192xbf16>
    %68 = vector.shape_cast %67 : vector<1x224x192xbf16> to vector<224x192xbf16>
    %cst_63 = arith.constant dense<0.000000e+00> : vector<48x192xf32>
    %69 = tpu.matmul %57, %68, %cst_63 {dimension_numbers = #tpu.dot_dimension_numbers<[1], [0], [0], [1], [0, 0, 1, 1], [], []>} : vector<48x224xbf16>, vector<224x192xbf16>, vector<48x192xf32> -> vector<48x192xf32>
    %c1_64 = arith.constant 1 : index
    %c0_65 = arith.constant 0 : index
    %c0_66 = arith.constant 0 : index
    %70 = vector.load %arg6[%c1_64, %c0_65, %c0_66] : memref<6x224x192xbf16, #tpu.memory_space<vmem>>, vector<1x224x192xbf16>
    %71 = vector.shape_cast %70 : vector<1x224x192xbf16> to vector<224x192xbf16>
    %cst_67 = arith.constant dense<0.000000e+00> : vector<48x192xf32>
    %72 = tpu.matmul %61, %71, %cst_67 {dimension_numbers = #tpu.dot_dimension_numbers<[1], [0], [0], [1], [0, 0, 1, 1], [], []>} : vector<48x224xbf16>, vector<224x192xbf16>, vector<48x192xf32> -> vector<48x192xf32>
    %73 = arith.addf %69, %72 : vector<48x192xf32>
    %c2_68 = arith.constant 2 : index
    %c0_69 = arith.constant 0 : index
    %c0_70 = arith.constant 0 : index
    %74 = vector.load %arg6[%c2_68, %c0_69, %c0_70] : memref<6x224x192xbf16, #tpu.memory_space<vmem>>, vector<1x224x192xbf16>
    %75 = vector.shape_cast %74 : vector<1x224x192xbf16> to vector<224x192xbf16>
    %cst_71 = arith.constant dense<0.000000e+00> : vector<48x192xf32>
    %76 = tpu.matmul %65, %75, %cst_71 {dimension_numbers = #tpu.dot_dimension_numbers<[1], [0], [0], [1], [0, 0, 1, 1], [], []>} : vector<48x224xbf16>, vector<224x192xbf16>, vector<48x192xf32> -> vector<48x192xf32>
    %77 = arith.addf %73, %76 : vector<48x192xf32>
    %c3_72 = arith.constant 3 : index
    %c0_73 = arith.constant 0 : index
    %c0_74 = arith.constant 0 : index
    %78 = vector.load %arg6[%c3_72, %c0_73, %c0_74] : memref<6x224x192xbf16, #tpu.memory_space<vmem>>, vector<1x224x192xbf16>
    %79 = vector.shape_cast %78 : vector<1x224x192xbf16> to vector<224x192xbf16>
    %cst_75 = arith.constant dense<0.000000e+00> : vector<48x192xf32>
    %80 = tpu.matmul %57, %79, %cst_75 {dimension_numbers = #tpu.dot_dimension_numbers<[1], [0], [0], [1], [0, 0, 1, 1], [], []>} : vector<48x224xbf16>, vector<224x192xbf16>, vector<48x192xf32> -> vector<48x192xf32>
    %c4_76 = arith.constant 4 : index
    %c0_77 = arith.constant 0 : index
    %c0_78 = arith.constant 0 : index
    %81 = vector.load %arg6[%c4_76, %c0_77, %c0_78] : memref<6x224x192xbf16, #tpu.memory_space<vmem>>, vector<1x224x192xbf16>
    %82 = vector.shape_cast %81 : vector<1x224x192xbf16> to vector<224x192xbf16>
    %cst_79 = arith.constant dense<0.000000e+00> : vector<48x192xf32>
    %83 = tpu.matmul %61, %82, %cst_79 {dimension_numbers = #tpu.dot_dimension_numbers<[1], [0], [0], [1], [0, 0, 1, 1], [], []>} : vector<48x224xbf16>, vector<224x192xbf16>, vector<48x192xf32> -> vector<48x192xf32>
    %84 = arith.addf %80, %83 : vector<48x192xf32>
    %c5_80 = arith.constant 5 : index
    %c0_81 = arith.constant 0 : index
    %c0_82 = arith.constant 0 : index
    %85 = vector.load %arg6[%c5_80, %c0_81, %c0_82] : memref<6x224x192xbf16, #tpu.memory_space<vmem>>, vector<1x224x192xbf16>
    %86 = vector.shape_cast %85 : vector<1x224x192xbf16> to vector<224x192xbf16>
    %cst_83 = arith.constant dense<0.000000e+00> : vector<48x192xf32>
    %87 = tpu.matmul %65, %86, %cst_83 {dimension_numbers = #tpu.dot_dimension_numbers<[1], [0], [0], [1], [0, 0, 1, 1], [], []>} : vector<48x224xbf16>, vector<224x192xbf16>, vector<48x192xf32> -> vector<48x192xf32>
    %88 = arith.addf %84, %87 : vector<48x192xf32>
    %89 = vector.broadcast %66 : vector<1x192xf32> to vector<48x192xf32>
    %90 = arith.addf %77, %89 : vector<48x192xf32>
    %cst_84 = arith.constant 0.000000e+00 : f32
    %91 = vector.broadcast %cst_84 : f32 to vector<48x192xf32>
    %92 = arith.maximumf %90, %91 : vector<48x192xf32>
    %93 = vector.broadcast %66 : vector<1x192xf32> to vector<48x192xf32>
    %94 = arith.addf %88, %93 : vector<48x192xf32>
    %cst_85 = arith.constant 0.000000e+00 : f32
    %95 = vector.broadcast %cst_85 : f32 to vector<48x192xf32>
    %96 = arith.maximumf %94, %95 : vector<48x192xf32>
    %97 = arith.maximumf %92, %96 : vector<48x192xf32>
    %98 = arith.truncf %97 : vector<48x192xf32> to vector<48x192xbf16>
    %c0_86 = arith.constant 0 : index
    %c0_87 = arith.constant 0 : index
    %c0_88 = arith.constant 0 : index
    %99 = vector.load %arg8[%c0_86, %c0_87, %c0_88] : memref<2x48x48xbf16, #tpu.memory_space<vmem>>, vector<1x48x48xbf16>
    %100 = vector.shape_cast %99 : vector<1x48x48xbf16> to vector<48x48xbf16>
    %cst_89 = arith.constant dense<0.000000e+00> : vector<48x192xf32>
    %101 = tpu.matmul %100, %98, %cst_89 {dimension_numbers = #tpu.dot_dimension_numbers<[1], [0], [0], [1], [0, 0, 1, 1], [], []>} : vector<48x48xbf16>, vector<48x192xbf16>, vector<48x192xf32> -> vector<48x192xf32>
    %c1_90 = arith.constant 1 : index
    %c0_91 = arith.constant 0 : index
    %c0_92 = arith.constant 0 : index
    %102 = vector.load %arg8[%c1_90, %c0_91, %c0_92] : memref<2x48x48xbf16, #tpu.memory_space<vmem>>, vector<1x48x48xbf16>
    %103 = vector.shape_cast %102 : vector<1x48x48xbf16> to vector<48x48xbf16>
    %cst_93 = arith.constant dense<0.000000e+00> : vector<48x192xf32>
    %104 = tpu.matmul %103, %98, %cst_93 {dimension_numbers = #tpu.dot_dimension_numbers<[1], [0], [0], [1], [0, 0, 1, 1], [], []>} : vector<48x48xbf16>, vector<48x192xbf16>, vector<48x192xf32> -> vector<48x192xf32>
    %105 = arith.maximumf %101, %104 : vector<48x192xf32>
    %106 = vector.extract_strided_slice %105 {offsets = [0, 0], sizes = [8, 192], strides = [1, 1]} : vector<48x192xf32> to vector<8x192xf32>
    %107 = vector.extract_strided_slice %105 {offsets = [8, 0], sizes = [8, 192], strides = [1, 1]} : vector<48x192xf32> to vector<8x192xf32>
    %108 = vector.extract_strided_slice %105 {offsets = [16, 0], sizes = [8, 192], strides = [1, 1]} : vector<48x192xf32> to vector<8x192xf32>
    %109 = vector.extract_strided_slice %105 {offsets = [24, 0], sizes = [8, 192], strides = [1, 1]} : vector<48x192xf32> to vector<8x192xf32>
    %110 = vector.extract_strided_slice %105 {offsets = [32, 0], sizes = [8, 192], strides = [1, 1]} : vector<48x192xf32> to vector<8x192xf32>
    %111 = vector.extract_strided_slice %105 {offsets = [40, 0], sizes = [8, 192], strides = [1, 1]} : vector<48x192xf32> to vector<8x192xf32>
    %112 = tpu.concatenate %106, %107, %108, %109, %110, %111 in 1 : vector<8x192xf32>, vector<8x192xf32>, vector<8x192xf32>, vector<8x192xf32>, vector<8x192xf32>, vector<8x192xf32> -> vector<8x1152xf32>
    %113 = arith.truncf %112 : vector<8x1152xf32> to vector<8x1152xbf16>
    %c0_94 = arith.constant 0 : index
    %c0_95 = arith.constant 0 : index
    %114 = vector.load %arg9[%c0_94, %c0_95] : memref<1152x128xbf16, #tpu.memory_space<vmem>>, vector<1152x128xbf16>
    %cst_96 = arith.constant dense<0.000000e+00> : vector<8x128xf32>
    %115 = tpu.matmul %113, %114, %cst_96 {dimension_numbers = #tpu.dot_dimension_numbers<[1], [0], [0], [1], [0, 0, 1, 1], [], []>} : vector<8x1152xbf16>, vector<1152x128xbf16>, vector<8x128xf32> -> vector<8x128xf32>
    %c0_97 = arith.constant 0 : index
    %c0_98 = arith.constant 0 : index
    %116 = vector.load %arg10[%c0_97, %c0_98] : memref<1x128xf32, #tpu.memory_space<vmem>>, vector<1x128xf32>
    %117 = vector.broadcast %116 : vector<1x128xf32> to vector<8x128xf32>
    %118 = arith.addf %115, %117 : vector<8x128xf32>
    %cst_99 = arith.constant 0.000000e+00 : f32
    %119 = vector.broadcast %cst_99 : f32 to vector<8x128xf32>
    %120 = arith.maximumf %118, %119 : vector<8x128xf32>
    %121 = arith.truncf %120 : vector<8x128xf32> to vector<8x128xbf16>
    %c0_100 = arith.constant 0 : index
    %c0_101 = arith.constant 0 : index
    %122 = vector.load %arg11[%c0_100, %c0_101] : memref<128x128xbf16, #tpu.memory_space<vmem>>, vector<128x128xbf16>
    %cst_102 = arith.constant dense<0.000000e+00> : vector<8x128xf32>
    %123 = tpu.matmul %121, %122, %cst_102 {dimension_numbers = #tpu.dot_dimension_numbers<[1], [0], [0], [1], [0, 0, 1, 1], [], []>} : vector<8x128xbf16>, vector<128x128xbf16>, vector<8x128xf32> -> vector<8x128xf32>
    %c0_103 = arith.constant 0 : index
    %c0_104 = arith.constant 0 : index
    %124 = vector.load %arg12[%c0_103, %c0_104] : memref<1x128xf32, #tpu.memory_space<vmem>>, vector<1x128xf32>
    %125 = vector.broadcast %124 : vector<1x128xf32> to vector<8x128xf32>
    %126 = arith.addf %123, %125 : vector<8x128xf32>
    %c0_105 = arith.constant 0 : index
    %c0_106 = arith.constant 0 : index
    %c0_107 = arith.constant 0 : index
    %127 = vector.load %arg13[%c0_105, %c0_106, %c0_107] : memref<1x8x128xf32, #tpu.memory_space<vmem>>, vector<1x8x128xf32>
    %128 = vector.shape_cast %127 : vector<1x8x128xf32> to vector<8x128xf32>
    %129 = vector.shape_cast %126 : vector<8x128xf32> to vector<1x8x128xf32>
    tpu.vector_store %arg13[%c0_105, %c0_106, %c0_107], %129 {strides = array<i32>} : memref<1x8x128xf32, #tpu.memory_space<vmem>>, vector<1x8x128xf32>,
    return
  }
  func.func @transform_0(%arg0: i32) -> (i32, i32, i32) {
    %c0_i32 = arith.constant 0 : i32
    %c0_i32_0 = arith.constant 0 : i32
    %c0_i32_1 = arith.constant 0 : i32
    return %c0_i32, %arg0, %c0_i32_0 : i32, i32, i32
  }
  func.func @transform_1(%arg0: i32) -> (i32, i32, i32) {
    %c0_i32 = arith.constant 0 : i32
    %c0_i32_0 = arith.constant 0 : i32
    %c0_i32_1 = arith.constant 0 : i32
    %c0_i32_2 = arith.constant 0 : i32
    return %c0_i32, %c0_i32_0, %c0_i32_1 : i32, i32, i32
  }
  func.func @transform_2(%arg0: i32) -> (i32, i32) {
    %c0_i32 = arith.constant 0 : i32
    %c0_i32_0 = arith.constant 0 : i32
    %c0_i32_1 = arith.constant 0 : i32
    return %c0_i32, %c0_i32_0 : i32, i32
  }
  func.func @transform_3(%arg0: i32) -> (i32, i32, i32) {
    %c0_i32 = arith.constant 0 : i32
    %c0_i32_0 = arith.constant 0 : i32
    %c0_i32_1 = arith.constant 0 : i32
    %c0_i32_2 = arith.constant 0 : i32
    return %c0_i32, %c0_i32_0, %c0_i32_1 : i32, i32, i32
  }
  func.func @transform_4(%arg0: i32) -> (i32, i32, i32) {
    %c0_i32 = arith.constant 0 : i32
    %c0_i32_0 = arith.constant 0 : i32
    %c0_i32_1 = arith.constant 0 : i32
    %c0_i32_2 = arith.constant 0 : i32
    return %c0_i32, %c0_i32_0, %c0_i32_1 : i32, i32, i32
  }
  func.func @transform_5(%arg0: i32) -> (i32, i32, i32) {
    %c0_i32 = arith.constant 0 : i32
    %c0_i32_0 = arith.constant 0 : i32
    %c0_i32_1 = arith.constant 0 : i32
    %c0_i32_2 = arith.constant 0 : i32
    return %c0_i32, %c0_i32_0, %c0_i32_1 : i32, i32, i32
  }
  func.func @transform_6(%arg0: i32) -> (i32, i32) {
    %c0_i32 = arith.constant 0 : i32
    %c0_i32_0 = arith.constant 0 : i32
    %c0_i32_1 = arith.constant 0 : i32
    return %c0_i32, %c0_i32_0 : i32, i32
  }
  func.func @transform_7(%arg0: i32) -> (i32, i32, i32) {
    %c0_i32 = arith.constant 0 : i32
    %c0_i32_0 = arith.constant 0 : i32
    %c0_i32_1 = arith.constant 0 : i32
    %c0_i32_2 = arith.constant 0 : i32
    return %c0_i32, %c0_i32_0, %c0_i32_1 : i32, i32, i32
  }
  func.func @transform_8(%arg0: i32) -> (i32, i32) {
    %c0_i32 = arith.constant 0 : i32
    %c0_i32_0 = arith.constant 0 : i32
    %c0_i32_1 = arith.constant 0 : i32
    return %c0_i32, %c0_i32_0 : i32, i32
  }
  func.func @transform_9(%arg0: i32) -> (i32, i32) {
    %c0_i32 = arith.constant 0 : i32
    %c0_i32_0 = arith.constant 0 : i32
    %c0_i32_1 = arith.constant 0 : i32
    return %c0_i32, %c0_i32_0 : i32, i32
  }
  func.func @transform_10(%arg0: i32) -> (i32, i32) {
    %c0_i32 = arith.constant 0 : i32
    %c0_i32_0 = arith.constant 0 : i32
    %c0_i32_1 = arith.constant 0 : i32
    return %c0_i32, %c0_i32_0 : i32, i32
  }
  func.func @transform_11(%arg0: i32) -> (i32, i32) {
    %c0_i32 = arith.constant 0 : i32
    %c0_i32_0 = arith.constant 0 : i32
    %c0_i32_1 = arith.constant 0 : i32
    return %c0_i32, %c0_i32_0 : i32, i32
  }
  func.func @transform_12(%arg0: i32) -> (i32, i32, i32) {
    %c0_i32 = arith.constant 0 : i32
    %c0_i32_0 = arith.constant 0 : i32
    %c0_i32_1 = arith.constant 0 : i32
    return %arg0, %c0_i32, %c0_i32_0 : i32, i32, i32
  }
}

</mosaic_0001>

<bundles_post_ra>
// kernel: custom_model_forward.1
= control target key start
LH: loop header
LB: loop body
LE: loop exit
PB: predicated region body
PF: predicated region fallthrough
CT: control target
= control target key end

     0   :  { %s7554_s21 = smov 0   ;;  %s7556_s22 = smov 0   ;;  %s10549_s0 = inlined_call_operand.vmem [shape: f32[3,224,90], index: 0, kind: input, shape index: {}]   ;;  %s10550_s1 = inlined_call_operand.vmem [shape: bf16[6,90,224], index: 1, kind: input, shape index: {}]   ;;  %s10551_s2 = inlined_call_operand.vmem [shape: f32[1,224], index: 2, kind: input, shape index: {}]   ;;  %s10552_s3 = inlined_call_operand.vmem [shape: bf16[2,56,112], index: 3, kind: input, shape index: {}]   ;;  %s10553_s4 = inlined_call_operand.vmem [shape: bf16[3,48,56], index: 4, kind: input, shape index: {}]   ;;  %s10554_s5 = inlined_call_operand.vmem [shape: bf16[6,224,192], index: 5, kind: input, shape index: {}]   ;;  %s10555_s6 = inlined_call_operand.vmem [shape: f32[1,192], index: 6, kind: input, shape index: {}]   ;;  %s10556_s7 = inlined_call_operand.vmem [shape: bf16[2,48,48], index: 7, kind: input, shape index: {}]   ;;  %s10557_s8 = inlined_call_operand.vmem [shape: bf16[1152,128], index: 8, kind: input, shape index: {}]   ;;  %s10558_s9 = inlined_call_operand.vmem [shape: f32[1,128], index: 9, kind: input, shape index: {}]   ;;  %s10559_s10 = inlined_call_operand.vmem [shape: bf16[128,128], index: 10, kind: input, shape index: {}]   ;;  %s10560_s11 = inlined_call_operand.vmem [shape: f32[1,128], index: 11, kind: input, shape index: {}]   ;;  %s10561_s12 = inlined_call_operand.vmem [shape: f32[2,8,128], index: 12, kind: output, shape index: {}]  }
   0x1   :  { %s7558_s23 = smov 0  }
   0x2 LB: > { %s7571_s25 = sadd.s32 1, %s7486_s23   ;;  %s29_s27 = sadd.s32 1, %s7482_s22  ;;  %s7486_s23 = sphi %s7558_s23, %s10574_s23   ;;  %s7482_s22 = sphi %s7556_s22, %s10573_s22   ;;  %s7478_s21 = sphi %s7554_s21, %s10572_s21  }
   0x3   : > { %s26_s26 = ssub.s32 %s7486_s23, %s7571_s25  ;;  %p36_p1 = scmp.ne.s32.totalorder %s7482_s22, %s7478_s21 }
   0x4   : > { %p27_p0 = scmp.eq.s32.totalorder %s26_s26, 0  ;;  %p37_p2 = scmp.eq.s32.totalorder %s7486_s23, 0 }
   0x5   : > { %p5299_p4 = scmp.ge.s32.totalorder %s7486_s23, 2 }
   0x6   : > { %s7580_s28 = scalar_select %p27_p0, %s7482_s22, %s29_s27  }
   0x7   : > { %p38_p3 = por %p37_p2, %p36_p1  ;;  %352 = sbr.rel (%p5299_p4) target bundleno = 59 (0x3b), region = 60 }
   0xc   : > { %355 = sbr.rel (!%p38_p3) target bundleno = 59 (0x3b), region = 64  ;;  %s357_s29 = sand.u32 (%p38_p3), 1, %s7482_s22  }
   0xd   : > { %s7088_s30 = smul.u32 (%p38_p3), 112, %s7486_s23 }
   0xe   : > { %s7430_s13 = smul.u32 (%p38_p3), 336, %s357_s29 }
   0xf   : > { %s7588_s16 = scalar_lea.vmem (%p38_p3), %s10549_s0, %s7088_s30 }
  0x10   : > { %v473_v0 = vld [vmem:[%s7588_s16] sm:$0xff] (%p38_p3)  ;;  %v475_v1 = vld [vmem:[%s7588_s16 + $0x8] sm:$0xff] (%p38_p3)  ;;  %v477_v2 = vld [vmem:[%s7588_s16 + $0x10] sm:$0xff] (%p38_p3)  ;;  %s7593_s17 = scalar_lea.vmem (%p38_p3), [#allocation3], %s7430_s13 }
  0x11   : > { %474 = vst [vmem:[%s7593_s17] sm:$0xff] %v473_v0  ;;  %v479_v3 = vld [vmem:[%s7588_s16 + $0x18] sm:$0xff]  ;;  %v481_v4 = vld [vmem:[%s7588_s16 + $0x20] sm:$0xff]  ;;  %v483_v5 = vld [vmem:[%s7588_s16 + $0x28] sm:$0xff] }
  0x12   : > { %476 = vst [vmem:[%s7593_s17 + $0x8] sm:$0xff] %v475_v1  ;;  %v485_v6 = vld [vmem:[%s7588_s16 + $0x30] sm:$0xff]  ;;  %v487_v7 = vld [vmem:[%s7588_s16 + $0x38] sm:$0xff]  ;;  %v489_v8 = vld [vmem:[%s7588_s16 + $0x40] sm:$0xff] }
  0x13   : > { %478 = vst [vmem:[%s7593_s17 + $0x10] sm:$0xff] %v477_v2  ;;  %v491_v9 = vld [vmem:[%s7588_s16 + $0x48] sm:$0xff]  ;;  %v493_v10 = vld [vmem:[%s7588_s16 + $0x50] sm:$0xff]  ;;  %v495_v11 = vld [vmem:[%s7588_s16 + $0x58] sm:$0xff] }
  0x14   : > { %480 = vst [vmem:[%s7593_s17 + $0x18] sm:$0xff] %v479_v3  ;;  %v497_v12 = vld [vmem:[%s7588_s16 + $0x60] sm:$0xff]  ;;  %v499_v13 = vld [vmem:[%s7588_s16 + $0x68] sm:$0xff]  ;;  %v505_v16 = vld [vmem:[%s7588_s16 + $0xf0] sm:$0xff] }
  0x15   : > { %482 = vst [vmem:[%s7593_s17 + $0x20] sm:$0xff] %v481_v4  ;;  %v501_v14 = vld [vmem:[%s7588_s16 + $0xe0] sm:$0xff]  ;;  %v503_v15 = vld [vmem:[%s7588_s16 + $0xe8] sm:$0xff]  ;;  %v507_v17 = vld [vmem:[%s7588_s16 + $0xf8] sm:$0xff] }
  0x16   : > { %484 = vst [vmem:[%s7593_s17 + $0x28] sm:$0xff] %v483_v5  ;;  %v509_v18 = vld [vmem:[%s7588_s16 + $0x100] sm:$0xff]  ;;  %v511_v19 = vld [vmem:[%s7588_s16 + $0x108] sm:$0xff]  ;;  %v513_v20 = vld [vmem:[%s7588_s16 + $0x110] sm:$0xff] }
  0x17   : > { %486 = vst [vmem:[%s7593_s17 + $0x30] sm:$0xff] %v485_v6  ;;  %v515_v21 = vld [vmem:[%s7588_s16 + $0x118] sm:$0xff]  ;;  %v517_v22 = vld [vmem:[%s7588_s16 + $0x120] sm:$0xff]  ;;  %v519_v23 = vld [vmem:[%s7588_s16 + $0x128] sm:$0xff] }
  0x18   : > { %488 = vst [vmem:[%s7593_s17 + $0x38] sm:$0xff] %v487_v7  ;;  %v521_v24 = vld [vmem:[%s7588_s16 + $0x130] sm:$0xff]  ;;  %v523_v25 = vld [vmem:[%s7588_s16 + $0x138] sm:$0xff]  ;;  %v525_v26 = vld [vmem:[%s7588_s16 + $0x140] sm:$0xff] }
  0x19   : > { %490 = vst [vmem:[%s7593_s17 + $0x40] sm:$0xff] %v489_v8  ;;  %v527_v27 = vld [vmem:[%s7588_s16 + $0x148] sm:$0xff]  ;;  %v529_v28 = vld [vmem:[%s7588_s16 + $0x1c0] sm:$0xff]  ;;  %v533_v30 = vld [vmem:[%s7588_s16 + $0x1d0] sm:$0xff] }
  0x1a   : > { %492 = vst [vmem:[%s7593_s17 + $0x48] sm:$0xff] %v491_v9  ;;  %v531_v29 = vld [vmem:[%s7588_s16 + $0x1c8] sm:$0xff]  ;;  %v535_v31 = vld [vmem:[%s7588_s16 + $0x1d8] sm:$0xff]  ;;  %v537_v32 = vld [vmem:[%s7588_s16 + $0x1e0] sm:$0xff] }
  0x1b   : > { %494 = vst [vmem:[%s7593_s17 + $0x50] sm:$0xff] %v493_v10  ;;  %v539_v33 = vld [vmem:[%s7588_s16 + $0x1e8] sm:$0xff]  ;;  %v541_v34 = vld [vmem:[%s7588_s16 + $0x1f0] sm:$0xff]  ;;  %v543_v35 = vld [vmem:[%s7588_s16 + $0x1f8] sm:$0xff] }
  0x1c   : > { %496 = vst [vmem:[%s7593_s17 + $0x58] sm:$0xff] %v495_v11  ;;  %v545_v36 = vld [vmem:[%s7588_s16 + $0x200] sm:$0xff]  ;;  %v547_v37 = vld [vmem:[%s7588_s16 + $0x208] sm:$0xff]  ;;  %v549_v38 = vld [vmem:[%s7588_s16 + $0x210] sm:$0xff] }
  0x1d   : > { %498 = vst [vmem:[%s7593_s17 + $0x60] sm:$0xff] %v497_v12  ;;  %v551_v39 = vld [vmem:[%s7588_s16 + $0x218] sm:$0xff]  ;;  %v553_v40 = vld [vmem:[%s7588_s16 + $0x220] sm:$0xff]  ;;  %v555_v41 = vld [vmem:[%s7588_s16 + $0x228] sm:$0xff] }
  0x1e   : > { %500 = vst [vmem:[%s7593_s17 + $0x68] sm:$0xff] %v499_v13 }
  0x1f   : > { %502 = vst [vmem:[%s7593_s17 + $0x70] sm:$0xff] %v501_v14 }
  0x20   : > { %504 = vst [vmem:[%s7593_s17 + $0x78] sm:$0xff] %v503_v15 }
  0x21   : > { %506 = vst [vmem:[%s7593_s17 + $0x80] sm:$0xff] %v505_v16 }
  0x22   : > { %508 = vst [vmem:[%s7593_s17 + $0x88] sm:$0xff] %v507_v17 }
  0x23   : > { %510 = vst [vmem:[%s7593_s17 + $0x90] sm:$0xff] %v509_v18 }
  0x24   : > { %512 = vst [vmem:[%s7593_s17 + $0x98] sm:$0xff] %v511_v19 }
  0x25   : > { %514 = vst [vmem:[%s7593_s17 + $0xa0] sm:$0xff] %v513_v20 }
  0x26   : > { %516 = vst [vmem:[%s7593_s17 + $0xa8] sm:$0xff] %v515_v21 }
  0x27   : > { %518 = vst [vmem:[%s7593_s17 + $0xb0] sm:$0xff] %v517_v22 }
  0x28   : > { %520 = vst [vmem:[%s7593_s17 + $0xb8] sm:$0xff] %v519_v23 }
  0x29   : > { %522 = vst [vmem:[%s7593_s17 + $0xc0] sm:$0xff] %v521_v24 }
  0x2a   : > { %524 = vst [vmem:[%s7593_s17 + $0xc8] sm:$0xff] %v523_v25 }
  0x2b   : > { %526 = vst [vmem:[%s7593_s17 + $0xd0] sm:$0xff] %v525_v26 }
  0x2c   : > { %528 = vst [vmem:[%s7593_s17 + $0xd8] sm:$0xff] %v527_v27 }
  0x2d   : > { %530 = vst [vmem:[%s7593_s17 + $0xe0] sm:$0xff] %v529_v28 }
  0x2e   : > { %532 = vst [vmem:[%s7593_s17 + $0xe8] sm:$0xff] %v531_v29 }
  0x2f   : > { %534 = vst [vmem:[%s7593_s17 + $0xf0] sm:$0xff] %v533_v30 }
  0x30   : > { %536 = vst [vmem:[%s7593_s17 + $0xf8] sm:$0xff] %v535_v31 }
  0x31   : > { %538 = vst [vmem:[%s7593_s17 + $0x100] sm:$0xff] %v537_v32 }
  0x32   : > { %540 = vst [vmem:[%s7593_s17 + $0x108] sm:$0xff] %v539_v33 }
  0x33   : > { %542 = vst [vmem:[%s7593_s17 + $0x110] sm:$0xff] %v541_v34 }
  0x34   : > { %544 = vst [vmem:[%s7593_s17 + $0x118] sm:$0xff] %v543_v35 }
  0x35   : > { %546 = vst [vmem:[%s7593_s17 + $0x120] sm:$0xff] %v545_v36 }
  0x36   : > { %548 = vst [vmem:[%s7593_s17 + $0x128] sm:$0xff] %v547_v37 }
  0x37   : > { %550 = vst [vmem:[%s7593_s17 + $0x130] sm:$0xff] %v549_v38 }
  0x38   : > { %552 = vst [vmem:[%s7593_s17 + $0x138] sm:$0xff] %v551_v39 }
  0x39   : > { %554 = vst [vmem:[%s7593_s17 + $0x140] sm:$0xff] %v553_v40 }
  0x3a   : > { %556 = vst [vmem:[%s7593_s17 + $0x148] sm:$0xff] %v555_v41 }
  0x3b PF: > { %p5301_p5 = scmp.ge.s32.totalorder %s7486_s23, 1  ;;  %p561_p6 = scmp.lt.s32.totalorder %s7486_s23, 3 }
  0x3d   : > { %p562_p7 = pnand %p5301_p5, %p561_p6 }
  0x3f   : > { %565 = sbr.rel (%p562_p7) target bundleno = 1950 (0x79e), region = 102 }
  0x44   : > { %v5385_v42 = vld [vmem:[%s10550_s1 + $0xb0] sm:$0xf]  ;;  %v7112_v43 = vld [vmem:[%s10550_s1 + $0xb4] sm:$0x10]  ;;  %vm785_vm0 = vcmask 1044480   ;;  %s568_s18 = sand.u32 1, %s7478_s21  }
  0x45   : > { %v5386_v44 = vor.u32 %v7112_v43, %v5385_v42  ;;  %v7111_v45 = vld [vmem:[%s10550_s1 + $0xb4] sm:$0xf]  ;;  %v5387_v46 = vld [vmem:[%s10550_s1 + $0xb8] sm:$0x10]  ;;  %v5447_v47 = vld [vmem:[%s10550_s1 + $0x50] sm:$0xf] }
  0x46   : > { %v5390_v48 = vor.u32 %v7111_v45, %v5387_v46  ;;  %v7100_v49 = vld [vmem:[%s10550_s1 + $0x54] sm:$0x10]  ;;  %v7099_v50 = vld [vmem:[%s10550_s1 + $0x54] sm:$0xf]  ;;  %v5449_v51 = vld [vmem:[%s10550_s1 + $0x58] sm:$0x10] }
  0x47   : > { %v787_v52 = vsel %vm785_vm0, %v5386_v44, 0  ;;  %v5448_v53 = vor.u32 %v7100_v49, %v5447_v47  ;;  %v5452_v54 = vor.u32 %v7099_v50, %v5449_v51  ;;  %v5377_v55 = vld [vmem:[%s10550_s1 + $0xa0] sm:$0xf]  ;;  %v7110_v56 = vld [vmem:[%s10550_s1 + $0xa4] sm:$0xf0]  ;;  %s7431_s17 = smul.u32 336, %s568_s18 }
  0x48   : > { %794 = vmatpush.bf16.msra.mxu0 %v787_v52  ;;  %v790_v57 = vsel %vm785_vm0, %v5390_v48, 0  ;;  %v5378_v58 = vor.u32 %v7110_v56, %v5377_v55  ;;  %v7109_v59 = vld [vmem:[%s10550_s1 + $0xa4] sm:$0xf]  ;;  %v5379_v60 = vld [vmem:[%s10550_s1 + $0xa8] sm:$0xf0]  ;;  %vm763_vm1 = vcmask 736256  }
  0x49   : > { %838 = vmatpush.bf16.msra.mxu1 %v790_v57  ;;  %v960_v61 = vsel %vm785_vm0, %v5448_v53, 0  ;;  %v963_v62 = vsel %vm785_vm0, %v5452_v54, 0  ;;  %v5382_v63 = vor.u32 %v7109_v59, %v5379_v60  ;;  %v5439_v0 = vld [vmem:[%s10550_s1 + $0x40] sm:$0xf]  ;;  %v7098_v1 = vld [vmem:[%s10550_s1 + $0x44] sm:$0xf0] }
  0x4a   : > { %967 = vmatpush.bf16.msra.mxu2 %v960_v61  ;;  %1011 = vmatpush.bf16.msra.mxu3 %v963_v62  ;;  %v5440_v2 = vor.u32 %v7098_v1, %v5439_v0  ;;  %v7097_v3 = vld [vmem:[%s10550_s1 + $0x44] sm:$0xf]  ;;  %v5441_v4 = vld [vmem:[%s10550_s1 + $0x48] sm:$0xf0]  ;;  %v5369_v5 = vld [vmem:[%s10550_s1 + $0x90] sm:$0xf] }
  0x4b   : > { %v5444_v6 = vor.u32 %v7097_v3, %v5441_v4  ;;  %v7108_v7 = vld [vmem:[%s10550_s1 + $0x94] sm:$0xf0]  ;;  %v7107_v8 = vld [vmem:[%s10550_s1 + $0x94] sm:$0xf]  ;;  %v5371_v9 = vld [vmem:[%s10550_s1 + $0x98] sm:$0xf0] }
  0x4c   : > { %795 = vmatpush.bf16.msra.mxu0 %v5378_v58  ;;  %v5370_v10 = vor.u32 %v7108_v7, %v5369_v5  ;;  %v5431_v11 = vld [vmem:[%s10550_s1 + $0x30] sm:$0xf]  ;;  %v7096_v12 = vld [vmem:[%s10550_s1 + $0x34] sm:$0xf0]  ;;  %v7095_v13 = vld [vmem:[%s10550_s1 + $0x34] sm:$0xf]  ;;  %v5374_v14 = vor.u32 %v7107_v8, %v5371_v9 }
  0x4d   : > { %839 = vmatpush.bf16.msra.mxu1 %v5382_v63  ;;  %v5433_v15 = vld [vmem:[%s10550_s1 + $0x38] sm:$0xf0]  ;;  %v5361_v16 = vld [vmem:[%s10550_s1 + $0x80] sm:$0xf]  ;;  %v7106_v17 = vld [vmem:[%s10550_s1 + $0x84] sm:$0xf0]  ;;  %v5432_v18 = vor.u32 %v7096_v12, %v5431_v11 }
  0x4e   : > { %968 = vmatpush.bf16.msra.mxu2 %v5440_v2  ;;  %1012 = vmatpush.bf16.msra.mxu3 %v5444_v6  ;;  %v5436_v19 = vor.u32 %v7095_v13, %v5433_v15  ;;  %v7105_v20 = vld [vmem:[%s10550_s1 + $0x84] sm:$0xf]  ;;  %v5363_v21 = vld [vmem:[%s10550_s1 + $0x88] sm:$0xf0]  ;;  %v5423_v22 = vld [vmem:[%s10550_s1 + $0x20] sm:$0xf]  ;;  %v5362_v26 = vor.u32 %v7106_v17, %v5361_v16 }
  0x4f   : > { %v7094_v23 = vld [vmem:[%s10550_s1 + $0x24] sm:$0xf0]  ;;  %v7093_v24 = vld [vmem:[%s10550_s1 + $0x24] sm:$0xf]  ;;  %v5425_v25 = vld [vmem:[%s10550_s1 + $0x28] sm:$0xf0]  ;;  %v5366_v27 = vor.u32 %v7105_v20, %v5363_v21 }
  0x50   : > { %796 = vmatpush.bf16.msra.mxu0 %v5370_v10  ;;  %v5353_v28 = vld [vmem:[%s10550_s1 + $0x70] sm:$0xf]  ;;  %v7104_v29 = vld [vmem:[%s10550_s1 + $0x74] sm:$0xf0]  ;;  %v5424_v30 = vor.u32 %v7094_v23, %v5423_v22  ;;  %v5428_v31 = vor.u32 %v7093_v24, %v5425_v25  ;;  %v7103_v32 = vld [vmem:[%s10550_s1 + $0x74] sm:$0xf] }
  0x51   : > { %840 = vmatpush.bf16.msra.mxu1 %v5374_v14  ;;  %v5355_v33 = vld [vmem:[%s10550_s1 + $0x78] sm:$0xf0]  ;;  %v5415_v34 = vld [vmem:[%s10550_s1 + $0x10] sm:$0xf]  ;;  %v7092_v35 = vld [vmem:[%s10550_s1 + $0x14] sm:$0xf0]  ;;  %v5354_v38 = vor.u32 %v7104_v29, %v5353_v28 }
  0x52   : > { %969 = vmatpush.bf16.msra.mxu2 %v5432_v18  ;;  %1013 = vmatpush.bf16.msra.mxu3 %v5436_v19  ;;  %v7091_v36 = vld [vmem:[%s10550_s1 + $0x14] sm:$0xf]  ;;  %v5417_v37 = vld [vmem:[%s10550_s1 + $0x18] sm:$0xf0]  ;;  %v5345_v39 = vld [vmem:[%s10550_s1 + $0x60] sm:$0xf]  ;;  %v5358_v40 = vor.u32 %v7103_v32, %v5355_v33  ;;  %v5416_v42 = vor.u32 %v7092_v35, %v5415_v34 }
  0x53   : > { %v7102_v41 = vld [vmem:[%s10550_s1 + $0x64] sm:$0xf0]  ;;  %v5420_v43 = vor.u32 %v7091_v36, %v5417_v37  ;;  %v7101_v44 = vld [vmem:[%s10550_s1 + $0x64] sm:$0xf]  ;;  %v5347_v45 = vld [vmem:[%s10550_s1 + $0x68] sm:$0xf0] }
  0x54   : > { %797 = vmatpush.bf16.msra.mxu0 %v5362_v26  ;;  %v5407_v46 = vld [vmem:[%s10550_s1] sm:$0xf]  ;;  %v7090_v47 = vld [vmem:[%s10550_s1 + $0x4] sm:$0xf0]  ;;  %v7089_v48 = vld [vmem:[%s10550_s1 + $0x4] sm:$0xf]  ;;  %v5346_v50 = vor.u32 %v7102_v41, %v5345_v39  ;;  %v5350_v53 = vor.u32 %v7101_v44, %v5347_v45 }
  0x55   : > { %841 = vmatpush.bf16.msra.mxu1 %v5366_v27  ;;  %v5409_v49 = vld [vmem:[%s10550_s1 + $0x8] sm:$0xf0]  ;;  %s7829_s20 = scalar_lea.vmem [#allocation3], %s7431_s17  ;;  %v5408_v54 = vor.u32 %v7090_v47, %v5407_v46  ;;  %v5607_v14 = vld [vmem:[%s10550_s1 + $0x1d0] sm:$0xf]  ;;  %vm1329_vm2 = vcmask 785408  }
  0x56   : > { %970 = vmatpush.bf16.msra.mxu2 %v5424_v30  ;;  %1014 = vmatpush.bf16.msra.mxu3 %v5428_v31  ;;  %v5303_v51 = vld [vmem:[%s7829_s20 + $0x70] sm:$0xff]  ;;  %v5304_v52 = vld [vmem:[%s7829_s20 + $0x78] sm:$0xff]  ;;  %v5412_v55 = vor.u32 %v7089_v48, %v5409_v49  ;;  %v614_v56 = vld [vmem:[%s7829_s20] sm:$0xff]  ;;  %vm2087_vm3 = vcmask 916480   ;;  %vm2303_vm4 = vcmask 1043456   ;;  %vm2293_vm5 = vcmask 457728  }
  0x57   : > { %v615_v57 = vld [vmem:[%s7829_s20 + $0x8] sm:$0xff]  ;;  %v7835_v58 = vpack.c.bf16 %v5304_v52, %v5303_v51  ;;  %v5305_v60 = vld [vmem:[%s7829_s20 + $0x80] sm:$0xff]  ;;  %v616_v62 = vld [vmem:[%s7829_s20 + $0x10] sm:$0xff]  ;;  %vm4267_vm6 = vcmask 392192   ;;  %s7488_s21 = smov 64   ;;  %vm4422_vm7 = vcmask 523264  }
  0x58   : > { %798 = vmatpush.bf16.msra.mxu0 %v5354_v38  ;;  %v7837_v59 = vpack.c.bf16 %v615_v57, %v614_v56  ;;  %v5306_v61 = vld [vmem:[%s7829_s20 + $0x88] sm:$0xff]  ;;  %v617_v63 = vld [vmem:[%s7829_s20 + $0x18] sm:$0xff]  ;;  %v5307_v2 = vld [vmem:[%s7829_s20 + $0x90] sm:$0xff]  ;;  %s10570_s27 = sadd.s32 4294967295, %s7486_s23  }
  0x59   : > { %842 = vmatpush.bf16.msra.mxu1 %v5358_v40  ;;  %v7851_v0 = vpack.c.bf16 %v5306_v61, %v5305_v60  ;;  %v7853_v1 = vpack.c.bf16 %v617_v63, %v616_v62  ;;  %v5308_v3 = vld [vmem:[%s7829_s20 + $0x98] sm:$0xff]  ;;  %v618_v4 = vld [vmem:[%s7829_s20 + $0x20] sm:$0xff]  ;;  %v619_v5 = vld [vmem:[%s7829_s20 + $0x28] sm:$0xff]  ;;  %p609_p8 = scmp.lt.s32.totalorder %s10570_s27, 1  ;;  %s10571_s29 = smov %s10570_s27 }
  0x5a   : > { %971 = vmatpush.bf16.msra.mxu2 %v5416_v42  ;;  %1015 = vmatpush.bf16.msra.mxu3 %v5420_v43  ;;  %v7867_v6 = vpack.c.bf16 %v5308_v3, %v5307_v2  ;;  %v7869_v7 = vpack.c.bf16 %v619_v5, %v618_v4  ;;  %v5309_v8 = vld [vmem:[%s7829_s20 + $0xa0] sm:$0xff]  ;;  %v5310_v9 = vld [vmem:[%s7829_s20 + $0xa8] sm:$0xff]  ;;  %v620_v10 = vld [vmem:[%s7829_s20 + $0x30] sm:$0xff] }
  0x5b   : > { %v621_v11 = vld [vmem:[%s7829_s20 + $0x38] sm:$0xff]  ;;  %v7883_v12 = vpack.c.bf16 %v5310_v9, %v5309_v8  ;;  %v7147_v16 = vld [vmem:[%s10550_s1 + $0x1d4] sm:$0xf]  ;;  %v5521_v19 = vld [vmem:[%s10550_s1 + $0x110] sm:$0xf]  ;;  %s10576_s29 = smov (!%p609_p8, %s10571_s29), 1 }
  0x5c   : > { %799 = vmatpush.bf16.msra.mxu0 %v5346_v50  ;;  %v7885_v13 = vpack.c.bf16 %v621_v11, %v620_v10  ;;  %v7148_v15 = vld [vmem:[%s10550_s1 + $0x1d4] sm:$0x10]  ;;  %v5609_v18 = vld [vmem:[%s10550_s1 + $0x1d8] sm:$0x10]  ;;  %v7123_v23 = vld [vmem:[%s10550_s1 + $0x114] sm:$0xf] }
  0x5d   : > { %843 = vmatpush.bf16.msra.mxu1 %v5350_v53  ;;  %v5608_v17 = vor.u32 %v7148_v15, %v5607_v14  ;;  %v7124_v20 = vld [vmem:[%s10550_s1 + $0x114] sm:$0x10]  ;;  %v5612_v21 = vor.u32 %v7147_v16, %v5609_v18  ;;  %v5523_v24 = vld [vmem:[%s10550_s1 + $0x118] sm:$0x10]  ;;  %v5513_v25 = vld [vmem:[%s10550_s1 + $0x100] sm:$0xf] }
  0x5e   : > { %972 = vmatpush.bf16.msra.mxu2 %v5408_v54  ;;  %1016 = vmatpush.bf16.msra.mxu3 %v5412_v55  ;;  %v5522_v22 = vor.u32 %v7124_v20, %v5521_v19  ;;  %v5526_v27 = vor.u32 %v7123_v23, %v5523_v24  ;;  %v7122_v28 = vld [vmem:[%s10550_s1 + $0x104] sm:$0xf0]  ;;  %v7121_v29 = vld [vmem:[%s10550_s1 + $0x104] sm:$0xf]  ;;  %v5515_v32 = vld [vmem:[%s10550_s1 + $0x108] sm:$0xf0] }
  0x5f   : > { %5391 = vmatmul.msk.bf16.vlgmr.msra.gmra.mxu0 %vm763_vm1, %v7835_v58  ;;  %v1442_v26 = vsel %vm785_vm0, %v5608_v17, 0  ;;  %v1445_v30 = vsel %vm785_vm0, %v5612_v21, 0  ;;  %v5599_v33 = vld [vmem:[%s10550_s1 + $0x1c0] sm:$0xf]  ;;  %v5514_v35 = vor.u32 %v7122_v28, %v5513_v25  ;;  %v7146_v36 = vld [vmem:[%s10550_s1 + $0x1c4] sm:$0xf0]  ;;  %v5518_v38 = vor.u32 %v7121_v29, %v5515_v32 }
  0x60   : > { %5398 = vmatmul.msk.bf16.vlgmr.msra.gmra.mxu1 %vm763_vm1, %v7835_v58  ;;  %v1146_v31 = vsel %vm785_vm0, %v5522_v22, 0  ;;  %v1149_v34 = vsel %vm785_vm0, %v5526_v27, 0  ;;  %v7145_v37 = vld [vmem:[%s10550_s1 + $0x1c4] sm:$0xf]  ;;  %v5600_v39 = vor.u32 %v7146_v36, %v5599_v33  ;;  %v5601_v40 = vld [vmem:[%s10550_s1 + $0x1c8] sm:$0xf0] }
  0x61   : > { %5453 = vmatmul.msk.bf16.vlgmr.msra.gmra.mxu2 %vm763_vm1, %v7837_v59  ;;  %5460 = vmatmul.msk.bf16.vlgmr.msra.gmra.mxu3 %vm763_vm1, %v7837_v59  ;;  %v5311_v41 = vld [vmem:[%s7829_s20 + $0xb0] sm:$0xff]  ;;  %v5312_v42 = vld [vmem:[%s7829_s20 + $0xb8] sm:$0xff]  ;;  %v5604_v43 = vor.u32 %v7145_v37, %v5601_v40  ;;  %v622_v44 = vld [vmem:[%s7829_s20 + $0x40] sm:$0xff]  ;;  %s5302_s30 = sshll.u32 %s10576_s29, 3 }
  0x62   : > { %1449 = vmatpush.bf16.msrb.mxu2 %v1442_v26  ;;  %1493 = vmatpush.bf16.msrb.mxu3 %v1445_v30  ;;  %v623_v45 = vld [vmem:[%s7829_s20 + $0x48] sm:$0xff]  ;;  %v7951_v46 = vpack.c.bf16 %v5312_v42, %v5311_v41  ;;  %v5505_v48 = vld [vmem:[%s10550_s1 + $0xf0] sm:$0xf]  ;;  %v7119_v50 = vld [vmem:[%s10550_s1 + $0xf4] sm:$0xf]  ;;  %s612_s15 = scalar_lea.vmem %s10561_s12, %s5302_s30 }
  0x63   : > { %1153 = vmatpush.bf16.msrb.mxu0 %v1146_v31  ;;  %1197 = vmatpush.bf16.msrb.mxu1 %v1149_v34  ;;  %v7953_v47 = vpack.c.bf16 %v623_v45, %v622_v44  ;;  %v7120_v49 = vld [vmem:[%s10550_s1 + $0xf4] sm:$0xf0]  ;;  %v5507_v52 = vld [vmem:[%s10550_s1 + $0xf8] sm:$0xf0]  ;;  %v5591_v53 = vld [vmem:[%s10550_s1 + $0x1b0] sm:$0xf] }
  0x64   : > { %v5506_v51 = vor.u32 %v7120_v49, %v5505_v48  ;;  %v7144_v54 = vld [vmem:[%s10550_s1 + $0x1b4] sm:$0xf0]  ;;  %v5510_v55 = vor.u32 %v7119_v50, %v5507_v52  ;;  %v7143_v57 = vld [vmem:[%s10550_s1 + $0x1b4] sm:$0xf]  ;;  %v5593_v60 = vld [vmem:[%s10550_s1 + $0x1b8] sm:$0xf0] }
  0x65   : > { %v5592_v56 = vor.u32 %v7144_v54, %v5591_v53  ;;  %v5497_v61 = vld [vmem:[%s10550_s1 + $0xe0] sm:$0xf]  ;;  %v5596_v62 = vor.u32 %v7143_v57, %v5593_v60  ;;  %v7118_v63 = vld [vmem:[%s10550_s1 + $0xe4] sm:$0xf0]  ;;  %v7117_v2 = vld [vmem:[%s10550_s1 + $0xe4] sm:$0xf] }
  0x66   : > { %1450 = vmatpush.bf16.msrb.mxu2 %v5600_v39  ;;  %1494 = vmatpush.bf16.msrb.mxu3 %v5604_v43  ;;  %v5499_v3 = vld [vmem:[%s10550_s1 + $0xe8] sm:$0xf0]  ;;  %v5498_v4 = vor.u32 %v7118_v63, %v5497_v61  ;;  %v5583_v8 = vld [vmem:[%s10550_s1 + $0x1a0] sm:$0xf]  ;;  %v7142_v9 = vld [vmem:[%s10550_s1 + $0x1a4] sm:$0xf0] }
  0x67   : > { %1154 = vmatpush.bf16.msrb.mxu0 %v5514_v35  ;;  %1198 = vmatpush.bf16.msrb.mxu1 %v5518_v38  ;;  %v5502_v5 = vor.u32 %v7117_v2, %v5499_v3  ;;  %v7141_v10 = vld [vmem:[%s10550_s1 + $0x1a4] sm:$0xf]  ;;  %v5584_v11 = vor.u32 %v7142_v9, %v5583_v8  ;;  %v5585_v14 = vld [vmem:[%s10550_s1 + $0x1a8] sm:$0xf0]  ;;  %v5489_v15 = vld [vmem:[%s10550_s1 + $0xd0] sm:$0xf] }
  0x68   : > { %v7116_v16 = vld [vmem:[%s10550_s1 + $0xd4] sm:$0xf0]  ;;  %v5588_v17 = vor.u32 %v7141_v10, %v5585_v14  ;;  %v7115_v18 = vld [vmem:[%s10550_s1 + $0xd4] sm:$0xf]  ;;  %v5491_v19 = vld [vmem:[%s10550_s1 + $0xd8] sm:$0xf0] }
  0x69   : > { %v5575_v20 = vld [vmem:[%s10550_s1 + $0x190] sm:$0xf]  ;;  %v5490_v21 = vor.u32 %v7116_v16, %v5489_v15  ;;  %v7140_v22 = vld [vmem:[%s10550_s1 + $0x194] sm:$0xf0]  ;;  %v7139_v23 = vld [vmem:[%s10550_s1 + $0x194] sm:$0xf]  ;;  %v5494_v26 = vor.u32 %v7115_v18, %v5491_v19 }
  0x6a   : > { %1451 = vmatpush.bf16.msrb.mxu2 %v5592_v56  ;;  %1495 = vmatpush.bf16.msrb.mxu3 %v5596_v62  ;;  %v5577_v24 = vld [vmem:[%s10550_s1 + $0x198] sm:$0xf0]  ;;  %v5313_v25 = vld [vmem:[%s7829_s20 + $0xc0] sm:$0xff]  ;;  %v5576_v27 = vor.u32 %v7140_v22, %v5575_v20  ;;  %v7114_v29 = vld [vmem:[%s10550_s1 + $0xc4] sm:$0xf0] }
  0x6b   : > { %1155 = vmatpush.bf16.msrb.mxu0 %v5506_v51  ;;  %1199 = vmatpush.bf16.msrb.mxu1 %v5510_v55  ;;  %v5481_v28 = vld [vmem:[%s10550_s1 + $0xc0] sm:$0xf]  ;;  %v5314_v30 = vld [vmem:[%s7829_s20 + $0xc8] sm:$0xff]  ;;  %v5580_v31 = vor.u32 %v7139_v23, %v5577_v24  ;;  %v7113_v32 = vld [vmem:[%s10550_s1 + $0xc4] sm:$0xf] }
  0x6c   : > { %v5483_v33 = vld [vmem:[%s10550_s1 + $0xc8] sm:$0xf0]  ;;  %v5567_v34 = vld [vmem:[%s10550_s1 + $0x180] sm:$0xf]  ;;  %v7138_v35 = vld [vmem:[%s10550_s1 + $0x184] sm:$0xf0]  ;;  %v5482_v38 = vor.u32 %v7114_v29, %v5481_v28  ;;  %v8057_v39 = vpack.c.bf16 %v5314_v30, %v5313_v25 }
  0x6d   : > { %v624_v36 = vld [vmem:[%s7829_s20 + $0x50] sm:$0xff]  ;;  %v625_v37 = vld [vmem:[%s7829_s20 + $0x58] sm:$0xff]  ;;  %v5486_v40 = vor.u32 %v7113_v32, %v5483_v33  ;;  %v5568_v43 = vor.u32 %v7138_v35, %v5567_v34  ;;  %v626_v50 = vld [vmem:[%s7829_s20 + $0x60] sm:$0xff] }
  0x6e   : > { %1452 = vmatpush.bf16.msrb.mxu2 %v5584_v11  ;;  %1496 = vmatpush.bf16.msrb.mxu3 %v5588_v17  ;;  %v7137_v41 = vld [vmem:[%s10550_s1 + $0x184] sm:$0xf]  ;;  %v5569_v42 = vld [vmem:[%s10550_s1 + $0x188] sm:$0xf0]  ;;  %v8065_v44 = vpack.c.bf16 %v625_v37, %v624_v36 }
  0x6f   : > { %5392 = vmatmul.msk.bf16.gmra.mxu0 %vm763_vm1, %v7851_v0  ;;  %1200 = vmatpush.bf16.msrb.mxu1 %v5502_v5  ;;  %v5572_v45 = vor.u32 %v7137_v41, %v5569_v42  ;;  %v5315_v48 = vld [vmem:[%s7829_s20 + $0xd0] sm:$0xff]  ;;  %v5316_v49 = vld [vmem:[%s7829_s20 + $0xd8] sm:$0xff]  ;;  %v627_v51 = vld [vmem:[%s7829_s20 + $0x68] sm:$0xff] }
  0x70   : > { %5399 = vmatmul.msk.bf16.gmra.mxu1 %vm763_vm1, %v7851_v0  ;;  %1156 = vmatpush.bf16.msrb.mxu0 %v5498_v4  ;;  %v8079_v52 = vpack.c.bf16 %v5316_v49, %v5315_v48  ;;  %v8081_v53 = vpack.c.bf16 %v627_v51, %v626_v50  ;;  %v5317_v54 = vld [vmem:[%s7829_s20 + $0xe0] sm:$0xff]  ;;  %v5318_v55 = vld [vmem:[%s7829_s20 + $0xe8] sm:$0xff]  ;;  %v5319_v57 = vld [vmem:[%s7829_s20 + $0xf0] sm:$0xff] }
  0x71   : > { %5454 = vmatmul.msk.bf16.gmra.mxu2 %vm763_vm1, %v7853_v1  ;;  %5461 = vmatmul.msk.bf16.gmra.mxu3 %vm763_vm1, %v7853_v1  ;;  %v8093_v56 = vpack.c.bf16 %v5318_v55, %v5317_v54  ;;  %v5320_v60 = vld [vmem:[%s7829_s20 + $0xf8] sm:$0xff]  ;;  %v5321_v9 = vld [vmem:[%s7829_s20 + $0x100] sm:$0xff]  ;;  %v5322_v10 = vld [vmem:[%s7829_s20 + $0x108] sm:$0xff] }
  0x72   : > { %1453 = vmatpush.bf16.msrb.mxu2 %v5576_v27  ;;  %1497 = vmatpush.bf16.msrb.mxu3 %v5580_v31  ;;  %v8105_v61 = vpack.c.bf16 %v5320_v60, %v5319_v57  ;;  %v8121_v11 = vpack.c.bf16 %v5322_v10, %v5321_v9  ;;  %v5323_v25 = vld [vmem:[%s7829_s20 + $0x110] sm:$0xff]  ;;  %v7160_v41 = vld [vmem:[%s10550_s1 + $0x234] sm:$0x10]  ;;  %v5671_v54 = vld [vmem:[%s10550_s1 + $0x178] sm:$0x10] }
  0x73   : > { %1201 = vmatpush.bf16.msrb.mxu1 %v5494_v26  ;;  %v5324_v26 = vld [vmem:[%s7829_s20 + $0x118] sm:$0xff]  ;;  %v7135_v51 = vld [vmem:[%s10550_s1 + $0x174] sm:$0xf]  ;;  %v5326_v57 = vld [vmem:[%s7829_s20 + $0x128] sm:$0xff] }
  0x74   : > { %1157 = vmatpush.bf16.msrb.mxu0 %v5490_v21  ;;  %v8141_v27 = vpack.c.bf16 %v5324_v26, %v5323_v25  ;;  %v7136_v48 = vld [vmem:[%s10550_s1 + $0x174] sm:$0x10]  ;;  %v5325_v55 = vld [vmem:[%s7829_s20 + $0x120] sm:$0xff]  ;;  %v7134_v9 = vld [vmem:[%s10550_s1 + $0x164] sm:$0xf0] }
  0x75   : > { %v7133_v10 = vld [vmem:[%s10550_s1 + $0x164] sm:$0xf] }
  0x76   : > { %1454 = vmatpush.bf16.msrb.mxu2 %v5568_v43  ;;  %1498 = vmatpush.bf16.msrb.mxu3 %v5572_v45  ;;  %v5745_v43 = vld [vmem:[%s10550_s1 + $0x238] sm:$0x10]  ;;  %v5669_v45 = vld [vmem:[%s10550_s1 + $0x170] sm:$0xf] }
  0x77   : > { %1202 = vmatpush.bf16.msrb.mxu1 %v5486_v40  ;;  %v5743_v40 = vld [vmem:[%s10550_s1 + $0x230] sm:$0xf]  ;;  %v5670_v50 = vor.u32 %v7136_v48, %v5669_v45  ;;  %v7155_v48 = vld [vmem:[%s10550_s1 + $0x214] sm:$0xf] }
  0x78   : > { %1158 = vmatpush.bf16.msrb.mxu0 %v5482_v38  ;;  %v5744_v42 = vor.u32 %v7160_v41, %v5743_v40  ;;  %v5655_v41 = vld [vmem:[%s10550_s1 + $0x158] sm:$0xf0] }
  0x7a   : > { %v1759_v60 = vsel %vm785_vm0, %v5744_v42, 0  ;;  %v7156_v42 = vld [vmem:[%s10550_s1 + $0x214] sm:$0xf0] }
  0x7b   : > { %1766 = vmatpush.bf16.msra.mxu2 %v1759_v60 }
  0x7f   : > { %5393 = vmatmul.msk.bf16.gmra.mxu0 %vm763_vm1, %v7867_v6 }
  0x80   : > { %5400 = vmatmul.msk.bf16.gmra.mxu1 %vm763_vm1, %v7867_v6 }
  0x81   : > { %5455 = vmatmul.msk.bf16.gmra.mxu2 %vm763_vm1, %v7869_v7  ;;  %5462 = vmatmul.msk.bf16.gmra.mxu3 %vm763_vm1, %v7869_v7 }
  0x8f   : > { %5394 = vmatmul.msk.bf16.gmra.mxu0 %vm763_vm1, %v7883_v12 }
  0x90   : > { %5401 = vmatmul.msk.bf16.gmra.mxu1 %vm763_vm1, %v7883_v12 }
  0x91   : > { %5456 = vmatmul.msk.bf16.gmra.mxu2 %vm763_vm1, %v7885_v13  ;;  %5463 = vmatmul.msk.bf16.gmra.mxu3 %vm763_vm1, %v7885_v13 }
  0x9f   : > { %5395 = vmatmul.msk.bf16.gmra.mxu0 %vm763_vm1, %v7951_v46 }
  0xa0   : > { %5402 = vmatmul.msk.bf16.gmra.mxu1 %vm763_vm1, %v7951_v46 }
  0xa1   : > { %5457 = vmatmul.msk.bf16.gmra.mxu2 %vm763_vm1, %v7953_v47  ;;  %5464 = vmatmul.msk.bf16.gmra.mxu3 %vm763_vm1, %v7953_v47 }
  0xaf   : > { %5396 = vmatmul.msk.bf16.gmra.mxu0 %vm763_vm1, %v8057_v39 }
  0xb0   : > { %5403 = vmatmul.msk.bf16.gmra.mxu1 %vm763_vm1, %v8057_v39 }
  0xb1   : > { %5458 = vmatmul.msk.bf16.gmra.mxu2 %vm763_vm1, %v8065_v44  ;;  %5465 = vmatmul.msk.bf16.gmra.mxu3 %vm763_vm1, %v8065_v44 }
  0xbf   : > { %5397 = vmatmul.msk.bf16.gmra.mxu0 %vm763_vm1, %v8079_v52 }
  0xc0   : > { %5404 = vmatmul.msk.bf16.gmra.mxu1 %vm763_vm1, %v8079_v52 }
  0xc1   : > { %5459 = vmatmul.msk.bf16.gmra.mxu2 %vm763_vm1, %v8081_v53  ;;  %5466 = vmatmul.msk.bf16.gmra.mxu3 %vm763_vm1, %v8081_v53 }
  0xcf   : > { %5527 = vmatmul.msk.bf16.vlgmr.msrb.gmra.mxu0 %vm763_vm1, %v8093_v56 }
  0xd0   : > { %5534 = vmatmul.msk.bf16.vlgmr.msrb.gmra.mxu1 %vm763_vm1, %v8093_v56 }
  0xd1   : > { %5613 = vmatmul.msk.bf16.vlgmr.msrb.gmra.mxu2 %vm763_vm1, %v7835_v58  ;;  %5620 = vmatmul.msk.bf16.vlgmr.msrb.gmra.mxu3 %vm763_vm1, %v7835_v58 }
  0xdc   : > { %v801_v62 = vpop.f32.mrf.mxu0 }
  0xdd   : > { %v845_v63 = vpop.f32.mrf.mxu1 }
  0xdf   : > { %5528 = vmatmul.msk.bf16.gmra.mxu0 %vm763_vm1, %v8105_v61 }
  0xe0   : > { %5535 = vmatmul.msk.bf16.gmra.mxu1 %vm763_vm1, %v8105_v61 }
  0xe1   : > { %5614 = vmatmul.msk.bf16.gmra.mxu2 %vm763_vm1, %v7851_v0  ;;  %5621 = vmatmul.msk.bf16.gmra.mxu3 %vm763_vm1, %v7851_v0 }
  0xe4   : > { %v974_v58 = vpop.f32.mrf.mxu2  ;;  %v1018_v2 = vpop.f32.mrf.mxu3 }
  0xe5   : > { %v8115_v3 = vadd.f32 %v974_v58, %v801_v62  ;;  %v8117_v4 = vadd.f32 %v1018_v2, %v845_v63  ;;  %v803_v5 = vpop.f32.mrf.mxu0  ;;  %v847_v8 = vpop.f32.mrf.mxu1  ;;  %v5674_v62 = vor.u32 %v7135_v51, %v5671_v54  ;;  %v1594_v58 = vsel %vm785_vm0, %v5670_v50, 0  ;;  %v5645_v51 = vld [vmem:[%s10550_s1 + $0x140] sm:$0xf]  ;;  %v7129_v54 = vld [vmem:[%s10550_s1 + $0x144] sm:$0xf] }
  0xe6   : > { %1601 = vmatpush.bf16.msra.mxu0 %v1594_v58  ;;  %v7154_v58 = vld [vmem:[%s10550_s1 + $0x204] sm:$0xf0] }
  0xe7   : > { %v1597_v2 = vsel %vm785_vm0, %v5674_v62, 0  ;;  %v5647_v62 = vld [vmem:[%s10550_s1 + $0x148] sm:$0xf0] }
  0xe8   : > { %1645 = vmatpush.bf16.msra.mxu1 %v1597_v2 }
  0xec   : > { %v976_v14 = vpop.f32.mrf.mxu2  ;;  %v1020_v15 = vpop.f32.mrf.mxu3 }
  0xed   : > { %v8123_v16 = vadd.f32 %v976_v14, %v803_v5  ;;  %v8125_v17 = vadd.f32 %v1020_v15, %v847_v8  ;;  %v806_v0 = vpop.f32.mrf.mxu0  ;;  %v850_v18 = vpop.f32.mrf.mxu1  ;;  %v8189_v5 = vpack.c.bf16 %v5326_v57, %v5325_v55  ;;  %v5661_v8 = vld [vmem:[%s10550_s1 + $0x160] sm:$0xf] }
  0xef   : > { %5529 = vmatmul.msk.bf16.gmra.mxu0 %vm763_vm1, %v8121_v11 }
  0xf0   : > { %5536 = vmatmul.msk.bf16.gmra.mxu1 %vm763_vm1, %v8121_v11 }
  0xf1   : > { %5615 = vmatmul.msk.bf16.gmra.mxu2 %vm763_vm1, %v7867_v6  ;;  %5622 = vmatmul.msk.bf16.gmra.mxu3 %vm763_vm1, %v7867_v6 }
  0xf4   : > { %v979_v19 = vpop.f32.mrf.mxu2  ;;  %v1023_v20 = vpop.f32.mrf.mxu3 }
  0xf5   : > { %v8135_v21 = vadd.f32 %v979_v19, %v806_v0  ;;  %v8137_v22 = vadd.f32 %v1023_v20, %v850_v18  ;;  %v808_v23 = vpop.f32.mrf.mxu0  ;;  %v852_v24 = vpop.f32.mrf.mxu1  ;;  %v5662_v0 = vor.u32 %v7134_v9, %v5661_v8  ;;  %v5663_v18 = vld [vmem:[%s10550_s1 + $0x168] sm:$0xf0]  ;;  %v5735_v19 = vld [vmem:[%s10550_s1 + $0x220] sm:$0xf]  ;;  %v7158_v20 = vld [vmem:[%s10550_s1 + $0x224] sm:$0xf0] }
  0xf7   : > { %1602 = vmatpush.bf16.msra.mxu0 %v5662_v0  ;;  %v7153_v0 = vld [vmem:[%s10550_s1 + $0x204] sm:$0xf] }
  0xfc   : > { %v981_v28 = vpop.f32.mrf.mxu2  ;;  %v1025_v29 = vpop.f32.mrf.mxu3 }
  0xfd   : > { %v8143_v30 = vadd.f32 %v981_v28, %v808_v23  ;;  %v8145_v31 = vadd.f32 %v1025_v29, %v852_v24  ;;  %v811_v32 = vpop.f32.mrf.mxu0  ;;  %v855_v6 = vpop.f32.mrf.mxu1  ;;  %v5666_v28 = vor.u32 %v7133_v10, %v5663_v18  ;;  %v5736_v29 = vor.u32 %v7158_v20, %v5735_v19  ;;  %v5721_v18 = vld [vmem:[%s10550_s1 + $0x208] sm:$0xf0]  ;;  %v5637_v19 = vld [vmem:[%s10550_s1 + $0x130] sm:$0xf] }
  0xfe   : > { %v5724_v20 = vor.u32 %v7153_v0, %v5721_v18  ;;  %v5705_v0 = vld [vmem:[%s10550_s1 + $0x1e8] sm:$0xf0] }
  0xff   : > { %5530 = vmatmul.msk.bf16.gmra.mxu0 %vm763_vm1, %v8141_v27  ;;  %1646 = vmatpush.bf16.msra.mxu1 %v5666_v28  ;;  %v5639_v28 = vld [vmem:[%s10550_s1 + $0x138] sm:$0xf0] }
 0x100   : > { %5537 = vmatmul.msk.bf16.gmra.mxu1 %vm763_vm1, %v8141_v27  ;;  %1767 = vmatpush.bf16.msra.mxu2 %v5736_v29 }
 0x101   : > { %5616 = vmatmul.msk.bf16.gmra.mxu2 %vm763_vm1, %v7883_v12  ;;  %5623 = vmatmul.msk.bf16.gmra.mxu3 %vm763_vm1, %v7883_v12  ;;  %v7159_v12 = vld [vmem:[%s10550_s1 + $0x234] sm:$0xf] }
 0x102   : > { %v5748_v49 = vor.u32 %v7159_v12, %v5745_v43  ;;  %v5727_v12 = vld [vmem:[%s10550_s1 + $0x210] sm:$0xf] }
 0x103   : > { %v5728_v45 = vor.u32 %v7156_v42, %v5727_v12 }
 0x104   : > { %v984_v33 = vpop.f32.mrf.mxu2  ;;  %v1028_v34 = vpop.f32.mrf.mxu3  ;;  %v1762_v63 = vsel %vm785_vm0, %v5748_v49, 0  ;;  %v5729_v49 = vld [vmem:[%s10550_s1 + $0x218] sm:$0xf0] }
 0x105   : > { %v8155_v35 = vadd.f32 %v984_v33, %v811_v32  ;;  %v8157_v36 = vadd.f32 %v1028_v34, %v855_v6  ;;  %v813_v37 = vpop.f32.mrf.mxu0  ;;  %v857_v38 = vpop.f32.mrf.mxu1  ;;  %1810 = vmatpush.bf16.msra.mxu3 %v1762_v63  ;;  %v7157_v32 = vld [vmem:[%s10550_s1 + $0x224] sm:$0xf]  ;;  %v5737_v6 = vld [vmem:[%s10550_s1 + $0x228] sm:$0xf0]  ;;  %v5653_v34 = vld [vmem:[%s10550_s1 + $0x150] sm:$0xf]  ;;  %v5732_v50 = vor.u32 %v7155_v48, %v5729_v49  ;;  %1768 = vmatpush.bf16.msra.mxu2 %v5728_v45 }
 0x106   : > { %v5740_v33 = vor.u32 %v7157_v32, %v5737_v6  ;;  %v5719_v63 = vld [vmem:[%s10550_s1 + $0x200] sm:$0xf]  ;;  %v5711_v6 = vld [vmem:[%s10550_s1 + $0x1f0] sm:$0xf]  ;;  %v7126_v45 = vld [vmem:[%s10550_s1 + $0x124] sm:$0xf0] }
 0x107   : > { %v7125_v48 = vld [vmem:[%s10550_s1 + $0x124] sm:$0xf] }
 0x109   : > { %1811 = vmatpush.bf16.msra.mxu3 %v5740_v33  ;;  %v7152_v33 = vld [vmem:[%s10550_s1 + $0x1f4] sm:$0xf0] }
 0x10c   : > { %v986_v14 = vpop.f32.mrf.mxu2  ;;  %v1030_v15 = vpop.f32.mrf.mxu3 }
 0x10d   : > { %v8209_v23 = vadd.f32 %v986_v14, %v813_v37  ;;  %v8211_v24 = vadd.f32 %v1030_v15, %v857_v38  ;;  %v816_v25 = vpop.f32.mrf.mxu0  ;;  %v860_v26 = vpop.f32.mrf.mxu1  ;;  %v7132_v37 = vld [vmem:[%s10550_s1 + $0x154] sm:$0xf0]  ;;  %v7131_v38 = vld [vmem:[%s10550_s1 + $0x154] sm:$0xf]  ;;  %v5650_v14 = vor.u32 %v7129_v54, %v5647_v62  ;;  %v5720_v15 = vor.u32 %v7154_v58, %v5719_v63  ;;  %1812 = vmatpush.bf16.msra.mxu3 %v5732_v50  ;;  %v5703_v54 = vld [vmem:[%s10550_s1 + $0x1e0] sm:$0xf] }
 0x10e   : > { %v5654_v40 = vor.u32 %v7132_v37, %v5653_v34  ;;  %v5658_v43 = vor.u32 %v7131_v38, %v5655_v41  ;;  %v7151_v34 = vld [vmem:[%s10550_s1 + $0x1f4] sm:$0xf]  ;;  %v5328_v38 = vld [vmem:[%s7829_s20 + $0x138] sm:$0xff] }
 0x10f   : > { %5531 = vmatmul.msk.bf16.gmra.mxu0 %vm763_vm1, %v8189_v5  ;;  %v5327_v37 = vld [vmem:[%s7829_s20 + $0x130] sm:$0xff]  ;;  %1769 = vmatpush.bf16.msra.mxu2 %v5720_v15  ;;  %v5713_v41 = vld [vmem:[%s10550_s1 + $0x1f8] sm:$0xf0] }
 0x110   : > { %5538 = vmatmul.msk.bf16.gmra.mxu1 %vm763_vm1, %v8189_v5  ;;  %1603 = vmatpush.bf16.msra.mxu0 %v5654_v40  ;;  %v5712_v40 = vor.u32 %v7152_v33, %v5711_v6  ;;  %v5716_v12 = vor.u32 %v7151_v34, %v5713_v41  ;;  %v8305_v42 = vpack.c.bf16 %v5328_v38, %v5327_v37  ;;  %v7149_v15 = vld [vmem:[%s10550_s1 + $0x1e4] sm:$0xf] }
 0x111   : > { %5617 = vmatmul.msk.bf16.gmra.mxu2 %vm763_vm1, %v7951_v46  ;;  %5624 = vmatmul.msk.bf16.gmra.mxu3 %vm763_vm1, %v7951_v46  ;;  %v7130_v46 = vld [vmem:[%s10550_s1 + $0x144] sm:$0xf0] }
 0x112   : > { %1647 = vmatpush.bf16.msra.mxu1 %v5658_v43  ;;  %v5646_v60 = vor.u32 %v7130_v46, %v5645_v51  ;;  %1813 = vmatpush.bf16.msra.mxu3 %v5724_v20  ;;  %v5629_v43 = vld [vmem:[%s10550_s1 + $0x120] sm:$0xf]  ;;  %v5631_v46 = vld [vmem:[%s10550_s1 + $0x128] sm:$0xf0] }
 0x113   : > { %1770 = vmatpush.bf16.msra.mxu2 %v5712_v40  ;;  %v5630_v51 = vor.u32 %v7126_v45, %v5629_v43  ;;  %v5634_v58 = vor.u32 %v7125_v48, %v5631_v46 }
 0x114   : > { %v989_v55 = vpop.f32.mrf.mxu2  ;;  %v1033_v57 = vpop.f32.mrf.mxu3  ;;  %1604 = vmatpush.bf16.msra.mxu0 %v5646_v60 }
 0x115   : > { %v8269_v2 = vadd.f32 %v989_v55, %v816_v25  ;;  %v8271_v8 = vadd.f32 %v1033_v57, %v860_v26  ;;  %v818_v9 = vpop.f32.mrf.mxu0  ;;  %v862_v10 = vpop.f32.mrf.mxu1  ;;  %v7128_v25 = vld [vmem:[%s10550_s1 + $0x134] sm:$0xf0]  ;;  %v7127_v26 = vld [vmem:[%s10550_s1 + $0x134] sm:$0xf]  ;;  %v7150_v55 = vld [vmem:[%s10550_s1 + $0x1e4] sm:$0xf0] }
 0x116   : > { %1648 = vmatpush.bf16.msra.mxu1 %v5650_v14  ;;  %v5638_v29 = vor.u32 %v7128_v25, %v5637_v19  ;;  %v5642_v32 = vor.u32 %v7127_v26, %v5639_v28  ;;  %v5704_v14 = vor.u32 %v7150_v55, %v5703_v54  ;;  %1814 = vmatpush.bf16.msra.mxu3 %v5716_v12  ;;  %v5329_v28 = vld [vmem:[%s7829_s20 + $0x140] sm:$0xff] }
 0x118   : > { %1605 = vmatpush.bf16.msra.mxu0 %v5638_v29  ;;  %1771 = vmatpush.bf16.msra.mxu2 %v5704_v14  ;;  %v5330_v29 = vld [vmem:[%s7829_s20 + $0x148] sm:$0xff] }
 0x11a   : > { %1649 = vmatpush.bf16.msra.mxu1 %v5642_v32  ;;  %v8349_v32 = vpack.c.bf16 %v5330_v29, %v5329_v28 }
 0x11c   : > { %v991_v49 = vpop.f32.mrf.mxu2  ;;  %v1035_v50 = vpop.f32.mrf.mxu3  ;;  %1606 = vmatpush.bf16.msra.mxu0 %v5630_v51 }
 0x11d   : > { %v8325_v57 = vadd.f32 %v991_v49, %v818_v9  ;;  %v8327_v60 = vadd.f32 %v1035_v50, %v862_v10  ;;  %v821_v62 = vpop.f32.mrf.mxu0  ;;  %v865_v63 = vpop.f32.mrf.mxu1  ;;  %v5708_v9 = vor.u32 %v7149_v15, %v5705_v0  ;;  %v8386_v0 = vld [vmem:[%s10551_s2] sm:$0x3] }
 0x11e   : > { %1650 = vmatpush.bf16.msra.mxu1 %v5634_v58 }
 0x11f   : > { %5532 = vmatmul.msk.bf16.gmra.mxu0 %vm763_vm1, %v8305_v42  ;;  %1815 = vmatpush.bf16.msra.mxu3 %v5708_v9 }
 0x120   : > { %5539 = vmatmul.msk.bf16.gmra.mxu1 %vm763_vm1, %v8305_v42 }
 0x121   : > { %5618 = vmatmul.msk.bf16.gmra.mxu2 %vm763_vm1, %v8057_v39  ;;  %5625 = vmatmul.msk.bf16.gmra.mxu3 %vm763_vm1, %v8057_v39 }
 0x124   : > { %v994_v10 = vpop.f32.mrf.mxu2  ;;  %v1038_v18 = vpop.f32.mrf.mxu3 }
 0x125   : > { %v8343_v19 = vadd.f32 %v994_v10, %v821_v62  ;;  %v8345_v20 = vadd.f32 %v1038_v18, %v865_v63  ;;  %v823_v25 = vpop.f32.mrf.mxu0  ;;  %v867_v26 = vpop.f32.mrf.mxu1  ;;  %v8389_v10 = vperm.slane %v8386_v0, 1 }
 0x12c   : > { %v996_v6 = vpop.f32.mrf.mxu2  ;;  %v1040_v33 = vpop.f32.mrf.mxu3 }
 0x12d   : > { %v8351_v34 = vadd.f32 %v996_v6, %v823_v25  ;;  %v8353_v37 = vadd.f32 %v1040_v33, %v867_v26  ;;  %v826_v39 = vpop.f32.mrf.mxu0  ;;  %v870_v38 = vpop.f32.mrf.mxu1 }
 0x12f   : > { %5533 = vmatmul.msk.bf16.gmra.mxu0 %vm763_vm1, %v8349_v32 }
 0x130   : > { %5540 = vmatmul.msk.bf16.gmra.mxu1 %vm763_vm1, %v8349_v32 }
 0x131   : > { %5619 = vmatmul.msk.bf16.gmra.mxu2 %vm763_vm1, %v8079_v52  ;;  %5626 = vmatmul.msk.bf16.gmra.mxu3 %vm763_vm1, %v8079_v52 }
 0x134   : > { %v999_v40 = vpop.f32.mrf.mxu2  ;;  %v1043_v41 = vpop.f32.mrf.mxu3 }
 0x135   : > { %v8363_v12 = vadd.f32 %v999_v40, %v826_v39  ;;  %v8365_v43 = vadd.f32 %v1043_v41, %v870_v38  ;;  %v828_v45 = vpop.f32.mrf.mxu0  ;;  %v872_v48 = vpop.f32.mrf.mxu1 }
 0x13c   : > { %v1001_v49 = vpop.f32.mrf.mxu2  ;;  %v1045_v50 = vpop.f32.mrf.mxu3 }
 0x13d   : > { %v8367_v51 = vadd.f32 %v1001_v49, %v828_v45  ;;  %v8369_v46 = vadd.f32 %v1045_v50, %v872_v48  ;;  %v831_v54 = vpop.f32.mrf.mxu0  ;;  %v875_v55 = vpop.f32.mrf.mxu1 }
 0x13f   : > { %5675 = vmatmul.msk.bf16.vlgmr.msra.gmra.mxu0 %vm763_vm1, %v7837_v59 }
 0x140   : > { %5682 = vmatmul.msk.bf16.vlgmr.msra.gmra.mxu1 %vm763_vm1, %v7837_v59 }
 0x141   : > { %5749 = vmatmul.msk.bf16.vlgmr.msra.gmra.mxu2 %vm763_vm1, %v8093_v56  ;;  %5756 = vmatmul.msk.bf16.vlgmr.msra.gmra.mxu3 %vm763_vm1, %v8093_v56 }
 0x144   : > { %v1004_v52 = vpop.f32.mrf.mxu2  ;;  %v1048_v62 = vpop.f32.mrf.mxu3 }
 0x145   : > { %v8379_v63 = vadd.f32 %v1004_v52, %v831_v54  ;;  %v8381_v58 = vadd.f32 %v1048_v62, %v875_v55  ;;  %v833_v14 = vpop.f32.mrf.mxu0  ;;  %v877_v15 = vpop.f32.mrf.mxu1 }
 0x14c   : > { %v1006_v59 = vpop.f32.mrf.mxu2  ;;  %v1050_v9 = vpop.f32.mrf.mxu3 }
 0x14d   : > { %v8391_v18 = vadd.f32 %v1006_v59, %v833_v14  ;;  %v8393_v56 = vadd.f32 %v1050_v9, %v877_v15  ;;  %v1160_v25 = vpop.f32.mrf.mxu0  ;;  %v1204_v26 = vpop.f32.mrf.mxu1 }
 0x14e   : > { %v8396_v28 = vadd.f32 %v1160_v25, %v8115_v3  ;;  %v1240_v29 = vadd.f32 %v1204_v26, %v8117_v4 }
 0x14f   : > { %5676 = vmatmul.msk.bf16.gmra.mxu0 %vm763_vm1, %v7853_v1 }
 0x150   : > { %v1273_v6 = vadd.f32 %v8389_v10, %v1240_v29  ;;  %5683 = vmatmul.msk.bf16.gmra.mxu1 %vm763_vm1, %v7853_v1 }
 0x151   : > { %5750 = vmatmul.msk.bf16.gmra.mxu2 %vm763_vm1, %v8105_v61  ;;  %5757 = vmatmul.msk.bf16.gmra.mxu3 %vm763_vm1, %v8105_v61 }
 0x152   : > { %v1301_v33 = vmax.f32 %v1273_v6, 0.0 }
 0x154   : > { %1330 = vst.msk [vmem:[#allocation2 + $0x8] sm:$0xff] %vm1329_vm2, %v1301_v33  ;;  %v8409_v3 = vpop.f32.mrf.mxu2  ;;  %v8411_v4 = vpop.f32.mrf.mxu3 }
 0x155   : > { %v1162_v39 = vpop.f32.mrf.mxu0  ;;  %v1206_v38 = vpop.f32.mrf.mxu1 }
 0x156   : > { %v8414_v40 = vadd.f32 %v1162_v39, %v8123_v16  ;;  %v1242_v1 = vadd.f32 %v1206_v38, %v8125_v17 }
 0x158   : > { %v1275_v41 = vadd.f32 %v8389_v10, %v1242_v1 }
 0x15a   : > { %v1303_v45 = vmax.f32 %v1275_v41, 0.0 }
 0x15c   : > { %1332 = vst.msk [vmem:[#allocation2 + $0x18] sm:$0xff] %vm1329_vm2, %v1303_v45  ;;  %v8419_v61 = vpop.f32.mrf.mxu2  ;;  %v8421_v48 = vpop.f32.mrf.mxu3 }
 0x15d   : > { %v1165_v49 = vpop.f32.mrf.mxu0  ;;  %v1209_v50 = vpop.f32.mrf.mxu1 }
 0x15e   : > { %v8424_v54 = vadd.f32 %v1165_v49, %v8135_v21  ;;  %v1244_v55 = vadd.f32 %v1209_v50, %v8137_v22 }
 0x15f   : > { %5677 = vmatmul.msk.bf16.gmra.mxu0 %vm763_vm1, %v7869_v7 }
 0x160   : > { %v1277_v16 = vadd.f32 %v8389_v10, %v1244_v55  ;;  %5684 = vmatmul.msk.bf16.gmra.mxu1 %vm763_vm1, %v7869_v7 }
 0x161   : > { %5751 = vmatmul.msk.bf16.gmra.mxu2 %vm763_vm1, %v8121_v11  ;;  %5758 = vmatmul.msk.bf16.gmra.mxu3 %vm763_vm1, %v8121_v11 }
 0x162   : > { %v1305_v17 = vmax.f32 %v1277_v16, 0.0 }
 0x164   : > { %1334 = vst.msk [vmem:[#allocation2 + $0x28] sm:$0xff] %vm1329_vm2, %v1305_v17  ;;  %v8437_v21 = vpop.f32.mrf.mxu2  ;;  %v8439_v22 = vpop.f32.mrf.mxu3 }
 0x165   : > { %v1167_v52 = vpop.f32.mrf.mxu0  ;;  %v1211_v62 = vpop.f32.mrf.mxu1 }
 0x166   : > { %v8442_v14 = vadd.f32 %v1167_v52, %v8143_v30  ;;  %v1246_v7 = vadd.f32 %v1211_v62, %v8145_v31 }
 0x168   : > { %v1279_v15 = vadd.f32 %v8389_v10, %v1246_v7 }
 0x16a   : > { %v1307_v59 = vmax.f32 %v1279_v15, 0.0 }
 0x16c   : > { %1336 = vst.msk [vmem:[#allocation2 + $0x38] sm:$0xff] %vm1329_vm2, %v1307_v59  ;;  %v8447_v11 = vpop.f32.mrf.mxu2  ;;  %v8449_v9 = vpop.f32.mrf.mxu3 }
 0x16d   : > { %v1170_v25 = vpop.f32.mrf.mxu0  ;;  %v1214_v26 = vpop.f32.mrf.mxu1 }
 0x16e   : > { %v8452_v29 = vadd.f32 %v1170_v25, %v8155_v35  ;;  %v1248_v6 = vadd.f32 %v1214_v26, %v8157_v36 }
 0x16f   : > { %5678 = vmatmul.msk.bf16.gmra.mxu0 %vm763_vm1, %v7885_v13 }
 0x170   : > { %v1281_v30 = vadd.f32 %v8389_v10, %v1248_v6  ;;  %5685 = vmatmul.msk.bf16.gmra.mxu1 %vm763_vm1, %v7885_v13 }
 0x171   : > { %5752 = vmatmul.msk.bf16.gmra.mxu2 %vm763_vm1, %v8141_v27  ;;  %5759 = vmatmul.msk.bf16.gmra.mxu3 %vm763_vm1, %v8141_v27 }
 0x172   : > { %v1309_v31 = vmax.f32 %v1281_v30, 0.0 }
 0x174   : > { %1338 = vst.msk [vmem:[#allocation2 + $0x48] sm:$0xff] %vm1329_vm2, %v1309_v31  ;;  %v8465_v35 = vpop.f32.mrf.mxu2  ;;  %v8467_v36 = vpop.f32.mrf.mxu3 }
 0x175   : > { %v8469_v33 = vpop.f32.mrf.mxu0  ;;  %v1216_v39 = vpop.f32.mrf.mxu1 }
 0x176   : > { %v1250_v38 = vadd.f32 %v1216_v39, %v8211_v24 }
 0x178   : > { %v1283_v13 = vadd.f32 %v8389_v10, %v1250_v38 }
 0x17a   : > { %v1311_v1 = vmax.f32 %v1283_v13, 0.0 }
 0x17c   : > { %1340 = vst.msk [vmem:[#allocation2 + $0x58] sm:$0xff] %vm1329_vm2, %v1311_v1  ;;  %v8474_v41 = vpop.f32.mrf.mxu2  ;;  %v8476_v27 = vpop.f32.mrf.mxu3 }
 0x17d   : > { %v1175_v45 = vpop.f32.mrf.mxu0  ;;  %v1219_v49 = vpop.f32.mrf.mxu1 }
 0x17e   : > { %v8479_v50 = vadd.f32 %v1175_v45, %v8269_v2  ;;  %v1252_v55 = vadd.f32 %v1219_v49, %v8271_v8 }
 0x17f   : > { %5679 = vmatmul.msk.bf16.gmra.mxu0 %vm763_vm1, %v7953_v47 }
 0x180   : > { %v1285_v24 = vadd.f32 %v8389_v10, %v1252_v55  ;;  %5686 = vmatmul.msk.bf16.gmra.mxu1 %vm763_vm1, %v7953_v47 }
 0x181   : > { %5753 = vmatmul.msk.bf16.gmra.mxu2 %vm763_vm1, %v8189_v5  ;;  %5760 = vmatmul.msk.bf16.gmra.mxu3 %vm763_vm1, %v8189_v5 }
 0x182   : > { %v1313_v16 = vmax.f32 %v1285_v24, 0.0 }
 0x184   : > { %1342 = vst.msk [vmem:[#allocation2 + $0x68] sm:$0xff] %vm1329_vm2, %v1313_v16  ;;  %v8492_v2 = vpop.f32.mrf.mxu2  ;;  %v8494_v8 = vpop.f32.mrf.mxu3 }
 0x185   : > { %v8496_v17 = vpop.f32.mrf.mxu0  ;;  %v1221_v52 = vpop.f32.mrf.mxu1 }
 0x186   : > { %v1254_v62 = vadd.f32 %v1221_v52, %v8327_v60 }
 0x188   : > { %v1287_v47 = vadd.f32 %v8389_v10, %v1254_v62 }
 0x18a   : > { %v1315_v7 = vmax.f32 %v1287_v47, 0.0 }
 0x18c   : > { %1344 = vst.msk [vmem:[#allocation2 + $0x78] sm:$0xff] %vm1329_vm2, %v1315_v7  ;;  %v8501_v15 = vpop.f32.mrf.mxu2  ;;  %v8503_v5 = vpop.f32.mrf.mxu3 }
 0x18d   : > { %v1180_v59 = vpop.f32.mrf.mxu0  ;;  %v1224_v25 = vpop.f32.mrf.mxu1 }
 0x18e   : > { %v8506_v26 = vadd.f32 %v1180_v59, %v8343_v19  ;;  %v1256_v6 = vadd.f32 %v1224_v25, %v8345_v20 }
 0x18f   : > { %5680 = vmatmul.msk.bf16.gmra.mxu0 %vm763_vm1, %v8065_v44 }
 0x190   : > { %v1289_v60 = vadd.f32 %v8389_v10, %v1256_v6  ;;  %5687 = vmatmul.msk.bf16.gmra.mxu1 %vm763_vm1, %v8065_v44 }
 0x191   : > { %5754 = vmatmul.msk.bf16.gmra.mxu2 %vm763_vm1, %v8305_v42  ;;  %5761 = vmatmul.msk.bf16.gmra.mxu3 %vm763_vm1, %v8305_v42 }
 0x192   : > { %v1317_v30 = vmax.f32 %v1289_v60, 0.0 }
 0x194   : > { %1346 = vst.msk [vmem:[#allocation2 + $0x88] sm:$0xff] %vm1329_vm2, %v1317_v30  ;;  %v8519_v19 = vpop.f32.mrf.mxu2  ;;  %v8521_v20 = vpop.f32.mrf.mxu3 }
 0x195   : > { %v8523_v31 = vpop.f32.mrf.mxu0  ;;  %v1226_v39 = vpop.f32.mrf.mxu1 }
 0x196   : > { %v1258_v38 = vadd.f32 %v1226_v39, %v8353_v37 }
 0x198   : > { %v1291_v44 = vadd.f32 %v8389_v10, %v1258_v38 }
 0x19a   : > { %v1319_v13 = vmax.f32 %v1291_v44, 0.0 }
 0x19c   : > { %1348 = vst.msk [vmem:[#allocation2 + $0x98] sm:$0xff] %vm1329_vm2, %v1319_v13  ;;  %v8528_v1 = vpop.f32.mrf.mxu2  ;;  %v8530_v42 = vpop.f32.mrf.mxu3 }
 0x19d   : > { %v1185_v45 = vpop.f32.mrf.mxu0  ;;  %v1229_v49 = vpop.f32.mrf.mxu1 }
 0x19e   : > { %v8533_v55 = vadd.f32 %v1185_v45, %v8363_v12  ;;  %v1260_v24 = vadd.f32 %v1229_v49, %v8365_v43 }
 0x19f   : > { %5681 = vmatmul.msk.bf16.gmra.mxu0 %vm763_vm1, %v8081_v53 }
 0x1a0   : > { %v1293_v37 = vadd.f32 %v8389_v10, %v1260_v24  ;;  %5688 = vmatmul.msk.bf16.gmra.mxu1 %vm763_vm1, %v8081_v53 }
 0x1a1   : > { %5755 = vmatmul.msk.bf16.gmra.mxu2 %vm763_vm1, %v8349_v32  ;;  %5762 = vmatmul.msk.bf16.gmra.mxu3 %vm763_vm1, %v8349_v32 }
 0x1a2   : > { %v1321_v16 = vmax.f32 %v1293_v37, 0.0 }
 0x1a4   : > { %1350 = vst.msk [vmem:[#allocation2 + $0xa8] sm:$0xff] %vm1329_vm2, %v1321_v16  ;;  %v8546_v12 = vpop.f32.mrf.mxu2  ;;  %v8548_v43 = vpop.f32.mrf.mxu3 }
 0x1a5   : > { %v8550_v52 = vpop.f32.mrf.mxu0  ;;  %v1231_v62 = vpop.f32.mrf.mxu1 }
 0x1a6   : > { %v1262_v47 = vadd.f32 %v1231_v62, %v8369_v46 }
 0x1a8   : > { %v1295_v53 = vadd.f32 %v8389_v10, %v1262_v47  ;;  %v8579_v47 = vperm.slane %v8386_v0, 0 }
 0x1aa   : > { %v1323_v7 = vmax.f32 %v1295_v53, 0.0 }
 0x1ac   : > { %1352 = vst.msk [vmem:[#allocation2 + $0xb8] sm:$0xff] %vm1329_vm2, %v1323_v7  ;;  %v8555_v59 = vpop.f32.mrf.mxu2  ;;  %v8557_v32 = vpop.f32.mrf.mxu3 }
 0x1ad   : > { %v1190_v25 = vpop.f32.mrf.mxu0  ;;  %v1234_v6 = vpop.f32.mrf.mxu1 }
 0x1ae   : > { %v8560_v60 = vadd.f32 %v1190_v25, %v8379_v63  ;;  %v1264_v30 = vadd.f32 %v1234_v6, %v8381_v58  ;;  %v1272_v6 = vadd.f32 %v8579_v47, %v8396_v28 }
 0x1b0   : > { %v1297_v39 = vadd.f32 %v8389_v10, %v1264_v30 }
 0x1b2   : > { %v1325_v38 = vmax.f32 %v1297_v39, 0.0 }
 0x1b4   : > { %1354 = vst.msk [vmem:[#allocation2 + $0xc8] sm:$0xff] %vm1329_vm2, %v1325_v38  ;;  %v8565_v46 = vpop.f32.mrf.mxu2  ;;  %v8567_v44 = vpop.f32.mrf.mxu3 }
 0x1b5   : > { %v8569_v13 = vpop.f32.mrf.mxu0  ;;  %v1236_v45 = vpop.f32.mrf.mxu1 }
 0x1b6   : > { %10562 = vst [vmem:[#allocation4_spill] sm:$0xff] %v8569_v13  ;;  %v1266_v49 = vadd.f32 %v1236_v45, %v8393_v56 }
 0x1b8   : > { %v1299_v24 = vadd.f32 %v8389_v10, %v1266_v49 }
 0x1ba   : > { %v1327_v63 = vmax.f32 %v1299_v24, 0.0 }
 0x1bc   : > { %1356 = vst.msk [vmem:[#allocation2 + $0xd8] sm:$0xff] %vm1329_vm2, %v1327_v63  ;;  %v8574_v58 = vpop.f32.mrf.mxu2  ;;  %v8576_v37 = vpop.f32.mrf.mxu3  ;;  %v1300_v63 = vmax.f32 %v1272_v6, 0.0 }
 0x1bd   : > { %10563 = vst [vmem:[#allocation5_spill] sm:$0xff] %v8574_v58  ;;  %v1608_v16 = vpop.f32.mrf.mxu0  ;;  %v1652_v62 = vpop.f32.mrf.mxu1  ;;  %v1881_v58 = vld [vmem:[#allocation2 + $0x8] sm:$0xff] }
 0x1be   : > { %10564 = vst [vmem:[#allocation6_spill] sm:$0xff] %v8576_v37  ;;  %v1609_v53 = vadd.f32 %v1608_v16, %v8409_v3  ;;  %v1653_v7 = vadd.f32 %v1652_v62, %v8411_v4 }
 0x1c4   : > { %v1773_v25 = vpop.f32.mrf.mxu2  ;;  %v1817_v56 = vpop.f32.mrf.mxu3 }
 0x1c5   : > { %v1852_v30 = vadd.f32 %v1773_v25, %v1609_v53  ;;  %v1853_v39 = vadd.f32 %v1817_v56, %v1653_v7  ;;  %v1610_v38 = vpop.f32.mrf.mxu0  ;;  %v1654_v45 = vpop.f32.mrf.mxu1  ;;  %v1274_v53 = vadd.f32 %v8579_v47, %v8414_v40 }
 0x1c6   : > { %v1611_v4 = vadd.f32 %v1610_v38, %v8419_v61  ;;  %v1655_v62 = vadd.f32 %v1654_v45, %v8421_v48  ;;  %v1883_v38 = vld [vmem:[#allocation2 + $0x18] sm:$0xff] }
 0x1c7   : > { %v1908_v49 = vadd.f32 %v1852_v30, %v8579_v47  ;;  %v1909_v24 = vadd.f32 %v1853_v39, %v8389_v10 }
 0x1c9   : > { %v1936_v0 = vmax.f32 %v1908_v49, 0.0  ;;  %v1937_v37 = vmax.f32 %v1909_v24, 0.0 }
 0x1cb   : > { %v1964_v3 = vmax.f32 %v1300_v63, %v1936_v0  ;;  %v1965_v16 = vmax.f32 %v1881_v58, %v1937_v37  ;;  %v1302_v58 = vmax.f32 %v1274_v53, 0.0  ;;  %v1276_v63 = vadd.f32 %v8579_v47, %v8424_v54 }
 0x1cc   : > { %v1775_v13 = vpop.f32.mrf.mxu2  ;;  %v1819_v28 = vpop.f32.mrf.mxu3 }
 0x1cd   : > { %v1854_v7 = vadd.f32 %v1775_v13, %v1611_v4  ;;  %v1855_v25 = vadd.f32 %v1819_v28, %v1655_v62  ;;  %v1613_v56 = vpop.f32.mrf.mxu0  ;;  %v1657_v30 = vpop.f32.mrf.mxu1  ;;  %1993 = vst.msk [vmem:[#allocation2 + $0x8] sm:$0xff] %vm1329_vm2, %v1965_v16 }
 0x1ce   : > { %v1614_v49 = vadd.f32 %v1613_v56, %v8437_v21  ;;  %v1658_v40 = vadd.f32 %v1657_v30, %v8439_v22  ;;  %v1304_v21 = vmax.f32 %v1276_v63, 0.0  ;;  %v1885_v56 = vld [vmem:[#allocation2 + $0x28] sm:$0xff]  ;;  %v1887_v63 = vld [vmem:[#allocation2 + $0x38] sm:$0xff] }
 0x1cf   : > { %v1910_v6 = vadd.f32 %v1854_v7, %v8579_v47  ;;  %v1911_v39 = vadd.f32 %v1855_v25, %v8389_v10 }
 0x1d1   : > { %v1938_v37 = vmax.f32 %v1910_v6, 0.0  ;;  %v1939_v61 = vmax.f32 %v1911_v39, 0.0 }
 0x1d3   : > { %v1966_v48 = vmax.f32 %v1302_v58, %v1938_v37  ;;  %v1967_v45 = vmax.f32 %v1883_v38, %v1939_v61 }
 0x1d4   : > { %v1778_v13 = vpop.f32.mrf.mxu2  ;;  %v1822_v24 = vpop.f32.mrf.mxu3 }
 0x1d5   : > { %v1856_v0 = vadd.f32 %v1778_v13, %v1614_v49  ;;  %v1857_v16 = vadd.f32 %v1822_v24, %v1658_v40  ;;  %v1615_v4 = vpop.f32.mrf.mxu0  ;;  %v1659_v62 = vpop.f32.mrf.mxu1  ;;  %v8598_v28 = vpack.c.bf16 %v1966_v48, %v1964_v3  ;;  %1995 = vst.msk [vmem:[#allocation2 + $0x18] sm:$0xff] %vm1329_vm2, %v1967_v45  ;;  %v1278_v3 = vadd.f32 %v8579_v47, %v8442_v14 }
 0x1d6   : > { %v1616_v54 = vadd.f32 %v1615_v4, %v8447_v11  ;;  %v1660_v39 = vadd.f32 %v1659_v62, %v8449_v9 }
 0x1d7   : > { %v1912_v53 = vadd.f32 %v1856_v0, %v8579_v47  ;;  %v1913_v7 = vadd.f32 %v1857_v16, %v8389_v10  ;;  %v1306_v13 = vmax.f32 %v1278_v3, 0.0 }
 0x1d9   : > { %v1940_v25 = vmax.f32 %v1912_v53, 0.0  ;;  %v1941_v22 = vmax.f32 %v1913_v7, 0.0  ;;  %v1280_v53 = vadd.f32 %v8579_v47, %v8452_v29 }
 0x1db   : > { %v1968_v30 = vmax.f32 %v1304_v21, %v1940_v25  ;;  %v1969_v6 = vmax.f32 %v1885_v56, %v1941_v22 }
 0x1dc   : > { %v1780_v58 = vpop.f32.mrf.mxu2  ;;  %v1824_v37 = vpop.f32.mrf.mxu3 }
 0x1dd   : > { %v1858_v61 = vadd.f32 %v1780_v58, %v1616_v54  ;;  %v1859_v38 = vadd.f32 %v1824_v37, %v1660_v39  ;;  %v1618_v48 = vpop.f32.mrf.mxu0  ;;  %v1662_v45 = vpop.f32.mrf.mxu1  ;;  %1997 = vst.msk [vmem:[#allocation2 + $0x28] sm:$0xff] %vm1329_vm2, %v1969_v6  ;;  %v1889_v37 = vld [vmem:[#allocation2 + $0x48] sm:$0xff] }
 0x1de   : > { %v1619_v16 = vadd.f32 %v1618_v48, %v8465_v35  ;;  %v1663_v14 = vadd.f32 %v1662_v45, %v8467_v36  ;;  %v1308_v35 = vmax.f32 %v1280_v53, 0.0  ;;  %v1249_v36 = vadd.f32 %v8469_v33, %v8209_v23 }
 0x1df   : > { %v1914_v49 = vadd.f32 %v1858_v61, %v8579_v47  ;;  %v1915_v40 = vadd.f32 %v1859_v38, %v8389_v10  ;;  %v1284_v53 = vadd.f32 %v8579_v47, %v8479_v50 }
 0x1e0   : > { %v1282_v45 = vadd.f32 %v8579_v47, %v1249_v36 }
 0x1e1   : > { %v1942_v24 = vmax.f32 %v1914_v49, 0.0  ;;  %v1943_v11 = vmax.f32 %v1915_v40, 0.0 }
 0x1e3   : > { %v1970_v9 = vmax.f32 %v1306_v13, %v1942_v24  ;;  %v1971_v0 = vmax.f32 %v1887_v63, %v1943_v11  ;;  %v1310_v11 = vmax.f32 %v1282_v45, 0.0 }
 0x1e4   : > { %v1783_v4 = vpop.f32.mrf.mxu2  ;;  %v1827_v62 = vpop.f32.mrf.mxu3 }
 0x1e5   : > { %v1860_v7 = vadd.f32 %v1783_v4, %v1619_v16  ;;  %v1861_v21 = vadd.f32 %v1827_v62, %v1663_v14  ;;  %v1620_v25 = vpop.f32.mrf.mxu0  ;;  %v1664_v22 = vpop.f32.mrf.mxu1  ;;  %v8614_v56 = vpack.c.bf16 %v1970_v9, %v1968_v30  ;;  %1999 = vst.msk [vmem:[#allocation2 + $0x38] sm:$0xff] %vm1329_vm2, %v1971_v0 }
 0x1e6   : > { %v1621_v61 = vadd.f32 %v1620_v25, %v8474_v41  ;;  %v1665_v30 = vadd.f32 %v1664_v22, %v8476_v27  ;;  %v1891_v41 = vld [vmem:[#allocation2 + $0x58] sm:$0xff] }
 0x1e7   : > { %v1916_v6 = vadd.f32 %v1860_v7, %v8579_v47  ;;  %v1917_v54 = vadd.f32 %v1861_v21, %v8389_v10 }
 0x1e9   : > { %v1944_v39 = vmax.f32 %v1916_v6, 0.0  ;;  %v1945_v58 = vmax.f32 %v1917_v54, 0.0 }
 0x1eb   : > { %v1972_v29 = vmax.f32 %v1308_v35, %v1944_v39  ;;  %v1973_v3 = vmax.f32 %v1889_v37, %v1945_v58  ;;  %v1893_v58 = vld [vmem:[#allocation2 + $0x68] sm:$0xff] }
 0x1ec   : > { %v1785_v38 = vpop.f32.mrf.mxu2  ;;  %v1829_v48 = vpop.f32.mrf.mxu3 }
 0x1ed   : > { %v1862_v49 = vadd.f32 %v1785_v38, %v1621_v61  ;;  %v1863_v40 = vadd.f32 %v1829_v48, %v1665_v30  ;;  %v1623_v13 = vpop.f32.mrf.mxu0  ;;  %v1667_v24 = vpop.f32.mrf.mxu1  ;;  %2001 = vst.msk [vmem:[#allocation2 + $0x48] sm:$0xff] %vm1329_vm2, %v1973_v3 }
 0x1ee   : > { %v1624_v16 = vadd.f32 %v1623_v13, %v8492_v2  ;;  %v1668_v14 = vadd.f32 %v1667_v24, %v8494_v8  ;;  %v1312_v2 = vmax.f32 %v1284_v53, 0.0  ;;  %v1253_v8 = vadd.f32 %v8496_v17, %v8325_v57 }
 0x1ef   : > { %v1918_v23 = vadd.f32 %v1862_v49, %v8579_v47  ;;  %v1919_v33 = vadd.f32 %v1863_v40, %v8389_v10 }
 0x1f0   : > { %v1286_v38 = vadd.f32 %v8579_v47, %v1253_v8 }
 0x1f1   : > { %v1946_v63 = vmax.f32 %v1918_v23, 0.0  ;;  %v1947_v9 = vmax.f32 %v1919_v33, 0.0 }
 0x1f2   : > { %v1314_v13 = vmax.f32 %v1286_v38, 0.0 }
 0x1f3   : > { %v1974_v0 = vmax.f32 %v1310_v11, %v1946_v63  ;;  %v1975_v27 = vmax.f32 %v1891_v41, %v1947_v9 }
 0x1f4   : > { %v1788_v4 = vpop.f32.mrf.mxu2  ;;  %v1832_v62 = vpop.f32.mrf.mxu3 }
 0x1f5   : > { %v1864_v7 = vadd.f32 %v1788_v4, %v1624_v16  ;;  %v1865_v21 = vadd.f32 %v1832_v62, %v1668_v14  ;;  %v1625_v25 = vpop.f32.mrf.mxu0  ;;  %v1669_v22 = vpop.f32.mrf.mxu1  ;;  %v8631_v6 = vpack.c.bf16 %v1974_v0, %v1972_v29  ;;  %2003 = vst.msk [vmem:[#allocation2 + $0x58] sm:$0xff] %vm1329_vm2, %v1975_v27  ;;  %v1288_v0 = vadd.f32 %v8579_v47, %v8506_v26 }
 0x1f6   : > { %v1626_v3 = vadd.f32 %v1625_v25, %v8501_v15  ;;  %v1670_v29 = vadd.f32 %v1669_v22, %v8503_v5  ;;  %v1895_v15 = vld [vmem:[#allocation2 + $0x78] sm:$0xff]  ;;  %v1897_v22 = vld [vmem:[#allocation2 + $0x88] sm:$0xff] }
 0x1f7   : > { %v1920_v54 = vadd.f32 %v1864_v7, %v8579_v47  ;;  %v1921_v35 = vadd.f32 %v1865_v21, %v8389_v10 }
 0x1f9   : > { %v1948_v36 = vmax.f32 %v1920_v54, 0.0  ;;  %v1949_v39 = vmax.f32 %v1921_v35, 0.0 }
 0x1fb   : > { %v1976_v50 = vmax.f32 %v1312_v2, %v1948_v36  ;;  %v1977_v37 = vmax.f32 %v1893_v58, %v1949_v39 }
 0x1fc   : > { %v1790_v61 = vpop.f32.mrf.mxu2  ;;  %v1834_v30 = vpop.f32.mrf.mxu3 }
 0x1fd   : > { %v1866_v48 = vadd.f32 %v1790_v61, %v1626_v3  ;;  %v1867_v45 = vadd.f32 %v1834_v30, %v1670_v29  ;;  %v1628_v49 = vpop.f32.mrf.mxu0  ;;  %v1672_v40 = vpop.f32.mrf.mxu1  ;;  %2005 = vst.msk [vmem:[#allocation2 + $0x68] sm:$0xff] %vm1329_vm2, %v1977_v37 }
 0x1fe   : > { %v1629_v11 = vadd.f32 %v1628_v49, %v8519_v19  ;;  %v1673_v63 = vadd.f32 %v1672_v40, %v8521_v20  ;;  %v1316_v19 = vmax.f32 %v1288_v0, 0.0  ;;  %v1257_v20 = vadd.f32 %v8523_v31, %v8351_v34 }
 0x1ff   : > { %v1922_v57 = vadd.f32 %v1866_v48, %v8579_v47  ;;  %v1923_v17 = vadd.f32 %v1867_v45, %v8389_v10 }
 0x200   : > { %v1290_v39 = vadd.f32 %v8579_v47, %v1257_v20 }
 0x201   : > { %v1950_v24 = vmax.f32 %v1922_v57, 0.0  ;;  %v1951_v23 = vmax.f32 %v1923_v17, 0.0  ;;  %v1292_v57 = vadd.f32 %v8579_v47, %v8533_v55 }
 0x202   : > { %v1318_v29 = vmax.f32 %v1290_v39, 0.0 }
 0x203   : > { %v1978_v33 = vmax.f32 %v1314_v13, %v1950_v24  ;;  %v1979_v5 = vmax.f32 %v1895_v15, %v1951_v23 }
 0x204   : > { %v1793_v9 = vpop.f32.mrf.mxu2  ;;  %v1837_v41 = vpop.f32.mrf.mxu3 }
 0x205   : > { %v1868_v27 = vadd.f32 %v1793_v9, %v1629_v11  ;;  %v1869_v16 = vadd.f32 %v1837_v41, %v1673_v63  ;;  %v1630_v14 = vpop.f32.mrf.mxu0  ;;  %v1674_v4 = vpop.f32.mrf.mxu1  ;;  %v8648_v62 = vpack.c.bf16 %v1978_v33, %v1976_v50  ;;  %2007 = vst.msk [vmem:[#allocation2 + $0x78] sm:$0xff] %vm1329_vm2, %v1979_v5  ;;  %v1901_v9 = vld [vmem:[#allocation2 + $0xa8] sm:$0xff] }
 0x206   : > { %v1631_v35 = vadd.f32 %v1630_v14, %v8528_v1  ;;  %v1675_v2 = vadd.f32 %v1674_v4, %v8530_v42  ;;  %v1899_v1 = vld [vmem:[#allocation2 + $0x98] sm:$0xff] }
 0x207   : > { %v1924_v53 = vadd.f32 %v1868_v27, %v8579_v47  ;;  %v1925_v7 = vadd.f32 %v1869_v16, %v8389_v10 }
 0x209   : > { %v1952_v21 = vmax.f32 %v1924_v53, 0.0  ;;  %v1953_v25 = vmax.f32 %v1925_v7, 0.0 }
 0x20b   : > { %v1980_v26 = vmax.f32 %v1316_v19, %v1952_v21  ;;  %v1981_v54 = vmax.f32 %v1897_v22, %v1953_v25 }
 0x20c   : > { %v1795_v8 = vpop.f32.mrf.mxu2  ;;  %v1839_v36 = vpop.f32.mrf.mxu3 }
 0x20d   : > { %v1870_v58 = vadd.f32 %v1795_v8, %v1631_v35  ;;  %v1871_v50 = vadd.f32 %v1839_v36, %v1675_v2  ;;  %v1633_v37 = vpop.f32.mrf.mxu0  ;;  %v1677_v3 = vpop.f32.mrf.mxu1  ;;  %2009 = vst.msk [vmem:[#allocation2 + $0x88] sm:$0xff] %vm1329_vm2, %v1981_v54  ;;  %v1296_v36 = vadd.f32 %v8579_v47, %v8560_v60 }
 0x20e   : > { %v1634_v48 = vadd.f32 %v1633_v37, %v8546_v12  ;;  %v1678_v45 = vadd.f32 %v1677_v3, %v8548_v43  ;;  %v1320_v12 = vmax.f32 %v1292_v57, 0.0  ;;  %v1261_v43 = vadd.f32 %v8550_v52, %v8367_v51 }
 0x20f   : > { %v1926_v34 = vadd.f32 %v1870_v58, %v8579_v47  ;;  %v1927_v31 = vadd.f32 %v1871_v50, %v8389_v10 }
 0x210   : > { %v1294_v4 = vadd.f32 %v8579_v47, %v1261_v43  ;;  %v1907_v43 = vld [vmem:[#allocation2 + $0xd8] sm:$0xff] }
 0x211   : > { %v1954_v61 = vmax.f32 %v1926_v34, 0.0  ;;  %v1955_v30 = vmax.f32 %v1927_v31, 0.0 }
 0x212   : > { %v1322_v21 = vmax.f32 %v1294_v4, 0.0 }
 0x213   : > { %v1982_v38 = vmax.f32 %v1318_v29, %v1954_v61  ;;  %v1983_v42 = vmax.f32 %v1899_v1, %v1955_v30  ;;  %v1324_v29 = vmax.f32 %v1296_v36, 0.0  ;;  %v1905_v1 = vld [vmem:[#allocation2 + $0xc8] sm:$0xff] }
 0x214   : > { %v1798_v49 = vpop.f32.mrf.mxu2  ;;  %v1842_v40 = vpop.f32.mrf.mxu3 }
 0x215   : > { %v1872_v17 = vadd.f32 %v1798_v49, %v1634_v48  ;;  %v1873_v13 = vadd.f32 %v1842_v40, %v1678_v45  ;;  %v1635_v24 = vpop.f32.mrf.mxu0  ;;  %v1679_v23 = vpop.f32.mrf.mxu1  ;;  %v8665_v15 = vpack.c.bf16 %v1982_v38, %v1980_v26  ;;  %2011 = vst.msk [vmem:[#allocation2 + $0x98] sm:$0xff] %vm1329_vm2, %v1983_v42  ;;  %v10566_v42 = vld [vmem:[#allocation5_spill] sm:$0xff]  ;;  %v10567_v45 = vld [vmem:[#allocation6_spill] sm:$0xff] }
 0x216   : > { %v1636_v0 = vadd.f32 %v1635_v24, %v8555_v59  ;;  %v1680_v27 = vadd.f32 %v1679_v23, %v8557_v32  ;;  %v1903_v59 = vld [vmem:[#allocation2 + $0xb8] sm:$0xff] }
 0x217   : > { %v1928_v33 = vadd.f32 %v1872_v17, %v8579_v47  ;;  %v1929_v5 = vadd.f32 %v1873_v13, %v8389_v10 }
 0x219   : > { %v1956_v11 = vmax.f32 %v1928_v33, 0.0  ;;  %v1957_v63 = vmax.f32 %v1929_v5, 0.0 }
 0x21b   : > { %v1984_v55 = vmax.f32 %v1320_v12, %v1956_v11  ;;  %v1985_v41 = vmax.f32 %v1901_v9, %v1957_v63 }
 0x21c   : > { %v1800_v16 = vpop.f32.mrf.mxu2  ;;  %v1844_v14 = vpop.f32.mrf.mxu3 }
 0x21d   : > { %v1874_v53 = vadd.f32 %v1800_v16, %v1636_v0  ;;  %v1875_v7 = vadd.f32 %v1844_v14, %v1680_v27  ;;  %2013 = vst.msk [vmem:[#allocation2 + $0xa8] sm:$0xff] %vm1329_vm2, %v1985_v41  ;;  %v1638_v19 = vpop.f32.mrf.mxu0  ;;  %v1682_v20 = vpop.f32.mrf.mxu1  ;;  %v2039_v16 = vld [vmem:[#allocation2 + $0x98] sm:$0xff]  ;;  %v2037_v14 = vld [vmem:[#allocation2 + $0x88] sm:$0xff] }
 0x21e   : > { %v1639_v54 = vadd.f32 %v1638_v19, %v8565_v46  ;;  %v1683_v35 = vadd.f32 %v1682_v20, %v8567_v44  ;;  %v10565_v46 = vld [vmem:[#allocation4_spill] sm:$0xff]  ;;  %v2057_v4 = vpack.c.bf16 %v2039_v16, %v2037_v14  ;;  %v2031_v19 = vld [vmem:[#allocation2 + $0x58] sm:$0xff] }
 0x21f   : > { %v1930_v51 = vadd.f32 %v1874_v53, %v8579_v47  ;;  %v1931_v52 = vadd.f32 %v1875_v7, %v8389_v10  ;;  %v1265_v44 = vadd.f32 %v10565_v46, %v8391_v18  ;;  %v2035_v53 = vld [vmem:[#allocation2 + $0x78] sm:$0xff] }
 0x221   : > { %v1958_v25 = vmax.f32 %v1930_v51, 0.0  ;;  %v1959_v22 = vmax.f32 %v1931_v52, 0.0  ;;  %v1298_v17 = vadd.f32 %v8579_v47, %v1265_v44  ;;  %v7164_v51 = vld [vmem:[%s10552_s3 + $0x1c] sm:$0xff] }
 0x222   : > { %v2027_v52 = vld [vmem:[#allocation2 + $0x38] sm:$0xff] }
 0x223   : > { %v1986_v26 = vmax.f32 %v1322_v21, %v1958_v25  ;;  %v1987_v32 = vmax.f32 %v1903_v59, %v1959_v22  ;;  %v1326_v33 = vmax.f32 %v1298_v17, 0.0  ;;  %v2023_v25 = vld [vmem:[#allocation2 + $0x18] sm:$0xff]  ;;  %v2021_v22 = vld [vmem:[#allocation2 + $0x8] sm:$0xff] }
 0x224   : > { %v1803_v2 = vpop.f32.mrf.mxu2  ;;  %v1847_v8 = vpop.f32.mrf.mxu3  ;;  %v2049_v59 = vpack.c.bf16 %v2023_v25, %v2021_v22 }
 0x225   : > { %v1876_v39 = vadd.f32 %v1803_v2, %v1639_v54  ;;  %v1877_v58 = vadd.f32 %v1847_v8, %v1683_v35  ;;  %v2058_v50 = vpack.c.bf16 %v1986_v26, %v1984_v55  ;;  %2015 = vst.msk [vmem:[#allocation2 + $0xb8] sm:$0xff] %vm1329_vm2, %v1987_v32  ;;  %v1640_v34 = vpop.f32.mrf.mxu0  ;;  %v1684_v31 = vpop.f32.mrf.mxu1  ;;  %v7162_v26 = vld [vmem:[%s10552_s3 + $0x8] sm:$0xff]  ;;  %v7163_v54 = vld [vmem:[%s10552_s3 + $0x10] sm:$0xff]  ;;  %v2068_v2 = vld [vmem:[%s10552_s3 + $0x18] sm:$0xf] }
 0x226   : > { %v1641_v48 = vadd.f32 %v1640_v34, %v10566_v42  ;;  %v1685_v49 = vadd.f32 %v1684_v31, %v10567_v45  ;;  %v7166_v32 = vld [vmem:[%s10552_s3 + $0x2c] sm:$0xff]  ;;  %v5789_v35 = vld [vmem:[%s10552_s3 + $0x34] sm:$0xf]  ;;  %v2082_v36 = vunpack.c.l.b16 %v2068_v2 }
 0x227   : > { %v1932_v37 = vadd.f32 %v1876_v39, %v8579_v47  ;;  %v1933_v3 = vadd.f32 %v1877_v58, %v8389_v10  ;;  %v2177_v8 = vunpack.c.l.b16 %v5789_v35  ;;  %v7171_v35 = vld [vmem:[%s10553_s4 + $0x20] sm:$0xff]  ;;  %v7168_v2 = vld [vmem:[%s10553_s4 + $0x8] sm:$0xff] }
 0x228   : > { %v2086_v58 = vpack.c.b16 %v2082_v36, %v2082_v36  ;;  %v7169_v36 = vld [vmem:[%s10553_s4 + $0x10] sm:$0xff] }
 0x229   : > { %v1960_v61 = vmax.f32 %v1932_v37, 0.0  ;;  %v1961_v30 = vmax.f32 %v1933_v3, 0.0  ;;  %v2181_v39 = vpack.c.b16 %v2177_v8, %v2177_v8  ;;  %v7172_v8 = vld [vmem:[%s10553_s4 + $0x28] sm:$0xff] }
 0x22b   : > { %v1988_v38 = vmax.f32 %v1324_v29, %v1960_v61  ;;  %v1989_v60 = vmax.f32 %v1905_v1, %v1961_v30 }
 0x22c   : > { %v1805_v40 = vpop.f32.mrf.mxu2  ;;  %v1849_v57 = vpop.f32.mrf.mxu3  ;;  %v2043_v27 = vld [vmem:[#allocation2 + $0xb8] sm:$0xff] }
 0x22d   : > { %v1878_v13 = vadd.f32 %v1805_v40, %v1641_v48  ;;  %v1879_v24 = vadd.f32 %v1849_v57, %v1685_v49  ;;  %2017 = vst.msk [vmem:[#allocation2 + $0xc8] sm:$0xff] %vm1329_vm2, %v1989_v60 }
 0x22f   : > { %v1934_v23 = vadd.f32 %v1878_v13, %v8579_v47  ;;  %v1935_v18 = vadd.f32 %v1879_v24, %v8389_v10  ;;  %v2041_v10 = vld [vmem:[#allocation2 + $0xa8] sm:$0xff] }
 0x230   : > { %v2059_v47 = vpack.c.bf16 %v2043_v27, %v2041_v10 }
 0x231   : > { %v1962_v5 = vmax.f32 %v1934_v23, 0.0  ;;  %v1963_v12 = vmax.f32 %v1935_v18, 0.0 }
 0x233   : > { %v1990_v11 = vmax.f32 %v1326_v33, %v1962_v5  ;;  %v1991_v63 = vmax.f32 %v1907_v43, %v1963_v12 }
 0x234   : > { %v2045_v55 = vld [vmem:[#allocation2 + $0xc8] sm:$0xff] }
 0x235   : > { %v2060_v9 = vpack.c.bf16 %v1990_v11, %v1988_v38  ;;  %2019 = vst.msk [vmem:[#allocation2 + $0xd8] sm:$0xff] %vm1329_vm2, %v1991_v63 }
 0x237   : > { %2101 = vmatpush.bf16.msrb.mxu0 %v2060_v9  ;;  %2195 = vmatpush.bf16.msrb.mxu2 %v2060_v9 }
 0x23b   : > { %2102 = vmatpush.bf16.msrb.mxu0 %v2058_v50  ;;  %2196 = vmatpush.bf16.msrb.mxu2 %v2058_v50 }
 0x23c   : > { %v2047_v41 = vld [vmem:[#allocation2 + $0xd8] sm:$0xff] }
 0x23d   : > { %v2061_v0 = vpack.c.bf16 %v2047_v41, %v2045_v55 }
 0x23f   : > { %2103 = vmatpush.bf16.msrb.mxu0 %v8665_v15  ;;  %2197 = vmatpush.bf16.msrb.mxu2 %v8665_v15  ;;  %v2033_v15 = vld [vmem:[#allocation2 + $0x68] sm:$0xff] }
 0x240   : > { %2129 = vmatpush.bf16.msrb.mxu1 %v2061_v0  ;;  %2223 = vmatpush.bf16.msrb.mxu3 %v2061_v0  ;;  %v2055_v7 = vpack.c.bf16 %v2035_v53, %v2033_v15 }
 0x243   : > { %2104 = vmatpush.bf16.msrb.mxu0 %v8648_v62  ;;  %2198 = vmatpush.bf16.msrb.mxu2 %v8648_v62  ;;  %v2029_v62 = vld [vmem:[#allocation2 + $0x48] sm:$0xff] }
 0x244   : > { %2130 = vmatpush.bf16.msrb.mxu1 %v2059_v47  ;;  %2224 = vmatpush.bf16.msrb.mxu3 %v2059_v47  ;;  %v2053_v20 = vpack.c.bf16 %v2031_v19, %v2029_v62 }
 0x247   : > { %2105 = vmatpush.bf16.msrb.mxu0 %v8631_v6  ;;  %2199 = vmatpush.bf16.msrb.mxu2 %v8631_v6  ;;  %v7161_v6 = vld [vmem:[%s10552_s3] sm:$0xff] }
 0x248   : > { %2131 = vmatpush.bf16.msrb.mxu1 %v2057_v4  ;;  %2225 = vmatpush.bf16.msrb.mxu3 %v2057_v4 }
 0x24b   : > { %2106 = vmatpush.bf16.msrb.mxu0 %v8614_v56  ;;  %2200 = vmatpush.bf16.msrb.mxu2 %v8614_v56  ;;  %v2025_v56 = vld [vmem:[#allocation2 + $0x28] sm:$0xff] }
 0x24c   : > { %2132 = vmatpush.bf16.msrb.mxu1 %v2055_v7  ;;  %2226 = vmatpush.bf16.msrb.mxu3 %v2055_v7  ;;  %v2051_v21 = vpack.c.bf16 %v2027_v52, %v2025_v56 }
 0x24f   : > { %2107 = vmatpush.bf16.msrb.mxu0 %v8598_v28  ;;  %2201 = vmatpush.bf16.msrb.mxu2 %v8598_v28  ;;  %v7165_v28 = vld [vmem:[%s10552_s3 + $0x24] sm:$0xff] }
 0x250   : > { %2133 = vmatpush.bf16.msrb.mxu1 %v2053_v20  ;;  %2227 = vmatpush.bf16.msrb.mxu3 %v2053_v20 }
 0x252   : > { %5802 = vmatmul.msk.bf16.vlgmr.msrb.gmra.mxu2 %vm2087_vm3, %v7164_v51  ;;  %5775 = vmatmul.msk.bf16.vlgmr.msrb.gmra.mxu0 %vm2087_vm3, %v7161_v6 }
 0x254   : > { %2134 = vmatpush.bf16.msrb.mxu1 %v2051_v21  ;;  %2228 = vmatpush.bf16.msrb.mxu3 %v2051_v21  ;;  %v7170_v21 = vld [vmem:[%s10553_s4 + $0x18] sm:$0xff] }
 0x258   : > { %2135 = vmatpush.bf16.msrb.mxu1 %v2049_v59  ;;  %2229 = vmatpush.bf16.msrb.mxu3 %v2049_v59 }
 0x25b   : > { %5806 = vmatmul.msk.bf16.vlgmr.msrb.gmra.mxu3 %vm2087_vm3, %v7164_v51  ;;  %5779 = vmatmul.msk.bf16.vlgmr.msrb.gmra.mxu1 %vm2087_vm3, %v7161_v6 }
 0x262   : > { %5803 = vmatmul.msk.bf16.gmra.mxu2 %vm2087_vm3, %v7165_v28  ;;  %5776 = vmatmul.msk.bf16.gmra.mxu0 %vm2087_vm3, %v7162_v26 }
 0x26b   : > { %5807 = vmatmul.msk.bf16.gmra.mxu3 %vm2087_vm3, %v7165_v28  ;;  %5780 = vmatmul.msk.bf16.gmra.mxu1 %vm2087_vm3, %v7162_v26 }
 0x272   : > { %5804 = vmatmul.msk.bf16.gmra.mxu2 %vm2087_vm3, %v7166_v32  ;;  %5777 = vmatmul.msk.bf16.gmra.mxu0 %vm2087_vm3, %v7163_v54 }
 0x27b   : > { %5808 = vmatmul.msk.bf16.gmra.mxu3 %vm2087_vm3, %v7166_v32  ;;  %5781 = vmatmul.msk.bf16.gmra.mxu1 %vm2087_vm3, %v7163_v54  ;;  %v7167_v54 = vld [vmem:[%s10553_s4] sm:$0xff] }
 0x282   : > { %5805 = vmatmul.msk.bf16.gmra.mxu2 %vm2087_vm3, %v2181_v39  ;;  %5778 = vmatmul.msk.bf16.gmra.mxu0 %vm2087_vm3, %v2086_v58 }
 0x28b   : > { %5809 = vmatmul.msk.bf16.gmra.mxu3 %vm2087_vm3, %v2181_v39  ;;  %5782 = vmatmul.msk.bf16.gmra.mxu1 %vm2087_vm3, %v2086_v58  ;;  %v5962_v39 = vld [vmem:[%s10554_s5 + $0x150] sm:$0xf]  ;;  %v7219_v58 = vld [vmem:[%s10554_s5 + $0x154] sm:$0xf0] }
 0x2cf   : > { %v2109_v50 = vpop.f32.mrf.mxu0 }
 0x2d5   : > { %v2203_v37 = vpop.f32.mrf.mxu2 }
 0x2d6   : > { %v2250_v53 = vmax.f32 %v2109_v50, %v2203_v37  ;;  %v7218_v50 = vld [vmem:[%s10554_s5 + $0x154] sm:$0xf]  ;;  %v5963_v37 = vor.u32 %v7219_v58, %v5962_v39  ;;  %v7225_v39 = vld [vmem:[%s10554_s5 + $0x184] sm:$0xf0]  ;;  %v7224_v58 = vld [vmem:[%s10554_s5 + $0x184] sm:$0xf] }
 0x2d7   : > { %v2111_v3 = vpop.f32.mrf.mxu0 }
 0x2d8   : > { %v8744_v34 = vpop.f32.mrf.mxu1 }
 0x2dd   : > { %v2205_v31 = vpop.f32.mrf.mxu2 }
 0x2de   : > { %v8746_v29 = vpop.f32.mrf.mxu3  ;;  %v2252_v15 = vmax.f32 %v2111_v3, %v2205_v31  ;;  %v5964_v3 = vld [vmem:[%s10554_s5 + $0x158] sm:$0xf0]  ;;  %v7217_v31 = vld [vmem:[%s10554_s5 + $0x144] sm:$0xf0] }
 0x2df   : > { %v2114_v46 = vpop.f32.mrf.mxu0  ;;  %v2251_v26 = vmax.f32 %v8744_v34, %v8746_v29  ;;  %v5954_v34 = vld [vmem:[%s10554_s5 + $0x140] sm:$0xf]  ;;  %v5967_v29 = vor.u32 %v7218_v50, %v5964_v3 }
 0x2e0   : > { %v8748_v44 = vpop.f32.mrf.mxu1  ;;  %v2264_v6 = vpack.c.bf16 %v2252_v15, %v2250_v53  ;;  %v7210_v53 = vld [vmem:[%s10554_s5 + $0x114] sm:$0xf]  ;;  %v5932_v15 = vld [vmem:[%s10554_s5 + $0x118] sm:$0xf0]  ;;  %v5906_v3 = vld [vmem:[%s10554_s5 + $0xe0] sm:$0xf] }
 0x2e5   : > { %v2208_v61 = vpop.f32.mrf.mxu2 }
 0x2e6   : > { %v8750_v30 = vpop.f32.mrf.mxu3  ;;  %v2254_v0 = vmax.f32 %v2114_v46, %v2208_v61  ;;  %v7216_v46 = vld [vmem:[%s10554_s5 + $0x144] sm:$0xf]  ;;  %v5955_v61 = vor.u32 %v7217_v31, %v5954_v34  ;;  %v7205_v34 = vld [vmem:[%s10554_s5 + $0xe4] sm:$0xf0] }
 0x2e7   : > { %v2116_v1 = vpop.f32.mrf.mxu0  ;;  %v2253_v59 = vmax.f32 %v8748_v44, %v8750_v30  ;;  %v5956_v44 = vld [vmem:[%s10554_s5 + $0x148] sm:$0xf0]  ;;  %v6010_v30 = vld [vmem:[%s10554_s5 + $0x1b0] sm:$0xf] }
 0x2e8   : > { %v2142_v38 = vpop.f32.mrf.mxu1 }
 0x2e9   : > { %v2265_v32 = vpack.c.bf16 %v2253_v59, %v2251_v26  ;;  %v5924_v59 = vld [vmem:[%s10554_s5 + $0x108] sm:$0xf0]  ;;  %v5914_v26 = vld [vmem:[%s10554_s5 + $0xf0] sm:$0xf] }
 0x2ed   : > { %v2210_v60 = vpop.f32.mrf.mxu2 }
 0x2ee   : > { %v2236_v42 = vpop.f32.mrf.mxu3  ;;  %v2256_v27 = vmax.f32 %v2116_v1, %v2210_v60  ;;  %v7231_v1 = vld [vmem:[%s10554_s5 + $0x1b4] sm:$0xf0]  ;;  %v5946_v60 = vld [vmem:[%s10554_s5 + $0x130] sm:$0xf] }
 0x2ef   : > { %v2119_v48 = vpop.f32.mrf.mxu0  ;;  %v2255_v22 = vmax.f32 %v2142_v38, %v2236_v42  ;;  %v5959_v38 = vor.u32 %v7216_v46, %v5956_v44  ;;  %v7215_v42 = vld [vmem:[%s10554_s5 + $0x134] sm:$0xf0]  ;;  %v7204_v46 = vld [vmem:[%s10554_s5 + $0xe4] sm:$0xf]  ;;  %v5908_v44 = vld [vmem:[%s10554_s5 + $0xe8] sm:$0xf0] }
 0x2f0   : > { %v2144_v45 = vpop.f32.mrf.mxu1  ;;  %v2266_v7 = vpack.c.bf16 %v2256_v27, %v2254_v0  ;;  %v7173_v0 = vld [vmem:[%s10553_s4 + $0x30] sm:$0xff] }
 0x2f5   : > { %v2213_v49 = vpop.f32.mrf.mxu2 }
 0x2f6   : > { %v2238_v40 = vpop.f32.mrf.mxu3  ;;  %v2258_v9 = vmax.f32 %v2119_v48, %v2213_v49  ;;  %v6011_v48 = vor.u32 %v7231_v1, %v6010_v30  ;;  %v7214_v49 = vld [vmem:[%s10554_s5 + $0x134] sm:$0xf]  ;;  %v7223_v30 = vld [vmem:[%s10554_s5 + $0x174] sm:$0xf0] }
 0x2f7   : > { %v2121_v57 = vpop.f32.mrf.mxu0  ;;  %v2257_v52 = vmax.f32 %v2144_v45, %v2238_v40  ;;  %v7230_v45 = vld [vmem:[%s10554_s5 + $0x1b4] sm:$0xf]  ;;  %v5948_v40 = vld [vmem:[%s10554_s5 + $0x138] sm:$0xf0] }
 0x2f8   : > { %v2147_v17 = vpop.f32.mrf.mxu1  ;;  %v7222_v1 = vld [vmem:[%s10554_s5 + $0x174] sm:$0xf] }
 0x2f9   : > { %v2267_v28 = vpack.c.bf16 %v2257_v52, %v2255_v22  ;;  %v7175_v52 = vld [vmem:[%s10553_s4 + $0x40] sm:$0xff] }
 0x2fd   : > { %v2215_v13 = vpop.f32.mrf.mxu2 }
 0x2fe   : > { %v2241_v24 = vpop.f32.mrf.mxu3  ;;  %v2260_v55 = vmax.f32 %v2121_v57, %v2215_v13  ;;  %v6012_v57 = vld [vmem:[%s10554_s5 + $0x1b8] sm:$0xf0]  ;;  %v6002_v13 = vld [vmem:[%s10554_s5 + $0x1a0] sm:$0xf] }
 0x2ff   : > { %v2124_v23 = vpop.f32.mrf.mxu0  ;;  %v2259_v51 = vmax.f32 %v2147_v17, %v2241_v24  ;;  %v6015_v17 = vor.u32 %v7230_v45, %v6012_v57  ;;  %v7229_v24 = vld [vmem:[%s10554_s5 + $0x1a4] sm:$0xf0]  ;;  %v5970_v45 = vld [vmem:[%s10554_s5 + $0x160] sm:$0xf] }
 0x300   : > { %v2149_v18 = vpop.f32.mrf.mxu1  ;;  %v2268_v10 = vpack.c.bf16 %v2260_v55, %v2258_v9  ;;  %v7212_v9 = vld [vmem:[%s10554_s5 + $0x124] sm:$0xf]  ;;  %v5940_v55 = vld [vmem:[%s10554_s5 + $0x128] sm:$0xf0] }
 0x301   : > { %v5943_v27 = vor.u32 %v7212_v9, %v5940_v55  ;;  %v6074_v55 = vld [vmem:[%s10554_s5 + $0x68] sm:$0xf0] }
 0x305   : > { %v2218_v33 = vpop.f32.mrf.mxu2 }
 0x306   : > { %v2243_v5 = vpop.f32.mrf.mxu3  ;;  %v2262_v12 = vmax.f32 %v2124_v23, %v2218_v33  ;;  %v5947_v23 = vor.u32 %v7215_v42, %v5946_v60  ;;  %v7228_v33 = vld [vmem:[%s10554_s5 + $0x1a4] sm:$0xf]  ;;  %v5980_v42 = vld [vmem:[%s10554_s5 + $0x178] sm:$0xf0] }
 0x307   : > { %v2126_v43 = vpop.f32.mrf.mxu0  ;;  %v2261_v62 = vmax.f32 %v2149_v18, %v2243_v5  ;;  %v6003_v18 = vor.u32 %v7229_v24, %v6002_v13  ;;  %v6004_v5 = vld [vmem:[%s10554_s5 + $0x1a8] sm:$0xf0]  ;;  %v6080_v24 = vld [vmem:[%s10554_s5 + $0x70] sm:$0xf] }
 0x308   : > { %v2152_v11 = vpop.f32.mrf.mxu1  ;;  %v2270_v63 = vpack.c.bf16 %v2262_v12, %v2262_v12  ;;  %v5951_v12 = vor.u32 %v7214_v49, %v5948_v40  ;;  %v5938_v43 = vld [vmem:[%s10554_s5 + $0x120] sm:$0xf]  ;;  %v7221_v49 = vld [vmem:[%s10554_s5 + $0x164] sm:$0xf0]  ;;  %v7220_v40 = vld [vmem:[%s10554_s5 + $0x164] sm:$0xf] }
 0x309   : > { %v2269_v56 = vpack.c.bf16 %v2261_v62, %v2259_v51  ;;  %v7226_v62 = vld [vmem:[%s10554_s5 + $0x194] sm:$0xf]  ;;  %v5971_v57 = vor.u32 %v7221_v49, %v5970_v45 }
 0x30a   : > { %v2305_v41 = vsel %vm2303_vm4, %v2270_v63, 0  ;;  %v6007_v63 = vor.u32 %v7228_v33, %v6004_v5  ;;  %v6082_v5 = vld [vmem:[%s10554_s5 + $0x78] sm:$0xf0]  ;;  %v7198_v45 = vld [vmem:[%s10554_s5 + $0xb4] sm:$0xf] }
 0x30b   : > { %2314 = vmatpush.bf16.msra.mxu0 %v2305_v41  ;;  %2399 = vmatpush.bf16.msra.mxu2 %v2305_v41 }
 0x30d   : > { %v2220_v47 = vpop.f32.mrf.mxu2 }
 0x30e   : > { %v2246_v16 = vpop.f32.mrf.mxu3  ;;  %v7211_v47 = vld [vmem:[%s10554_s5 + $0x114] sm:$0xf0] }
 0x30f   : > { %v2263_v14 = vmax.f32 %v2152_v11, %v2246_v16  ;;  %2315 = vmatpush.bf16.msra.mxu0 %v2268_v10  ;;  %2400 = vmatpush.bf16.msra.mxu2 %v2268_v10  ;;  %v7213_v11 = vld [vmem:[%s10554_s5 + $0x124] sm:$0xf0]  ;;  %v5994_v16 = vld [vmem:[%s10554_s5 + $0x190] sm:$0xf] }
 0x310   : > { %v2154_v4 = vpop.f32.mrf.mxu1 }
 0x311   : > { %v2271_v19 = vpack.c.bf16 %v2263_v14, %v2263_v14  ;;  %v7227_v4 = vld [vmem:[%s10554_s5 + $0x194] sm:$0xf0] }
 0x313   : > { %v2308_v20 = vsel %vm2303_vm4, %v2271_v19, 0  ;;  %2316 = vmatpush.bf16.msra.mxu0 %v2266_v7  ;;  %2401 = vmatpush.bf16.msra.mxu2 %v2266_v7  ;;  %v5935_v19 = vor.u32 %v7210_v53, %v5932_v15  ;;  %v6056_v53 = vld [vmem:[%s10554_s5 + $0x40] sm:$0xf]  ;;  %v7185_v15 = vld [vmem:[%s10554_s5 + $0x44] sm:$0xf0] }
 0x314   : > { %2338 = vmatpush.bf16.msra.mxu1 %v2308_v20  ;;  %2423 = vmatpush.bf16.msra.mxu3 %v2308_v20 }
 0x316   : > { %v2248_v25 = vpop.f32.mrf.mxu3 }
 0x317   : > { %2317 = vmatpush.bf16.msra.mxu0 %v2264_v6  ;;  %2402 = vmatpush.bf16.msra.mxu2 %v2264_v6  ;;  %v7208_v25 = vld [vmem:[%s10554_s5 + $0x104] sm:$0xf] }
 0x318   : > { %2339 = vmatpush.bf16.msra.mxu1 %v2269_v56  ;;  %2424 = vmatpush.bf16.msra.mxu3 %v2269_v56 }
 0x31a   : > { %5846 = vmatmul.msk.bf16.vlgmr.msra.gmra.mxu2 %vm2293_vm5, %v7170_v21  ;;  %5822 = vmatmul.msk.bf16.vlgmr.msra.gmra.mxu0 %vm2293_vm5, %v7167_v54 }
 0x31b   : > { %2484 = vmatpush.bf16.msrb.mxu0 %v2305_v41  ;;  %2741 = vmatpush.bf16.msrb.mxu2 %v5963_v37  ;;  %v5939_v41 = vor.u32 %v7213_v11, %v5938_v43  ;;  %v5988_v37 = vld [vmem:[%s10554_s5 + $0x188] sm:$0xf0]  ;;  %v6072_v43 = vld [vmem:[%s10554_s5 + $0x60] sm:$0xf]  ;;  %v7189_v11 = vld [vmem:[%s10554_s5 + $0x64] sm:$0xf0] }
 0x31c   : > { %2340 = vmatpush.bf16.msra.mxu1 %v2267_v28  ;;  %2425 = vmatpush.bf16.msra.mxu3 %v2267_v28  ;;  %v5991_v31 = vor.u32 %v7224_v58, %v5988_v37  ;;  %v6073_v9 = vor.u32 %v7189_v11, %v6072_v43  ;;  %v7200_v58 = vld [vmem:[%s10554_s5 + $0xc4] sm:$0xf]  ;;  %v6122_v37 = vld [vmem:[%s10554_s5 + $0xc8] sm:$0xf0]  ;;  %v6096_v43 = vld [vmem:[%s10554_s5 + $0x90] sm:$0xf] }
 0x31d   : > { %v7195_v11 = vld [vmem:[%s10554_s5 + $0x94] sm:$0xf0] }
 0x31f   : > { %2485 = vmatpush.bf16.msrb.mxu0 %v2268_v10  ;;  %2742 = vmatpush.bf16.msrb.mxu2 %v5955_v61  ;;  %v5930_v10 = vld [vmem:[%s10554_s5 + $0x110] sm:$0xf] }
 0x320   : > { %2341 = vmatpush.bf16.msra.mxu1 %v2265_v32  ;;  %2426 = vmatpush.bf16.msra.mxu3 %v2265_v32  ;;  %v5931_v14 = vor.u32 %v7211_v47, %v5930_v10  ;;  %v5978_v61 = vld [vmem:[%s10554_s5 + $0x170] sm:$0xf]  ;;  %v7187_v10 = vld [vmem:[%s10554_s5 + $0x54] sm:$0xf0]  ;;  %v7186_v47 = vld [vmem:[%s10554_s5 + $0x54] sm:$0xf] }
 0x321   : > { %v5979_v60 = vor.u32 %v7223_v30, %v5978_v61  ;;  %v7180_v61 = vld [vmem:[%s10554_s5 + $0x24] sm:$0xf]  ;;  %v6042_v30 = vld [vmem:[%s10554_s5 + $0x28] sm:$0xf0] }
 0x323   : > { %2486 = vmatpush.bf16.msrb.mxu0 %v2266_v7  ;;  %5849 = vmatmul.msk.bf16.vlgmr.msra.gmra.mxu3 %vm2293_vm5, %v7170_v21  ;;  %v5995_v7 = vor.u32 %v7227_v4, %v5994_v16  ;;  %v7209_v21 = vld [vmem:[%s10554_s5 + $0x104] sm:$0xf0] }
 0x324   : > { %2508 = vmatpush.bf16.msrb.mxu1 %v2308_v20  ;;  %2767 = vmatpush.bf16.msrb.mxu3 %v6011_v48  ;;  %v5996_v20 = vld [vmem:[%s10554_s5 + $0x198] sm:$0xf0]  ;;  %v5983_v48 = vor.u32 %v7222_v1, %v5980_v42  ;;  %v6112_v42 = vld [vmem:[%s10554_s5 + $0xb0] sm:$0xf] }
 0x325   : > { %5825 = vmatmul.msk.bf16.vlgmr.msra.gmra.mxu1 %vm2293_vm5, %v7167_v54  ;;  %2743 = vmatpush.bf16.msrb.mxu2 %v5947_v23  ;;  %v5999_v51 = vor.u32 %v7226_v62, %v5996_v20  ;;  %v7206_v54 = vld [vmem:[%s10554_s5 + $0xf4] sm:$0xf]  ;;  %v7191_v23 = vld [vmem:[%s10554_s5 + $0x74] sm:$0xf0]  ;;  %v6058_v62 = vld [vmem:[%s10554_s5 + $0x48] sm:$0xf0] }
 0x326   : > { %v6081_v33 = vor.u32 %v7191_v23, %v6080_v24  ;;  %v6104_v24 = vld [vmem:[%s10554_s5 + $0xa0] sm:$0xf]  ;;  %v7197_v23 = vld [vmem:[%s10554_s5 + $0xa4] sm:$0xf0] }
 0x327   : > { %2487 = vmatpush.bf16.msrb.mxu0 %v2264_v6  ;;  %v7174_v6 = vld [vmem:[%s10553_s4 + $0x38] sm:$0xff] }
 0x328   : > { %2509 = vmatpush.bf16.msrb.mxu1 %v2269_v56  ;;  %2768 = vmatpush.bf16.msrb.mxu3 %v6003_v18  ;;  %v5922_v56 = vld [vmem:[%s10554_s5 + $0x100] sm:$0xf]  ;;  %v7190_v18 = vld [vmem:[%s10554_s5 + $0x74] sm:$0xf] }
 0x329   : > { %2744 = vmatpush.bf16.msrb.mxu2 %v5939_v41  ;;  %v5923_v22 = vor.u32 %v7209_v21, %v5922_v56  ;;  %v6128_v56 = vld [vmem:[%s10554_s5 + $0xd0] sm:$0xf]  ;;  %v7203_v21 = vld [vmem:[%s10554_s5 + $0xd4] sm:$0xf0] }
 0x32a   : > { %5847 = vmatmul.msk.bf16.gmra.mxu2 %vm2293_vm5, %v7171_v35  ;;  %5823 = vmatmul.msk.bf16.gmra.mxu0 %vm2293_vm5, %v7168_v2 }
 0x32b   : > { %2789 = vmatpush.bf16.msra.mxu0 %v5967_v29  ;;  %v5907_v29 = vor.u32 %v7205_v34, %v5906_v3  ;;  %v6040_v3 = vld [vmem:[%s10554_s5 + $0x20] sm:$0xf]  ;;  %v7181_v34 = vld [vmem:[%s10554_s5 + $0x24] sm:$0xf0] }
 0x32c   : > { %2510 = vmatpush.bf16.msrb.mxu1 %v2267_v28  ;;  %2769 = vmatpush.bf16.msrb.mxu3 %v5995_v7  ;;  %v5927_v28 = vor.u32 %v7208_v25, %v5924_v59  ;;  %v7184_v7 = vld [vmem:[%s10554_s5 + $0x44] sm:$0xf]  ;;  %v7202_v25 = vld [vmem:[%s10554_s5 + $0xd4] sm:$0xf]  ;;  %v6130_v59 = vld [vmem:[%s10554_s5 + $0xd8] sm:$0xf0] }
 0x32d   : > { %2745 = vmatpush.bf16.msrb.mxu2 %v5931_v14  ;;  %v6066_v14 = vld [vmem:[%s10554_s5 + $0x58] sm:$0xf0] }
 0x32e   : > { %v6069_v4 = vor.u32 %v7186_v47, %v6066_v14  ;;  %v7177_v47 = vld [vmem:[%s10554_s5 + $0x4] sm:$0xf0] }
 0x32f   : > { %2790 = vmatpush.bf16.msra.mxu0 %v5959_v38  ;;  %v5911_v38 = vor.u32 %v7204_v46, %v5908_v44  ;;  %v6125_v46 = vor.u32 %v7200_v58, %v6122_v37  ;;  %v6041_v44 = vor.u32 %v7181_v34, %v6040_v3  ;;  %v6226_v58 = vld [vmem:[%s10554_s5 + $0x230] sm:$0xf]  ;;  %v7246_v37 = vld [vmem:[%s10554_s5 + $0x234] sm:$0xf]  ;;  %v6228_v34 = vld [vmem:[%s10554_s5 + $0x238] sm:$0xf0] }
 0x330   : > { %2511 = vmatpush.bf16.msrb.mxu1 %v2265_v32  ;;  %v7207_v32 = vld [vmem:[%s10554_s5 + $0xf4] sm:$0xf0] }
 0x331   : > { %2746 = vmatpush.bf16.msrb.mxu2 %v5923_v22  ;;  %v6129_v22 = vor.u32 %v7203_v21, %v6128_v56  ;;  %v7193_v56 = vld [vmem:[%s10554_s5 + $0x84] sm:$0xf0] }
 0x333   : > { %5850 = vmatmul.msk.bf16.gmra.mxu3 %vm2293_vm5, %v7171_v35  ;;  %2791 = vmatpush.bf16.msra.mxu0 %v5951_v12  ;;  %v5915_v35 = vor.u32 %v7207_v32, %v5914_v26  ;;  %v6085_v12 = vor.u32 %v7190_v18, %v6082_v5  ;;  %v7183_v26 = vld [vmem:[%s10554_s5 + $0x34] sm:$0xf0]  ;;  %v6133_v32 = vor.u32 %v7202_v25, %v6130_v59  ;;  %v7196_v18 = vld [vmem:[%s10554_s5 + $0xa4] sm:$0xf] }
 0x334   : > { %2815 = vmatpush.bf16.msra.mxu1 %v6015_v17  ;;  %v5972_v17 = vld [vmem:[%s10554_s5 + $0x168] sm:$0xf0]  ;;  %v6105_v5 = vor.u32 %v7197_v23, %v6104_v24  ;;  %v7192_v25 = vld [vmem:[%s10554_s5 + $0x84] sm:$0xf]  ;;  %v6212_v24 = vld [vmem:[%s10554_s5 + $0x218] sm:$0xf0] }
 0x335   : > { %5826 = vmatmul.msk.bf16.gmra.mxu1 %vm2293_vm5, %v7168_v2  ;;  %v5916_v2 = vld [vmem:[%s10554_s5 + $0xf8] sm:$0xf0]  ;;  %2747 = vmatpush.bf16.msrb.mxu2 %v5915_v35  ;;  %v5975_v13 = vor.u32 %v7220_v40, %v5972_v17  ;;  %v7182_v35 = vld [vmem:[%s10554_s5 + $0x34] sm:$0xf]  ;;  %v7179_v17 = vld [vmem:[%s10554_s5 + $0x14] sm:$0xf0] }
 0x336   : > { %v6114_v40 = vld [vmem:[%s10554_s5 + $0xb8] sm:$0xf0]  ;;  %v6274_v23 = vld [vmem:[%s10554_s5 + $0x290] sm:$0xf] }
 0x337   : > { %2792 = vmatpush.bf16.msra.mxu0 %v5943_v27  ;;  %v6064_v27 = vld [vmem:[%s10554_s5 + $0x50] sm:$0xf] }
 0x338   : > { %2816 = vmatpush.bf16.msra.mxu1 %v6007_v63  ;;  %v7188_v63 = vld [vmem:[%s10554_s5 + $0x64] sm:$0xf]  ;;  %v6065_v16 = vor.u32 %v7187_v10, %v6064_v27  ;;  %v6098_v27 = vld [vmem:[%s10554_s5 + $0x98] sm:$0xf0]  ;;  %v6024_v10 = vld [vmem:[%s10554_s5] sm:$0xf] }
 0x339   : > { %2748 = vmatpush.bf16.msrb.mxu2 %v5907_v29  ;;  %v6025_v14 = vor.u32 %v7177_v47, %v6024_v10 }
 0x33a   : > { %5848 = vmatmul.msk.bf16.gmra.mxu2 %vm2293_vm5, %v7172_v8  ;;  %5824 = vmatmul.msk.bf16.gmra.mxu0 %vm2293_vm5, %v7169_v36 }
 0x33b   : > { %2793 = vmatpush.bf16.msra.mxu0 %v5935_v19  ;;  %v6057_v19 = vor.u32 %v7185_v15, %v6056_v53 }
 0x33c   : > { %2817 = vmatpush.bf16.msra.mxu1 %v5999_v51  ;;  %v6061_v51 = vor.u32 %v7184_v7, %v6058_v62  ;;  %v6026_v62 = vld [vmem:[%s10554_s5 + $0x8] sm:$0xf0] }
 0x33d   : > { %2986 = vmatpush.bf16.msra.mxu2 %v6081_v33 }
 0x33f   : > { %2794 = vmatpush.bf16.msra.mxu0 %v5927_v28  ;;  %v6048_v28 = vld [vmem:[%s10554_s5 + $0x30] sm:$0xf] }
 0x340   : > { %2818 = vmatpush.bf16.msra.mxu1 %v5991_v31 }
 0x341   : > { %2987 = vmatpush.bf16.msra.mxu2 %v6073_v9  ;;  %v7178_v9 = vld [vmem:[%s10554_s5 + $0x14] sm:$0xf] }
 0x343   : > { %5851 = vmatmul.msk.bf16.gmra.mxu3 %vm2293_vm5, %v7172_v8  ;;  %v5919_v8 = vor.u32 %v7206_v54, %v5916_v2  ;;  %v6049_v54 = vor.u32 %v7183_v26, %v6048_v28  ;;  %v6050_v2 = vld [vmem:[%s10554_s5 + $0x38] sm:$0xf0] }
 0x344   : > { %2819 = vmatpush.bf16.msra.mxu1 %v5983_v48  ;;  %v7199_v48 = vld [vmem:[%s10554_s5 + $0xb4] sm:$0xf0] }
 0x345   : > { %5827 = vmatmul.msk.bf16.gmra.mxu1 %vm2293_vm5, %v7169_v36  ;;  %v5986_v36 = vld [vmem:[%s10554_s5 + $0x180] sm:$0xf]  ;;  %2795 = vmatpush.bf16.msra.mxu0 %v5919_v8  ;;  %v6053_v8 = vor.u32 %v7182_v35, %v6050_v2  ;;  %v6113_v49 = vor.u32 %v7199_v48, %v6112_v42  ;;  %v6220_v42 = vld [vmem:[%s10554_s5 + $0x228] sm:$0xf0] }
 0x346   : > { %v5987_v50 = vor.u32 %v7225_v39, %v5986_v36  ;;  %2988 = vmatpush.bf16.msra.mxu2 %v6065_v16  ;;  %v6120_v36 = vld [vmem:[%s10554_s5 + $0xc0] sm:$0xf]  ;;  %v7201_v39 = vld [vmem:[%s10554_s5 + $0xc4] sm:$0xf0] }
 0x348   : > { %2770 = vmatpush.bf16.msrb.mxu3 %v5987_v50  ;;  %2820 = vmatpush.bf16.msra.mxu1 %v5975_v13  ;;  %v6121_v50 = vor.u32 %v7201_v39, %v6120_v36  ;;  %v6117_v13 = vor.u32 %v7198_v45, %v6114_v40  ;;  %v6210_v40 = vld [vmem:[%s10554_s5 + $0x210] sm:$0xf] }
 0x349   : > { %2796 = vmatpush.bf16.msra.mxu0 %v5911_v38  ;;  %v6045_v38 = vor.u32 %v7180_v61, %v6042_v30  ;;  %v6218_v61 = vld [vmem:[%s10554_s5 + $0x220] sm:$0xf]  ;;  %v7245_v30 = vld [vmem:[%s10554_s5 + $0x224] sm:$0xf0] }
 0x34a   : > { %5870 = vmatmul.msk.bf16.vlgmr.msrb.gmra.mxu0 %vm2293_vm5, %v7173_v0  ;;  %2989 = vmatpush.bf16.msra.mxu2 %v6057_v19  ;;  %v6097_v19 = vor.u32 %v7195_v11, %v6096_v43  ;;  %v6276_v43 = vld [vmem:[%s10554_s5 + $0x298] sm:$0xf0]  ;;  %v6202_v11 = vld [vmem:[%s10554_s5 + $0x200] sm:$0xf] }
 0x34c   : > { %2771 = vmatpush.bf16.msrb.mxu3 %v5979_v60 }
 0x34d   : > { %3034 = vmatpush.bf16.msrb.mxu0 %v6085_v12  ;;  %v6106_v12 = vld [vmem:[%s10554_s5 + $0xa8] sm:$0xf0] }
 0x34e   : > { %2990 = vmatpush.bf16.msra.mxu2 %v6049_v54 }
 0x350   : > { %2772 = vmatpush.bf16.msrb.mxu3 %v5971_v57  ;;  %v6032_v57 = vld [vmem:[%s10554_s5 + $0x10] sm:$0xf] }
 0x351   : > { %v6033_v33 = vor.u32 %v7179_v17, %v6032_v57  ;;  %v7243_v57 = vld [vmem:[%s10554_s5 + $0x214] sm:$0xf0]  ;;  %v7242_v17 = vld [vmem:[%s10554_s5 + $0x214] sm:$0xf] }
 0x352   : > { %2991 = vmatpush.bf16.msra.mxu2 %v6041_v44 }
 0x354   : > { %3012 = vmatpush.bf16.msra.mxu3 %v6129_v22  ;;  %v6090_v22 = vld [vmem:[%s10554_s5 + $0x88] sm:$0xf0] }
 0x355   : > { %5873 = vmatmul.msk.bf16.vlgmr.msrb.gmra.mxu1 %vm2293_vm5, %v7173_v0  ;;  %v6077_v0 = vor.u32 %v7188_v63, %v6074_v55  ;;  %v6109_v63 = vor.u32 %v7196_v18, %v6106_v12  ;;  %v6034_v55 = vld [vmem:[%s10554_s5 + $0x18] sm:$0xf0]  ;;  %v6093_v28 = vor.u32 %v7192_v25, %v6090_v22  ;;  %v7259_v18 = vld [vmem:[%s10554_s5 + $0x294] sm:$0xf0]  ;;  %v6186_v22 = vld [vmem:[%s10554_s5 + $0x1e0] sm:$0xf] }
 0x356   : > { %3060 = vmatpush.bf16.msrb.mxu1 %v6133_v32  ;;  %2992 = vmatpush.bf16.msra.mxu2 %v6033_v33  ;;  %v6215_v33 = vor.u32 %v7242_v17, %v6212_v24  ;;  %v6275_v12 = vor.u32 %v7259_v18, %v6274_v23  ;;  %v7251_v17 = vld [vmem:[%s10554_s5 + $0x254] sm:$0xf0]  ;;  %v7234_v24 = vld [vmem:[%s10554_s5 + $0x1d4] sm:$0xf]  ;;  %v6180_v23 = vld [vmem:[%s10554_s5 + $0x1d8] sm:$0xf0] }
 0x357   : > { %3035 = vmatpush.bf16.msrb.mxu0 %v6077_v0  ;;  %v6037_v0 = vor.u32 %v7178_v9, %v6034_v55  ;;  %v7250_v18 = vld [vmem:[%s10554_s5 + $0x254] sm:$0xf] }
 0x358   : > { %3013 = vmatpush.bf16.msra.mxu3 %v6121_v50  ;;  %v7247_v50 = vld [vmem:[%s10554_s5 + $0x234] sm:$0xf0] }
 0x359   : > { %v6227_v3 = vor.u32 %v7247_v50, %v6226_v58 }
 0x35a   : > { %5871 = vmatmul.msk.bf16.gmra.mxu0 %vm2293_vm5, %v7174_v6  ;;  %3061 = vmatpush.bf16.msrb.mxu1 %v6125_v46 }
 0x35b   : > { %3036 = vmatpush.bf16.msrb.mxu0 %v6069_v4  ;;  %v7176_v4 = vld [vmem:[%s10554_s5 + $0x4] sm:$0xf]  ;;  %2993 = vmatpush.bf16.msra.mxu2 %v6025_v14 }
 0x35c   : > { %3014 = vmatpush.bf16.msra.mxu3 %v6113_v49  ;;  %v6029_v21 = vor.u32 %v7176_v4, %v6026_v62  ;;  %v7256_v14 = vld [vmem:[%s10554_s5 + $0x284] sm:$0xf]  ;;  %v6268_v4 = vld [vmem:[%s10554_s5 + $0x288] sm:$0xf0] }
 0x35d   : > { %v6271_v62 = vor.u32 %v7256_v14, %v6268_v4  ;;  %v7248_v14 = vld [vmem:[%s10554_s5 + $0x244] sm:$0xf]  ;;  %v6236_v4 = vld [vmem:[%s10554_s5 + $0x248] sm:$0xf0] }
 0x35e   : > { %3062 = vmatpush.bf16.msrb.mxu1 %v6117_v13  ;;  %v6211_v13 = vor.u32 %v7243_v57, %v6210_v40  ;;  %v6252_v40 = vld [vmem:[%s10554_s5 + $0x268] sm:$0xf0]  ;;  %v6242_v57 = vld [vmem:[%s10554_s5 + $0x250] sm:$0xf] }
 0x35f   : > { %3037 = vmatpush.bf16.msrb.mxu0 %v6061_v51 }
 0x360   : > { %3015 = vmatpush.bf16.msra.mxu3 %v6105_v5  ;;  %v7258_v5 = vld [vmem:[%s10554_s5 + $0x294] sm:$0xf] }
 0x361   : > { %v6279_v9 = vor.u32 %v7258_v5, %v6276_v43  ;;  %v6183_v5 = vor.u32 %v7234_v24, %v6180_v23  ;;  %v6170_v43 = vld [vmem:[%s10554_s5 + $0x1c0] sm:$0xf] }
 0x362   : > { %3063 = vmatpush.bf16.msrb.mxu1 %v6109_v63  ;;  %v7241_v63 = vld [vmem:[%s10554_s5 + $0x204] sm:$0xf0] }
 0x363   : > { %3038 = vmatpush.bf16.msrb.mxu0 %v6053_v8  ;;  %v6203_v55 = vor.u32 %v7241_v63, %v6202_v11  ;;  %v7233_v11 = vld [vmem:[%s10554_s5 + $0x1c4] sm:$0xf0] }
 0x364   : > { %3016 = vmatpush.bf16.msra.mxu3 %v6097_v19  ;;  %v6171_v63 = vor.u32 %v7233_v11, %v6170_v43  ;;  %v6368_v11 = vld [vmem:[%s10554_s5 + $0x3b0] sm:$0xf] }
 0x365   : > { %5874 = vmatmul.msk.bf16.gmra.mxu1 %vm2293_vm5, %v7174_v6 }
 0x367   : > { %3039 = vmatpush.bf16.msrb.mxu0 %v6045_v38  ;;  %v6219_v38 = vor.u32 %v7245_v30, %v6218_v61  ;;  %v7235_v61 = vld [vmem:[%s10554_s5 + $0x1d4] sm:$0xf0] }
 0x36a   : > { %5872 = vmatmul.msk.bf16.gmra.mxu0 %vm2293_vm5, %v7175_v52 }
 0x36b   : > { %3040 = vmatpush.bf16.msrb.mxu0 %v6037_v0  ;;  %v7257_v0 = vld [vmem:[%s10554_s5 + $0x284] sm:$0xf0] }
 0x36f   : > { %3041 = vmatpush.bf16.msrb.mxu0 %v6029_v21  ;;  %v6196_v21 = vld [vmem:[%s10554_s5 + $0x1f8] sm:$0xf0] }
 0x375   : > { %5875 = vmatmul.msk.bf16.gmra.mxu1 %vm2293_vm5, %v7175_v52 }
 0x397   : > { %v9065_v29 = vpop.f32.mrf.mxu0 }
 0x39d   : > { %v2404_v41 = vpop.f32.mrf.mxu2 }
 0x3a2   : > { %v9138_v7 = vpop.f32.mrf.mxu1 }
 0x3a5   : > { %v2406_v20 = vpop.f32.mrf.mxu2 }
 0x3a6   : > { %v2428_v6 = vpop.f32.mrf.mxu3  ;;  %v9019_v52 = vpack.c.bf16 %v2406_v20, %v2404_v41  ;;  %v7194_v41 = vld [vmem:[%s10554_s5 + $0x94] sm:$0xf]  ;;  %v9143_v20 = vpop.f32.mrf.mxu0 }
 0x3a7   : > { %v6101_v51 = vor.u32 %v7194_v41, %v6098_v27  ;;  %v6266_v41 = vld [vmem:[%s10554_s5 + $0x280] sm:$0xf]  ;;  %v7240_v27 = vld [vmem:[%s10554_s5 + $0x204] sm:$0xf]  ;;  %v9248_v10 = vpack.c.bf16 %v9143_v20, %v9065_v29  ;;  %v6194_v20 = vld [vmem:[%s10554_s5 + $0x1f0] sm:$0xf] }
 0x3a8   : > { %2749 = vmatmul.bf16.vlgmr.msrb.gmra.mxu2 %v9019_v52  ;;  %2797 = vmatmul.bf16.vlgmr.msra.gmra.mxu0 %v9019_v52  ;;  %v6267_v29 = vor.u32 %v7257_v0, %v6266_v41  ;;  %v6234_v41 = vld [vmem:[%s10554_s5 + $0x240] sm:$0xf]  ;;  %v7249_v0 = vld [vmem:[%s10554_s5 + $0x244] sm:$0xf0] }
 0x3a9   : > { %3064 = vmatpush.bf16.msrb.mxu1 %v6101_v51  ;;  %3260 = vmatpush.bf16.msrb.mxu2 %v6227_v3  ;;  %v7239_v51 = vld [vmem:[%s10554_s5 + $0x1f4] sm:$0xf0] }
 0x3aa   : > { %v9161_v35 = vpop.f32.mrf.mxu1  ;;  %v7255_v3 = vld [vmem:[%s10554_s5 + $0x274] sm:$0xf0] }
 0x3ab   : > { %v9293_v58 = vpack.c.bf16 %v9161_v35, %v9138_v7  ;;  %v6260_v7 = vld [vmem:[%s10554_s5 + $0x278] sm:$0xf0]  ;;  %v6178_v35 = vld [vmem:[%s10554_s5 + $0x1d0] sm:$0xf] }
 0x3ad   : > { %v2409_v31 = vpop.f32.mrf.mxu2  ;;  %3065 = vmatpush.bf16.msrb.mxu1 %v6093_v28  ;;  %3261 = vmatpush.bf16.msrb.mxu2 %v6219_v38  ;;  %v7236_v28 = vld [vmem:[%s10554_s5 + $0x1e4] sm:$0xf]  ;;  %v7253_v38 = vld [vmem:[%s10554_s5 + $0x264] sm:$0xf0] }
 0x3ae   : > { %v2430_v1 = vpop.f32.mrf.mxu3  ;;  %v9167_v2 = vpop.f32.mrf.mxu0 }
 0x3af   : > { %v9073_v60 = vpack.c.bf16 %v2430_v1, %v2428_v6  ;;  %v6088_v6 = vld [vmem:[%s10554_s5 + $0x80] sm:$0xf]  ;;  %v7244_v1 = vld [vmem:[%s10554_s5 + $0x224] sm:$0xf] }
 0x3b0   : > { %v6089_v59 = vor.u32 %v7193_v56, %v6088_v6  ;;  %v6223_v48 = vor.u32 %v7244_v1, %v6220_v42  ;;  %v7238_v6 = vld [vmem:[%s10554_s5 + $0x1f4] sm:$0xf]  ;;  %v6195_v56 = vor.u32 %v7239_v51, %v6194_v20  ;;  %v6250_v1 = vld [vmem:[%s10554_s5 + $0x260] sm:$0xf]  ;;  %v7252_v42 = vld [vmem:[%s10554_s5 + $0x264] sm:$0xf] }
 0x3b1   : > { %6016 = vmatmul.msk.bf16.vlgmr.msrb.gmra.mxu3 %vm1329_vm2, %v9073_v60  ;;  %6019 = vmatmul.msk.bf16.vlgmr.msra.gmra.mxu1 %vm1329_vm2, %v9073_v60  ;;  %v6199_v25 = vor.u32 %v7238_v6, %v6196_v21  ;;  %v6400_v21 = vld [vmem:[%s10554_s5 + $0x3f0] sm:$0xf] }
 0x3b2   : > { %3017 = vmatpush.bf16.msra.mxu3 %v6089_v59  ;;  %v9185_v46 = vpop.f32.mrf.mxu1  ;;  %3262 = vmatpush.bf16.msrb.mxu2 %v6211_v13  ;;  %v7237_v59 = vld [vmem:[%s10554_s5 + $0x1e4] sm:$0xf0]  ;;  %v6255_v13 = vor.u32 %v7252_v42, %v6252_v40  ;;  %v7314_v42 = vld [vmem:[%s10554_s5 + $0x454] sm:$0xf] }
 0x3b3   : > { %3334 = vmatpush.bf16.msra.mxu1 %v6279_v9  ;;  %v7232_v9 = vld [vmem:[%s10554_s5 + $0x1c4] sm:$0xf] }
 0x3b5   : > { %v2411_v16 = vpop.f32.mrf.mxu2 }
 0x3b6   : > { %v2433_v53 = vpop.f32.mrf.mxu3  ;;  %v9136_v15 = vpack.c.bf16 %v2411_v16, %v2409_v31  ;;  %v6231_v31 = vor.u32 %v7246_v37, %v6228_v34  ;;  %v9187_v44 = vpop.f32.mrf.mxu0  ;;  %3286 = vmatpush.bf16.msrb.mxu3 %v6275_v12  ;;  %v6204_v16 = vld [vmem:[%s10554_s5 + $0x208] sm:$0xf0]  ;;  %3263 = vmatpush.bf16.msrb.mxu2 %v6203_v55  ;;  %v6258_v37 = vld [vmem:[%s10554_s5 + $0x270] sm:$0xf]  ;;  %v7254_v34 = vld [vmem:[%s10554_s5 + $0x274] sm:$0xf] }
 0x3b7   : > { %v6207_v19 = vor.u32 %v7240_v27, %v6204_v16  ;;  %3335 = vmatpush.bf16.msra.mxu1 %v6271_v62  ;;  %v6263_v30 = vor.u32 %v7254_v34, %v6260_v7  ;;  %v6244_v12 = vld [vmem:[%s10554_s5 + $0x258] sm:$0xf0]  ;;  %v6239_v62 = vor.u32 %v7248_v14, %v6236_v4  ;;  %v7299_v7 = vld [vmem:[%s10554_s5 + $0x3d4] sm:$0xf0]  ;;  %v6442_v14 = vld [vmem:[%s10554_s5 + $0x448] sm:$0xf0] }
 0x3b8   : > { %2754 = vmatmul.bf16.gmra.mxu2 %v9136_v15  ;;  %2802 = vmatmul.bf16.gmra.mxu0 %v9136_v15  ;;  %v6247_v55 = vor.u32 %v7250_v18, %v6244_v12  ;;  %v6378_v18 = vld [vmem:[%s10554_s5 + $0x3c8] sm:$0xf0]  ;;  %v6360_v4 = vld [vmem:[%s10554_s5 + $0x3a0] sm:$0xf] }
 0x3b9   : > { %3308 = vmatpush.bf16.msra.mxu0 %v6231_v31  ;;  %v6259_v31 = vor.u32 %v7255_v3, %v6258_v37 }
 0x3ba   : > { %v9250_v47 = vpop.f32.mrf.mxu1  ;;  %3287 = vmatpush.bf16.msrb.mxu3 %v6267_v29  ;;  %3264 = vmatpush.bf16.msrb.mxu2 %v6195_v56 }
 0x3bb   : > { %3336 = vmatpush.bf16.msra.mxu1 %v6263_v30  ;;  %v9379_v20 = vpack.c.bf16 %v9250_v47, %v9185_v46  ;;  %v7303_v46 = vld [vmem:[%s10554_s5 + $0x3f4] sm:$0xf0]  ;;  %v7302_v47 = vld [vmem:[%s10554_s5 + $0x3f4] sm:$0xf]  ;;  %v6386_v30 = vld [vmem:[%s10554_s5 + $0x3d8] sm:$0xf0] }
 0x3bd   : > { %v2414_v26 = vpop.f32.mrf.mxu2  ;;  %3309 = vmatpush.bf16.msra.mxu0 %v6223_v48  ;;  %v6179_v48 = vor.u32 %v7235_v61, %v6178_v35  ;;  %v7298_v35 = vld [vmem:[%s10554_s5 + $0x3d4] sm:$0xf] }
 0x3be   : > { %v2435_v32 = vpop.f32.mrf.mxu3  ;;  %3288 = vmatpush.bf16.msrb.mxu3 %v6259_v31  ;;  %v6384_v31 = vld [vmem:[%s10554_s5 + $0x3d0] sm:$0xf] }
 0x3bf   : > { %v9159_v54 = vpack.c.bf16 %v2435_v32, %v2433_v53  ;;  %v9261_v53 = vpop.f32.mrf.mxu0  ;;  %v6188_v32 = vld [vmem:[%s10554_s5 + $0x1e8] sm:$0xf0]  ;;  %3337 = vmatpush.bf16.msra.mxu1 %v6255_v13  ;;  %v6385_v61 = vor.u32 %v7299_v7, %v6384_v31  ;;  %v7296_v13 = vld [vmem:[%s10554_s5 + $0x3c4] sm:$0xf]  ;;  %v7290_v31 = vld [vmem:[%s10554_s5 + $0x394] sm:$0xf] }
 0x3c0   : > { %v6354_v7 = vld [vmem:[%s10554_s5 + $0x398] sm:$0xf0] }
 0x3c1   : > { %6017 = vmatmul.msk.bf16.gmra.mxu3 %vm1329_vm2, %v9159_v54  ;;  %6020 = vmatmul.msk.bf16.gmra.mxu1 %vm1329_vm2, %v9159_v54 }
 0x3c2   : > { %3310 = vmatpush.bf16.msra.mxu0 %v6215_v33  ;;  %v9346_v33 = vpack.c.bf16 %v9187_v44, %v9167_v2  ;;  %v6243_v2 = vor.u32 %v7251_v17, %v6242_v57  ;;  %v6172_v44 = vld [vmem:[%s10554_s5 + $0x1c8] sm:$0xf0]  ;;  %v6376_v57 = vld [vmem:[%s10554_s5 + $0x3c0] sm:$0xf]  ;;  %v7297_v17 = vld [vmem:[%s10554_s5 + $0x3c4] sm:$0xf0] }
 0x3c3   : > { %v6175_v27 = vor.u32 %v7232_v9, %v6172_v44  ;;  %3338 = vmatpush.bf16.msra.mxu1 %v6247_v55  ;;  %v6377_v23 = vor.u32 %v7297_v17, %v6376_v57  ;;  %v7294_v9 = vld [vmem:[%s10554_s5 + $0x3b4] sm:$0xf]  ;;  %v6370_v44 = vld [vmem:[%s10554_s5 + $0x3b8] sm:$0xf0]  ;;  %v6346_v17 = vld [vmem:[%s10554_s5 + $0x388] sm:$0xf0] }
 0x3c4   : > { %v6373_v55 = vor.u32 %v7294_v9, %v6370_v44  ;;  %v6408_v44 = vld [vmem:[%s10554_s5 + $0x400] sm:$0xf] }
 0x3c5   : > { %v2416_v8 = vpop.f32.mrf.mxu2 }
 0x3c6   : > { %v2438_v36 = vpop.f32.mrf.mxu3  ;;  %v9169_v39 = vpack.c.bf16 %v2416_v8, %v2414_v26  ;;  %3311 = vmatpush.bf16.msra.mxu0 %v6207_v19  ;;  %v6187_v26 = vor.u32 %v7237_v59, %v6186_v22  ;;  %v6191_v8 = vor.u32 %v7236_v28, %v6188_v32  ;;  %v6235_v19 = vor.u32 %v7249_v0, %v6234_v41  ;;  %v6392_v59 = vld [vmem:[%s10554_s5 + $0x3e0] sm:$0xf]  ;;  %v7301_v28 = vld [vmem:[%s10554_s5 + $0x3e4] sm:$0xf0] }
 0x3c7   : > { %v2331_v50 = vpop.f32.mrf.mxu0  ;;  %3339 = vmatpush.bf16.msra.mxu1 %v6239_v62  ;;  %v6440_v41 = vld [vmem:[%s10554_s5 + $0x440] sm:$0xf]  ;;  %v7313_v0 = vld [vmem:[%s10554_s5 + $0x444] sm:$0xf0] }
 0x3c8   : > { %2759 = vmatmul.bf16.gmra.mxu2 %v9169_v39  ;;  %2807 = vmatmul.bf16.gmra.mxu0 %v9169_v39  ;;  %v9388_v56 = vpack.c.bf16 %v2331_v50, %v9261_v53  ;;  %v6402_v53 = vld [vmem:[%s10554_s5 + $0x3f8] sm:$0xf0]  ;;  %v6394_v50 = vld [vmem:[%s10554_s5 + $0x3e8] sm:$0xf0] }
 0x3c9   : > { %3265 = vmatpush.bf16.msrb.mxu2 %v6187_v26  ;;  %v6405_v22 = vor.u32 %v7302_v47, %v6402_v53  ;;  %v7300_v26 = vld [vmem:[%s10554_s5 + $0x3e4] sm:$0xf]  ;;  %v7311_v53 = vld [vmem:[%s10554_s5 + $0x434] sm:$0xf0] }
 0x3ca   : > { %3312 = vmatpush.bf16.msra.mxu0 %v6199_v25  ;;  %v6401_v25 = vor.u32 %v7303_v46, %v6400_v21  ;;  %v6397_v3 = vor.u32 %v7300_v26, %v6394_v50  ;;  %v6362_v21 = vld [vmem:[%s10554_s5 + $0x3a8] sm:$0xf0]  ;;  %v6352_v26 = vld [vmem:[%s10554_s5 + $0x390] sm:$0xf] }
 0x3cd   : > { %3266 = vmatpush.bf16.msrb.mxu2 %v6179_v48 }
 0x3ce   : > { %v2440_v45 = vpop.f32.mrf.mxu3  ;;  %3313 = vmatpush.bf16.msra.mxu0 %v6191_v8  ;;  %v6393_v8 = vor.u32 %v7301_v28, %v6392_v59 }
 0x3cf   : > { %v9201_v49 = vpack.c.bf16 %v2440_v45, %v2438_v36  ;;  %v9289_v36 = vpop.f32.mrf.mxu1  ;;  %v6251_v45 = vor.u32 %v7253_v38, %v6250_v1  ;;  %v2489_v29 = vpop.f32.mrf.mxu0  ;;  %v7315_v1 = vld [vmem:[%s10554_s5 + $0x454] sm:$0xf0]  ;;  %v6389_v38 = vor.u32 %v7298_v35, %v6386_v30  ;;  %v6357_v35 = vor.u32 %v7290_v31, %v6354_v7  ;;  %v7309_v30 = vld [vmem:[%s10554_s5 + $0x424] sm:$0xf0]  ;;  %v6502_v7 = vld [vmem:[%s10554_s5 + $0x2f0] sm:$0xf] }
 0x3d1   : > { %6018 = vmatmul.msk.bf16.gmra.mxu3 %vm1329_vm2, %v9201_v49  ;;  %6021 = vmatmul.msk.bf16.gmra.mxu1 %vm1329_vm2, %v9201_v49 }
 0x3d2   : > { %3289 = vmatpush.bf16.msrb.mxu3 %v6251_v45  ;;  %3314 = vmatpush.bf16.msra.mxu0 %v6183_v5  ;;  %v6450_v45 = vld [vmem:[%s10554_s5 + $0x458] sm:$0xf0]  ;;  %v6381_v5 = vor.u32 %v7296_v13, %v6378_v18  ;;  %v7307_v18 = vld [vmem:[%s10554_s5 + $0x414] sm:$0xf0] }
 0x3d3   : > { %3267 = vmatpush.bf16.msrb.mxu2 %v6171_v63  ;;  %v6453_v40 = vor.u32 %v7314_v42, %v6450_v45  ;;  %v7295_v63 = vld [vmem:[%s10554_s5 + $0x3b4] sm:$0xf0]  ;;  %v6426_v42 = vld [vmem:[%s10554_s5 + $0x428] sm:$0xf0]  ;;  %v7289_v45 = vld [vmem:[%s10554_s5 + $0x384] sm:$0xf0] }
 0x3d6   : > { %3290 = vmatpush.bf16.msrb.mxu3 %v6243_v2  ;;  %3315 = vmatpush.bf16.msra.mxu0 %v6175_v27  ;;  %v6369_v2 = vor.u32 %v7295_v63, %v6368_v11  ;;  %v7312_v27 = vld [vmem:[%s10554_s5 + $0x444] sm:$0xf]  ;;  %v6418_v11 = vld [vmem:[%s10554_s5 + $0x418] sm:$0xf0] }
 0x3d7   : > { %v2355_v16 = vpop.f32.mrf.mxu1  ;;  %v2491_v6 = vpop.f32.mrf.mxu0 }
 0x3d8   : > { %2994 = vmatmul.bf16.vlgmr.msra.gmra.mxu2 %v9248_v10  ;;  %3042 = vmatmul.bf16.vlgmr.msrb.gmra.mxu0 %v9248_v10  ;;  %v9419_v34 = vpack.c.bf16 %v2355_v16, %v9289_v36  ;;  %v6448_v36 = vld [vmem:[%s10554_s5 + $0x450] sm:$0xf]  ;;  %v9458_v24 = vpack.c.bf16 %v2491_v6, %v2489_v29  ;;  %v6441_v16 = vor.u32 %v7313_v0, %v6440_v41  ;;  %v7293_v29 = vld [vmem:[%s10554_s5 + $0x3a4] sm:$0xf0]  ;;  %v7292_v6 = vld [vmem:[%s10554_s5 + $0x3a4] sm:$0xf] }
 0x3d9   : > { %3566 = vmatpush.bf16.msra.mxu2 %v6401_v25  ;;  %v6449_v48 = vor.u32 %v7315_v1, %v6448_v36  ;;  %v6361_v62 = vor.u32 %v7293_v29, %v6360_v4  ;;  %v6365_v46 = vor.u32 %v7292_v6, %v6362_v21  ;;  %v6432_v25 = vld [vmem:[%s10554_s5 + $0x430] sm:$0xf]  ;;  %v7308_v36 = vld [vmem:[%s10554_s5 + $0x424] sm:$0xf]  ;;  %v7274_v6 = vld [vmem:[%s10554_s5 + $0x314] sm:$0xf] }
 0x3da   : > { %3291 = vmatpush.bf16.msrb.mxu3 %v6235_v19  ;;  %3614 = vmatpush.bf16.msrb.mxu0 %v6405_v22  ;;  %v6445_v19 = vor.u32 %v7312_v27, %v6442_v14  ;;  %v7310_v22 = vld [vmem:[%s10554_s5 + $0x434] sm:$0xf]  ;;  %v6433_v28 = vor.u32 %v7311_v53, %v6432_v25  ;;  %v7304_v41 = vld [vmem:[%s10554_s5 + $0x404] sm:$0xf]  ;;  %v6410_v27 = vld [vmem:[%s10554_s5 + $0x408] sm:$0xf0] }
 0x3dd   : > { %3567 = vmatpush.bf16.msra.mxu2 %v6393_v8 }
 0x3de   : > { %3615 = vmatpush.bf16.msrb.mxu0 %v6397_v3 }
 0x3df   : > { %v9385_v51 = vpop.f32.mrf.mxu1  ;;  %v9416_v37 = vpop.f32.mrf.mxu0 }
 0x3e1   : > { %6134 = vmatmul.msk.bf16.vlgmr.msra.gmra.mxu3 %vm1329_vm2, %v9293_v58  ;;  %6137 = vmatmul.msk.bf16.vlgmr.msrb.gmra.mxu1 %vm1329_vm2, %v9293_v58 }
 0x3e2   : > { %3568 = vmatpush.bf16.msra.mxu2 %v6385_v61  ;;  %3616 = vmatpush.bf16.msrb.mxu0 %v6389_v38  ;;  %v6424_v61 = vld [vmem:[%s10554_s5 + $0x420] sm:$0xf] }
 0x3e3   : > { %3592 = vmatpush.bf16.msra.mxu3 %v6449_v48  ;;  %3640 = vmatpush.bf16.msrb.mxu1 %v6453_v40  ;;  %v6425_v38 = vor.u32 %v7309_v30, %v6424_v61  ;;  %v6344_v48 = vld [vmem:[%s10554_s5 + $0x380] sm:$0xf]  ;;  %v6429_v40 = vor.u32 %v7308_v36, %v6426_v42  ;;  %v7270_v61 = vld [vmem:[%s10554_s5 + $0x2f4] sm:$0xf]  ;;  %v6504_v36 = vld [vmem:[%s10554_s5 + $0x2f8] sm:$0xf0] }
 0x3e4   : > { %v6345_v57 = vor.u32 %v7289_v45, %v6344_v48  ;;  %v6494_v48 = vld [vmem:[%s10554_s5 + $0x2e0] sm:$0xf]  ;;  %v7269_v45 = vld [vmem:[%s10554_s5 + $0x2e4] sm:$0xf0] }
 0x3e6   : > { %3569 = vmatpush.bf16.msra.mxu2 %v6377_v23  ;;  %3617 = vmatpush.bf16.msrb.mxu0 %v6381_v5  ;;  %v6416_v23 = vld [vmem:[%s10554_s5 + $0x410] sm:$0xf]  ;;  %v7306_v5 = vld [vmem:[%s10554_s5 + $0x414] sm:$0xf] }
 0x3e7   : > { %v2515_v32 = vpop.f32.mrf.mxu1  ;;  %v2496_v43 = vpop.f32.mrf.mxu0  ;;  %3593 = vmatpush.bf16.msra.mxu3 %v6441_v16  ;;  %3641 = vmatpush.bf16.msrb.mxu1 %v6445_v19  ;;  %v6421_v63 = vor.u32 %v7306_v5, %v6418_v11  ;;  %v6413_v16 = vor.u32 %v7304_v41, %v6410_v27  ;;  %v6566_v11 = vld [vmem:[%s10554_s5 + $0x370] sm:$0xf]  ;;  %v7267_v41 = vld [vmem:[%s10554_s5 + $0x2d4] sm:$0xf0] }
 0x3e8   : > { %2999 = vmatmul.bf16.gmra.mxu2 %v9346_v33  ;;  %3047 = vmatmul.bf16.gmra.mxu0 %v9346_v33  ;;  %v9504_v47 = vpack.c.bf16 %v2515_v32, %v9385_v51  ;;  %v6434_v51 = vld [vmem:[%s10554_s5 + $0x438] sm:$0xf0]  ;;  %v7291_v32 = vld [vmem:[%s10554_s5 + $0x394] sm:$0xf0]  ;;  %v9544_v1 = vpack.c.bf16 %v2496_v43, %v9416_v37  ;;  %v7288_v37 = vld [vmem:[%s10554_s5 + $0x384] sm:$0xf]  ;;  %v6417_v43 = vor.u32 %v7307_v18, %v6416_v23 }
 0x3e9   : > { %v6437_v50 = vor.u32 %v7310_v22, %v6434_v51  ;;  %v6353_v3 = vor.u32 %v7291_v32, %v6352_v26  ;;  %v6349_v13 = vor.u32 %v7288_v37, %v6346_v17  ;;  %v6510_v22 = vld [vmem:[%s10554_s5 + $0x300] sm:$0xf]  ;;  %v6512_v26 = vld [vmem:[%s10554_s5 + $0x308] sm:$0xf0]  ;;  %v6495_v37 = vor.u32 %v7269_v45, %v6494_v48  ;;  %v6470_v48 = vld [vmem:[%s10554_s5 + $0x2b0] sm:$0xf] }
 0x3ea   : > { %3570 = vmatpush.bf16.msra.mxu2 %v6369_v2  ;;  %3618 = vmatpush.bf16.msrb.mxu0 %v6373_v55  ;;  %v7305_v55 = vld [vmem:[%s10554_s5 + $0x404] sm:$0xf0]  ;;  %v6496_v17 = vld [vmem:[%s10554_s5 + $0x2e8] sm:$0xf0]  ;;  %v7263_v45 = vld [vmem:[%s10554_s5 + $0x2b4] sm:$0xf0] }
 0x3eb   : > { %3594 = vmatpush.bf16.msra.mxu3 %v6433_v28  ;;  %3642 = vmatpush.bf16.msrb.mxu1 %v6437_v50  ;;  %v6409_v0 = vor.u32 %v7305_v55, %v6408_v44  ;;  %v7272_v28 = vld [vmem:[%s10554_s5 + $0x304] sm:$0xf]  ;;  %v6568_v44 = vld [vmem:[%s10554_s5 + $0x378] sm:$0xf0]  ;;  %v6486_v55 = vld [vmem:[%s10554_s5 + $0x2d0] sm:$0xf] }
 0x3ec   : > { %v6487_v27 = vor.u32 %v7267_v41, %v6486_v55  ;;  %v7261_v55 = vld [vmem:[%s10554_s5 + $0x2a4] sm:$0xf0] }
 0x3ee   : > { %3571 = vmatpush.bf16.msra.mxu2 %v6361_v62  ;;  %3619 = vmatpush.bf16.msrb.mxu0 %v6365_v46  ;;  %v6518_v62 = vld [vmem:[%s10554_s5 + $0x310] sm:$0xf]  ;;  %v6520_v46 = vld [vmem:[%s10554_s5 + $0x318] sm:$0xf0] }
 0x3ef   : > { %v9463_v12 = vpop.f32.mrf.mxu1  ;;  %v2499_v8 = vpop.f32.mrf.mxu0  ;;  %3595 = vmatpush.bf16.msra.mxu3 %v6425_v38  ;;  %3643 = vmatpush.bf16.msrb.mxu1 %v6429_v40  ;;  %v6523_v25 = vor.u32 %v7274_v6, %v6520_v46  ;;  %v6507_v38 = vor.u32 %v7270_v61, %v6504_v36  ;;  %v7268_v40 = vld [vmem:[%s10554_s5 + $0x2e4] sm:$0xf]  ;;  %v6550_v61 = vld [vmem:[%s10554_s5 + $0x350] sm:$0xf]  ;;  %v7282_v36 = vld [vmem:[%s10554_s5 + $0x354] sm:$0xf] }
 0x3f0   : > { %v6499_v18 = vor.u32 %v7268_v40, %v6496_v17  ;;  %v7284_v6 = vld [vmem:[%s10554_s5 + $0x364] sm:$0xf]  ;;  %v6472_v17 = vld [vmem:[%s10554_s5 + $0x2b8] sm:$0xf0] }
 0x3f1   : > { %6135 = vmatmul.msk.bf16.gmra.mxu3 %vm1329_vm2, %v9379_v20  ;;  %6138 = vmatmul.msk.bf16.gmra.mxu1 %vm1329_vm2, %v9379_v20 }
 0x3f2   : > { %3572 = vmatpush.bf16.msra.mxu2 %v6353_v3  ;;  %3620 = vmatpush.bf16.msrb.mxu0 %v6357_v35  ;;  %v7271_v35 = vld [vmem:[%s10554_s5 + $0x2f4] sm:$0xf0] }
 0x3f3   : > { %3596 = vmatpush.bf16.msra.mxu3 %v6417_v43  ;;  %3644 = vmatpush.bf16.msrb.mxu1 %v6421_v63  ;;  %v6503_v30 = vor.u32 %v7271_v35, %v6502_v7  ;;  %v7287_v63 = vld [vmem:[%s10554_s5 + $0x374] sm:$0xf0] }
 0x3f6   : > { %3573 = vmatpush.bf16.msra.mxu2 %v6345_v57  ;;  %3621 = vmatpush.bf16.msrb.mxu0 %v6349_v13 }
 0x3f7   : > { %v2520_v59 = vpop.f32.mrf.mxu1  ;;  %v2501_v2 = vpop.f32.mrf.mxu0  ;;  %3597 = vmatpush.bf16.msra.mxu3 %v6409_v0  ;;  %3645 = vmatpush.bf16.msrb.mxu1 %v6413_v16  ;;  %v7266_v16 = vld [vmem:[%s10554_s5 + $0x2d4] sm:$0xf] }
 0x3f8   : > { %3004 = vmatmul.bf16.gmra.mxu2 %v9388_v56  ;;  %3052 = vmatmul.bf16.gmra.mxu0 %v9388_v56  ;;  %v9588_v14 = vpack.c.bf16 %v2520_v59, %v9463_v12  ;;  %v9594_v4 = vpack.c.bf16 %v2501_v2, %v2499_v8  ;;  %v7275_v12 = vld [vmem:[%s10554_s5 + $0x314] sm:$0xf0]  ;;  %v7273_v59 = vld [vmem:[%s10554_s5 + $0x304] sm:$0xf0]  ;;  %v6515_v8 = vor.u32 %v7272_v28, %v6512_v26 }
 0x3f9   : > { %v6519_v21 = vor.u32 %v7275_v12, %v6518_v62  ;;  %v6511_v51 = vor.u32 %v7273_v59, %v6510_v22  ;;  %v6567_v2 = vor.u32 %v7287_v63, %v6566_v11  ;;  %v6558_v62 = vld [vmem:[%s10554_s5 + $0x360] sm:$0xf]  ;;  %v7285_v12 = vld [vmem:[%s10554_s5 + $0x364] sm:$0xf0]  ;;  %v7280_v11 = vld [vmem:[%s10554_s5 + $0x344] sm:$0xf] }
 0x3fa   : > { %v6559_v46 = vor.u32 %v7285_v12, %v6558_v62  ;;  %v7265_v22 = vld [vmem:[%s10554_s5 + $0x2c4] sm:$0xf0] }
 0x3ff   : > { %v2523_v9 = vpop.f32.mrf.mxu1 }
 0x401   : > { %6136 = vmatmul.msk.bf16.gmra.mxu3 %vm1329_vm2, %v9419_v34  ;;  %6139 = vmatmul.msk.bf16.gmra.mxu1 %vm1329_vm2, %v9419_v34 }
 0x407   : > { %v2525_v29 = vpop.f32.mrf.mxu1 }
 0x408   : > { %3268 = vmatmul.bf16.vlgmr.msrb.gmra.mxu2 %v9458_v24  ;;  %3316 = vmatmul.bf16.vlgmr.msra.gmra.mxu0 %v9458_v24  ;;  %v9622_v3 = vpack.c.bf16 %v2525_v29, %v2523_v9  ;;  %v7286_v9 = vld [vmem:[%s10554_s5 + $0x374] sm:$0xf] }
 0x409   : > { %3802 = vmatpush.bf16.msrb.mxu2 %v6519_v21  ;;  %3850 = vmatpush.bf16.msra.mxu0 %v6523_v25  ;;  %v6571_v0 = vor.u32 %v7286_v9, %v6568_v44  ;;  %v6560_v25 = vld [vmem:[%s10554_s5 + $0x368] sm:$0xf0]  ;;  %v6462_v44 = vld [vmem:[%s10554_s5 + $0x2a0] sm:$0xf] }
 0x40d   : > { %3803 = vmatpush.bf16.msrb.mxu2 %v6511_v51  ;;  %3851 = vmatpush.bf16.msra.mxu0 %v6515_v8  ;;  %v6563_v51 = vor.u32 %v7284_v6, %v6560_v25  ;;  %v6480_v8 = vld [vmem:[%s10554_s5 + $0x2c8] sm:$0xf0] }
 0x411   : > { %6280 = vmatmul.msk.bf16.vlgmr.msrb.gmra.mxu3 %vm1329_vm2, %v9504_v47  ;;  %6283 = vmatmul.msk.bf16.vlgmr.msra.gmra.mxu1 %vm1329_vm2, %v9504_v47 }
 0x412   : > { %3804 = vmatpush.bf16.msrb.mxu2 %v6503_v30  ;;  %3852 = vmatpush.bf16.msra.mxu0 %v6507_v38  ;;  %v7283_v30 = vld [vmem:[%s10554_s5 + $0x354] sm:$0xf0] }
 0x413   : > { %3828 = vmatpush.bf16.msrb.mxu3 %v6567_v2  ;;  %3876 = vmatpush.bf16.msra.mxu1 %v6571_v0  ;;  %v6551_v38 = vor.u32 %v7283_v30, %v6550_v61  ;;  %v6544_v2 = vld [vmem:[%s10554_s5 + $0x348] sm:$0xf0] }
 0x416   : > { %3805 = vmatpush.bf16.msrb.mxu2 %v6495_v37  ;;  %3853 = vmatpush.bf16.msra.mxu0 %v6499_v18  ;;  %v7262_v37 = vld [vmem:[%s10554_s5 + $0x2b4] sm:$0xf] }
 0x417   : > { %3829 = vmatpush.bf16.msrb.mxu3 %v6559_v46  ;;  %3877 = vmatpush.bf16.msra.mxu1 %v6563_v51  ;;  %v7278_v46 = vld [vmem:[%s10554_s5 + $0x334] sm:$0xf]  ;;  %v6526_v51 = vld [vmem:[%s10554_s5 + $0x320] sm:$0xf] }
 0x418   : > { %3273 = vmatmul.bf16.gmra.mxu2 %v9544_v1  ;;  %3321 = vmatmul.bf16.gmra.mxu0 %v9544_v1 }
 0x41a   : > { %3806 = vmatpush.bf16.msrb.mxu2 %v6487_v27  ;;  %v6547_v27 = vor.u32 %v7280_v11, %v6544_v2 }
 0x41b   : > { %3830 = vmatpush.bf16.msrb.mxu3 %v6551_v38 }
 0x421   : > { %6281 = vmatmul.msk.bf16.gmra.mxu3 %vm1329_vm2, %v9588_v14  ;;  %6284 = vmatmul.msk.bf16.gmra.mxu1 %vm1329_vm2, %v9588_v14 }
 0x425   : > { %v2798_v19 = vpop.f32.mrf.mxu0 }
 0x428   : > { %3278 = vmatmul.bf16.gmra.mxu2 %v9594_v4  ;;  %3326 = vmatmul.bf16.gmra.mxu0 %v9594_v4 }
 0x42b   : > { %v2750_v53 = vpop.f32.mrf.mxu2 }
 0x42d   : > { %v2800_v32 = vpop.f32.mrf.mxu0 }
 0x42e   : > { %v2822_v50 = vpop.f32.mrf.mxu1 }
 0x42f   : > { %v9624_v31 = vadd.f32 %v2822_v50, %v2798_v19 }
 0x431   : > { %6282 = vmatmul.msk.bf16.gmra.mxu3 %vm1329_vm2, %v9622_v3  ;;  %6285 = vmatmul.msk.bf16.gmra.mxu1 %vm1329_vm2, %v9622_v3 }
 0x433   : > { %v2752_v42 = vpop.f32.mrf.mxu2 }
 0x434   : > { %v2774_v57 = vpop.f32.mrf.mxu3 }
 0x435   : > { %v9654_v13 = vadd.f32 %v2774_v57, %v2750_v53  ;;  %v2803_v23 = vpop.f32.mrf.mxu0  ;;  %v6478_v53 = vld [vmem:[%s10554_s5 + $0x2c0] sm:$0xf]  ;;  %v6471_v57 = vor.u32 %v7263_v45, %v6470_v48 }
 0x436   : > { %v2824_v5 = vpop.f32.mrf.mxu1  ;;  %v6479_v26 = vor.u32 %v7265_v22, %v6478_v53  ;;  %v6536_v53 = vld [vmem:[%s10554_s5 + $0x338] sm:$0xf0] }
 0x437   : > { %v9656_v43 = vadd.f32 %v2824_v5, %v2800_v32  ;;  %v7264_v32 = vld [vmem:[%s10554_s5 + $0x2c4] sm:$0xf]  ;;  %v6542_v5 = vld [vmem:[%s10554_s5 + $0x340] sm:$0xf]  ;;  %v6539_v22 = vor.u32 %v7278_v46, %v6536_v53 }
 0x438   : > { %3574 = vmatmul.bf16.vlgmr.msra.gmra.mxu2 %v9019_v52  ;;  %3622 = vmatmul.bf16.vlgmr.msrb.gmra.mxu0 %v9019_v52  ;;  %v6488_v52 = vld [vmem:[%s10554_s5 + $0x2d8] sm:$0xf0]  ;;  %v6483_v7 = vor.u32 %v7264_v32, %v6480_v8 }
 0x439   : > { %v6491_v29 = vor.u32 %v7266_v16, %v6488_v52  ;;  %3807 = vmatpush.bf16.msrb.mxu2 %v6479_v26  ;;  %v6463_v16 = vor.u32 %v7261_v55, %v6462_v44  ;;  %v7260_v52 = vld [vmem:[%s10554_s5 + $0x2a4] sm:$0xf]  ;;  %v7277_v26 = vld [vmem:[%s10554_s5 + $0x324] sm:$0xf0] }
 0x43a   : > { %v6527_v8 = vor.u32 %v7277_v26, %v6526_v51  ;;  %v7324_v51 = vld [vmem:[%s10554_s5 + $0x4a4] sm:$0xf] }
 0x43b   : > { %v2755_v19 = vpop.f32.mrf.mxu2  ;;  %3854 = vmatpush.bf16.msra.mxu0 %v6491_v29  ;;  %v6464_v29 = vld [vmem:[%s10554_s5 + $0x2a8] sm:$0xf0] }
 0x43c   : > { %v2776_v21 = vpop.f32.mrf.mxu3  ;;  %v6467_v12 = vor.u32 %v7260_v52, %v6464_v29 }
 0x43d   : > { %v9702_v59 = vadd.f32 %v2776_v21, %v2752_v42  ;;  %v2805_v28 = vpop.f32.mrf.mxu0  ;;  %v6552_v42 = vld [vmem:[%s10554_s5 + $0x358] sm:$0xf0]  ;;  %3808 = vmatpush.bf16.msrb.mxu2 %v6471_v57  ;;  %v7279_v21 = vld [vmem:[%s10554_s5 + $0x334] sm:$0xf0] }
 0x43e   : > { %v2827_v50 = vpop.f32.mrf.mxu1  ;;  %v6555_v40 = vor.u32 %v7282_v36, %v6552_v42 }
 0x43f   : > { %v9710_v35 = vadd.f32 %v2827_v50, %v2803_v23  ;;  %3855 = vmatpush.bf16.msra.mxu0 %v6483_v7  ;;  %v6475_v23 = vor.u32 %v7262_v37, %v6472_v17  ;;  %v6528_v50 = vld [vmem:[%s10554_s5 + $0x328] sm:$0xf0] }
 0x440   : > { %3878 = vmatpush.bf16.msra.mxu1 %v6555_v40 }
 0x441   : > { %6454 = vmatmul.msk.bf16.vlgmr.msra.gmra.mxu3 %vm1329_vm2, %v9073_v60  ;;  %6457 = vmatmul.msk.bf16.vlgmr.msrb.gmra.mxu1 %vm1329_vm2, %v9073_v60  ;;  %v7281_v60 = vld [vmem:[%s10554_s5 + $0x344] sm:$0xf0] }
 0x442   : > { %v6543_v9 = vor.u32 %v7281_v60, %v6542_v5  ;;  %3809 = vmatpush.bf16.msrb.mxu2 %v6463_v16 }
 0x443   : > { %v2757_v18 = vpop.f32.mrf.mxu2  ;;  %3856 = vmatpush.bf16.msra.mxu0 %v6475_v23  ;;  %v6664_v23 = vld [vmem:[%s10554_s5 + $0x4d0] sm:$0xf] }
 0x444   : > { %v2779_v63 = vpop.f32.mrf.mxu3  ;;  %3831 = vmatpush.bf16.msrb.mxu3 %v6543_v9  ;;  %3879 = vmatpush.bf16.msra.mxu1 %v6547_v27  ;;  %v7329_v9 = vld [vmem:[%s10554_s5 + $0x4c4] sm:$0xf0] }
 0x445   : > { %v9758_v41 = vadd.f32 %v2779_v63, %v2755_v19  ;;  %v2808_v0 = vpop.f32.mrf.mxu0  ;;  %v6534_v19 = vld [vmem:[%s10554_s5 + $0x330] sm:$0xf]  ;;  %v6656_v63 = vld [vmem:[%s10554_s5 + $0x4c0] sm:$0xf] }
 0x446   : > { %v2829_v62 = vpop.f32.mrf.mxu1  ;;  %v6535_v25 = vor.u32 %v7279_v21, %v6534_v19  ;;  %v6657_v55 = vor.u32 %v7329_v9, %v6656_v63  ;;  %v7327_v19 = vld [vmem:[%s10554_s5 + $0x4b4] sm:$0xf0]  ;;  %v7326_v21 = vld [vmem:[%s10554_s5 + $0x4b4] sm:$0xf]  ;;  %v7341_v63 = vld [vmem:[%s10554_s5 + $0x524] sm:$0xf0] }
 0x447   : > { %v9766_v6 = vadd.f32 %v2829_v62, %v2805_v28  ;;  %3857 = vmatpush.bf16.msra.mxu0 %v6467_v12  ;;  %v7340_v9 = vld [vmem:[%s10554_s5 + $0x524] sm:$0xf] }
 0x448   : > { %3579 = vmatmul.bf16.gmra.mxu2 %v9136_v15  ;;  %3627 = vmatmul.bf16.gmra.mxu0 %v9136_v15  ;;  %v7276_v15 = vld [vmem:[%s10554_s5 + $0x324] sm:$0xf] }
 0x449   : > { %3832 = vmatpush.bf16.msrb.mxu3 %v6535_v25  ;;  %3880 = vmatpush.bf16.msra.mxu1 %v6539_v22  ;;  %v6531_v30 = vor.u32 %v7276_v15, %v6528_v50  ;;  %v6640_v22 = vld [vmem:[%s10554_s5 + $0x4a0] sm:$0xf] }
 0x44b   : > { %v2760_v28 = vpop.f32.mrf.mxu2 }
 0x44c   : > { %v2781_v32 = vpop.f32.mrf.mxu3 }
 0x44d   : > { %v9794_v7 = vadd.f32 %v2781_v32, %v2757_v18  ;;  %v2810_v61 = vpop.f32.mrf.mxu0  ;;  %3833 = vmatpush.bf16.msrb.mxu3 %v6527_v8  ;;  %3881 = vmatpush.bf16.msra.mxu1 %v6531_v30  ;;  %v7331_v18 = vld [vmem:[%s10554_s5 + $0x4d4] sm:$0xf0]  ;;  %v6642_v32 = vld [vmem:[%s10554_s5 + $0x4a8] sm:$0xf0] }
 0x44e   : > { %v2832_v36 = vpop.f32.mrf.mxu1  ;;  %v6665_v5 = vor.u32 %v7331_v18, %v6664_v23  ;;  %v7323_v23 = vld [vmem:[%s10554_s5 + $0x494] sm:$0xf0] }
 0x44f   : > { %v9796_v38 = vadd.f32 %v2832_v36, %v2808_v0  ;;  %v6658_v0 = vld [vmem:[%s10554_s5 + $0x4c8] sm:$0xf0] }
 0x450   : > { %4067 = vmatpush.bf16.msra.mxu2 %v6665_v5  ;;  %v7322_v5 = vld [vmem:[%s10554_s5 + $0x494] sm:$0xf] }
 0x451   : > { %6455 = vmatmul.msk.bf16.gmra.mxu3 %vm1329_vm2, %v9159_v54  ;;  %6458 = vmatmul.msk.bf16.gmra.mxu1 %vm1329_vm2, %v9159_v54  ;;  %v7330_v54 = vld [vmem:[%s10554_s5 + $0x4d4] sm:$0xf] }
 0x453   : > { %v2762_v42 = vpop.f32.mrf.mxu2 }
 0x454   : > { %v2784_v48 = vpop.f32.mrf.mxu3  ;;  %4068 = vmatpush.bf16.msra.mxu2 %v6657_v55  ;;  %v6706_v55 = vld [vmem:[%s10554_s5 + $0x528] sm:$0xf0] }
 0x455   : > { %v9802_v45 = vadd.f32 %v2784_v48, %v2760_v28  ;;  %v3043_v40 = vpop.f32.mrf.mxu0  ;;  %v7325_v28 = vld [vmem:[%s10554_s5 + $0x4a4] sm:$0xf0]  ;;  %v6712_v48 = vld [vmem:[%s10554_s5 + $0x530] sm:$0xf] }
 0x456   : > { %v2834_v57 = vpop.f32.mrf.mxu1  ;;  %v3044_v37 = vadd.f32 %v3043_v40, %v9624_v31  ;;  %v6666_v31 = vld [vmem:[%s10554_s5 + $0x4d8] sm:$0xf0]  ;;  %v7342_v40 = vld [vmem:[%s10554_s5 + $0x534] sm:$0xf] }
 0x457   : > { %v9805_v17 = vadd.f32 %v2834_v57, %v2810_v61  ;;  %v6669_v60 = vor.u32 %v7330_v54, %v6666_v31  ;;  %v6645_v61 = vor.u32 %v7324_v51, %v6642_v32  ;;  %v6714_v57 = vld [vmem:[%s10554_s5 + $0x538] sm:$0xf0] }
 0x458   : > { %3584 = vmatmul.bf16.gmra.mxu2 %v9169_v39  ;;  %3632 = vmatmul.bf16.gmra.mxu0 %v9169_v39  ;;  %v7328_v39 = vld [vmem:[%s10554_s5 + $0x4c4] sm:$0xf]  ;;  %v6717_v18 = vor.u32 %v7342_v40, %v6714_v57 }
 0x459   : > { %4115 = vmatpush.bf16.msrb.mxu0 %v6669_v60  ;;  %v6661_v52 = vor.u32 %v7328_v39, %v6658_v0  ;;  %v6624_v0 = vld [vmem:[%s10554_s5 + $0x480] sm:$0xf] }
 0x45a   : > { %4141 = vmatpush.bf16.msrb.mxu1 %v6717_v18  ;;  %v7317_v18 = vld [vmem:[%s10554_s5 + $0x464] sm:$0xf0] }
 0x45b   : > { %v2995_v11 = vpop.f32.mrf.mxu2 }
 0x45c   : > { %v2786_v2 = vpop.f32.mrf.mxu3  ;;  %v2996_v44 = vadd.f32 %v2995_v11, %v9654_v13  ;;  %v6648_v13 = vld [vmem:[%s10554_s5 + $0x4b0] sm:$0xf]  ;;  %v6704_v11 = vld [vmem:[%s10554_s5 + $0x520] sm:$0xf] }
 0x45d   : > { %v9834_v27 = vadd.f32 %v2786_v2, %v2762_v42  ;;  %v3045_v16 = vpop.f32.mrf.mxu0  ;;  %4116 = vmatpush.bf16.msrb.mxu0 %v6661_v52  ;;  %v6649_v46 = vor.u32 %v7327_v19, %v6648_v13  ;;  %v6626_v19 = vld [vmem:[%s10554_s5 + $0x488] sm:$0xf0] }
 0x45e   : > { %v3067_v29 = vpop.f32.mrf.mxu1  ;;  %v3046_v62 = vadd.f32 %v3045_v16, %v9656_v43  ;;  %v6650_v43 = vld [vmem:[%s10554_s5 + $0x4b8] sm:$0xf0]  ;;  %v7321_v16 = vld [vmem:[%s10554_s5 + $0x484] sm:$0xf0] }
 0x45f   : > { %v9837_v12 = vadd.f32 %v3067_v29, %v3044_v37  ;;  %v6653_v25 = vor.u32 %v7326_v21, %v6650_v43  ;;  %4069 = vmatpush.bf16.msra.mxu2 %v6649_v46  ;;  %v6632_v37 = vld [vmem:[%s10554_s5 + $0x490] sm:$0xf]  ;;  %v6625_v13 = vor.u32 %v7321_v16, %v6624_v0  ;;  %v6682_v0 = vld [vmem:[%s10554_s5 + $0x4f8] sm:$0xf0] }
 0x460   : > { %v6633_v54 = vor.u32 %v7323_v23, %v6632_v37  ;;  %v6690_v37 = vld [vmem:[%s10554_s5 + $0x508] sm:$0xf0]  ;;  %v6608_v23 = vld [vmem:[%s10554_s5 + $0x460] sm:$0xf] }
 0x461   : > { %6456 = vmatmul.msk.bf16.gmra.mxu3 %vm1329_vm2, %v9201_v49  ;;  %6459 = vmatmul.msk.bf16.gmra.mxu1 %vm1329_vm2, %v9201_v49  ;;  %v6641_v49 = vor.u32 %v7325_v28, %v6640_v22  ;;  %v7339_v22 = vld [vmem:[%s10554_s5 + $0x514] sm:$0xf0]  ;;  %v7338_v28 = vld [vmem:[%s10554_s5 + $0x514] sm:$0xf] }
 0x462   : > { %4117 = vmatpush.bf16.msrb.mxu0 %v6653_v25 }
 0x463   : > { %v2997_v53 = vpop.f32.mrf.mxu2  ;;  %4070 = vmatpush.bf16.msra.mxu2 %v6641_v49 }
 0x464   : > { %v3019_v26 = vpop.f32.mrf.mxu3  ;;  %v2998_v15 = vadd.f32 %v2997_v53, %v9702_v59  ;;  %v7343_v59 = vld [vmem:[%s10554_s5 + $0x534] sm:$0xf0]  ;;  %v6696_v53 = vld [vmem:[%s10554_s5 + $0x510] sm:$0xf] }
 0x465   : > { %v9868_v8 = vadd.f32 %v3019_v26, %v2996_v44  ;;  %v3048_v50 = vpop.f32.mrf.mxu0  ;;  %v6705_v44 = vor.u32 %v7341_v63, %v6704_v11  ;;  %v6697_v51 = vor.u32 %v7339_v22, %v6696_v53  ;;  %v6616_v26 = vld [vmem:[%s10554_s5 + $0x470] sm:$0xf] }
 0x466   : > { %v3069_v30 = vpop.f32.mrf.mxu1  ;;  %v3049_v36 = vadd.f32 %v3048_v50, %v9710_v35  ;;  %4118 = vmatpush.bf16.msrb.mxu0 %v6645_v61  ;;  %v6713_v35 = vor.u32 %v7343_v59, %v6712_v48  ;;  %v7318_v50 = vld [vmem:[%s10554_s5 + $0x474] sm:$0xf]  ;;  %v6618_v61 = vld [vmem:[%s10554_s5 + $0x478] sm:$0xf0]  ;;  %v6688_v48 = vld [vmem:[%s10554_s5 + $0x500] sm:$0xf] }
 0x467   : > { %v9871_v42 = vadd.f32 %v3069_v30, %v3046_v62  ;;  %4071 = vmatpush.bf16.msra.mxu2 %v6633_v54  ;;  %v6709_v62 = vor.u32 %v7340_v9, %v6706_v55  ;;  %v6621_v30 = vor.u32 %v7318_v50, %v6618_v61  ;;  %v7336_v59 = vld [vmem:[%s10554_s5 + $0x504] sm:$0xf] }
 0x468   : > { %3810 = vmatmul.bf16.vlgmr.msrb.gmra.mxu2 %v9248_v10  ;;  %3858 = vmatmul.bf16.vlgmr.msra.gmra.mxu0 %v9248_v10  ;;  %v6634_v10 = vld [vmem:[%s10554_s5 + $0x498] sm:$0xf0] }
 0x469   : > { %4093 = vmatpush.bf16.msra.mxu3 %v6713_v35  ;;  %v6637_v31 = vor.u32 %v7322_v5, %v6634_v10  ;;  %4142 = vmatpush.bf16.msrb.mxu1 %v6709_v62  ;;  %v6693_v10 = vor.u32 %v7336_v59, %v6690_v37  ;;  %v6672_v62 = vld [vmem:[%s10554_s5 + $0x4e0] sm:$0xf] }
 0x46b   : > { %v3000_v60 = vpop.f32.mrf.mxu2  ;;  %4119 = vmatpush.bf16.msrb.mxu0 %v6637_v31  ;;  %4072 = vmatpush.bf16.msra.mxu2 %v6625_v13  ;;  %v6609_v31 = vor.u32 %v7317_v18, %v6608_v23  ;;  %v7332_v13 = vld [vmem:[%s10554_s5 + $0x4e4] sm:$0xf] }
 0x46c   : > { %v3021_v39 = vpop.f32.mrf.mxu3  ;;  %v3001_v2 = vadd.f32 %v3000_v60, %v9758_v41  ;;  %v7320_v41 = vld [vmem:[%s10554_s5 + $0x484] sm:$0xf]  ;;  %v6610_v60 = vld [vmem:[%s10554_s5 + $0x468] sm:$0xf0] }
 0x46d   : > { %v9918_v52 = vadd.f32 %v3021_v39, %v2998_v15  ;;  %v3050_v29 = vpop.f32.mrf.mxu0  ;;  %4094 = vmatpush.bf16.msra.mxu3 %v6705_v44  ;;  %v6629_v43 = vor.u32 %v7320_v41, %v6626_v19  ;;  %v7319_v15 = vld [vmem:[%s10554_s5 + $0x474] sm:$0xf0] }
 0x46e   : > { %v3072_v21 = vpop.f32.mrf.mxu1  ;;  %v3051_v46 = vadd.f32 %v3050_v29, %v9766_v6  ;;  %v6698_v6 = vld [vmem:[%s10554_s5 + $0x518] sm:$0xf0]  ;;  %v6617_v32 = vor.u32 %v7319_v15, %v6616_v26  ;;  %v7335_v44 = vld [vmem:[%s10554_s5 + $0x4f4] sm:$0xf0] }
 0x46f   : > { %v9927_v25 = vadd.f32 %v3072_v21, %v3049_v36  ;;  %4120 = vmatpush.bf16.msrb.mxu0 %v6629_v43  ;;  %v6701_v49 = vor.u32 %v7338_v28, %v6698_v6 }
 0x470   : > { %4073 = vmatpush.bf16.msra.mxu2 %v6617_v32 }
 0x471   : > { %6572 = vmatmul.msk.bf16.vlgmr.msrb.gmra.mxu3 %vm1329_vm2, %v9293_v58  ;;  %6575 = vmatmul.msk.bf16.vlgmr.msra.gmra.mxu1 %vm1329_vm2, %v9293_v58  ;;  %v7337_v58 = vld [vmem:[%s10554_s5 + $0x504] sm:$0xf0] }
 0x472   : > { %4095 = vmatpush.bf16.msra.mxu3 %v6697_v51  ;;  %4143 = vmatpush.bf16.msrb.mxu1 %v6701_v49  ;;  %v6689_v57 = vor.u32 %v7337_v58, %v6688_v48 }
 0x473   : > { %v3002_v36 = vpop.f32.mrf.mxu2  ;;  %4121 = vmatpush.bf16.msrb.mxu0 %v6621_v30 }
 0x474   : > { %v3024_v40 = vpop.f32.mrf.mxu3  ;;  %v3003_v35 = vadd.f32 %v3002_v36, %v9794_v7  ;;  %v7316_v7 = vld [vmem:[%s10554_s5 + $0x464] sm:$0xf]  ;;  %4074 = vmatpush.bf16.msra.mxu2 %v6609_v31 }
 0x475   : > { %v9976_v54 = vadd.f32 %v3024_v40, %v3001_v2  ;;  %v3053_v5 = vpop.f32.mrf.mxu0  ;;  %v6613_v9 = vor.u32 %v7316_v7, %v6610_v60  ;;  %v6680_v2 = vld [vmem:[%s10554_s5 + $0x4f0] sm:$0xf] }
 0x476   : > { %v3074_v11 = vpop.f32.mrf.mxu1  ;;  %v3054_v63 = vadd.f32 %v3053_v5, %v9796_v38  ;;  %4096 = vmatpush.bf16.msra.mxu3 %v6689_v57  ;;  %4144 = vmatpush.bf16.msrb.mxu1 %v6693_v10  ;;  %v6681_v55 = vor.u32 %v7335_v44, %v6680_v2  ;;  %v7334_v38 = vld [vmem:[%s10554_s5 + $0x4f4] sm:$0xf] }
 0x477   : > { %v9985_v39 = vadd.f32 %v3074_v11, %v3051_v46  ;;  %v6685_v16 = vor.u32 %v7334_v38, %v6682_v0  ;;  %4122 = vmatpush.bf16.msrb.mxu0 %v6613_v9  ;;  %v6674_v46 = vld [vmem:[%s10554_s5 + $0x4e8] sm:$0xf0] }
 0x478   : > { %3815 = vmatmul.bf16.gmra.mxu2 %v9346_v33  ;;  %3863 = vmatmul.bf16.gmra.mxu0 %v9346_v33  ;;  %v7333_v33 = vld [vmem:[%s10554_s5 + $0x4e4] sm:$0xf0]  ;;  %v6677_v22 = vor.u32 %v7332_v13, %v6674_v46 }
 0x479   : > { %v6673_v21 = vor.u32 %v7333_v33, %v6672_v62 }
 0x47a   : > { %4097 = vmatpush.bf16.msra.mxu3 %v6681_v55  ;;  %4145 = vmatpush.bf16.msrb.mxu1 %v6685_v16 }
 0x47b   : > { %v3005_v29 = vpop.f32.mrf.mxu2 }
 0x47c   : > { %v3026_v41 = vpop.f32.mrf.mxu3  ;;  %v3006_v19 = vadd.f32 %v3005_v29, %v9802_v45 }
 0x47d   : > { %v10014_v43 = vadd.f32 %v3026_v41, %v3003_v35  ;;  %v3055_v53 = vpop.f32.mrf.mxu0 }
 0x47e   : > { %v3077_v28 = vpop.f32.mrf.mxu1  ;;  %v3056_v51 = vadd.f32 %v3055_v53, %v9805_v17  ;;  %4098 = vmatpush.bf16.msra.mxu3 %v6673_v21  ;;  %4146 = vmatpush.bf16.msrb.mxu1 %v6677_v22 }
 0x47f   : > { %v3078_v6 = vadd.f32 %v3077_v28, %v3054_v63 }
 0x481   : > { %6573 = vmatmul.msk.bf16.gmra.mxu3 %vm1329_vm2, %v9379_v20  ;;  %6576 = vmatmul.msk.bf16.gmra.mxu1 %vm1329_vm2, %v9379_v20 }
 0x483   : > { %v3007_v45 = vpop.f32.mrf.mxu2 }
 0x484   : > { %v3029_v26 = vpop.f32.mrf.mxu3  ;;  %v3008_v15 = vadd.f32 %v3007_v45, %v9834_v27 }
 0x485   : > { %v3030_v49 = vadd.f32 %v3029_v26, %v3006_v19  ;;  %v3317_v32 = vpop.f32.mrf.mxu0 }
 0x486   : > { %v3079_v50 = vpop.f32.mrf.mxu1 }
 0x487   : > { %v10022_v61 = vadd.f32 %v3079_v50, %v3056_v51 }
 0x488   : > { %3820 = vmatmul.bf16.gmra.mxu2 %v9388_v56  ;;  %3868 = vmatmul.bf16.gmra.mxu0 %v9388_v56 }
 0x48b   : > { %v3269_v17 = vpop.f32.mrf.mxu2 }
 0x48c   : > { %v3031_v30 = vpop.f32.mrf.mxu3 }
 0x48d   : > { %v10026_v36 = vadd.f32 %v3031_v30, %v3008_v15  ;;  %v10028_v48 = vpop.f32.mrf.mxu0 }
 0x48e   : > { %v3341_v20 = vpop.f32.mrf.mxu1 }
 0x48f   : > { %v3342_v58 = vadd.f32 %v3341_v20, %v3317_v32 }
 0x491   : > { %v10031_v59 = vadd.f32 %v3342_v58, %v9837_v12  ;;  %6574 = vmatmul.msk.bf16.gmra.mxu3 %vm1329_vm2, %v9419_v34  ;;  %6577 = vmatmul.msk.bf16.gmra.mxu1 %vm1329_vm2, %v9419_v34 }
 0x493   : > { %v10037_v27 = vpop.f32.mrf.mxu2 }
 0x494   : > { %v3293_v56 = vpop.f32.mrf.mxu3 }
 0x495   : > { %v3294_v40 = vadd.f32 %v3293_v56, %v3269_v17  ;;  %v3322_v35 = vpop.f32.mrf.mxu0 }
 0x496   : > { %v10039_v57 = vpop.f32.mrf.mxu1 }
 0x497   : > { %v10042_v37 = vadd.f32 %v3294_v40, %v9868_v8 }
 0x498   : > { %4075 = vmatmul.bf16.vlgmr.msra.gmra.mxu2 %v9458_v24  ;;  %4123 = vmatmul.bf16.vlgmr.msrb.gmra.mxu0 %v9458_v24 }
 0x49b   : > { %v3274_v12 = vpop.f32.mrf.mxu2 }
 0x49c   : > { %v10046_v23 = vpop.f32.mrf.mxu3 }
 0x49d   : > { %v10048_v18 = vpop.f32.mrf.mxu0 }
 0x49e   : > { %v3346_v34 = vpop.f32.mrf.mxu1 }
 0x49f   : > { %v3347_v5 = vadd.f32 %v3346_v34, %v3322_v35 }
 0x4a1   : > { %v10051_v10 = vadd.f32 %v3347_v5, %v9927_v25  ;;  %6718 = vmatmul.msk.bf16.vlgmr.msra.gmra.mxu3 %vm1329_vm2, %v9504_v47  ;;  %6721 = vmatmul.msk.bf16.vlgmr.msrb.gmra.mxu1 %vm1329_vm2, %v9504_v47 }
 0x4a3   : > { %v10057_v8 = vpop.f32.mrf.mxu2 }
 0x4a4   : > { %v3298_v31 = vpop.f32.mrf.mxu3 }
 0x4a5   : > { %v3299_v24 = vadd.f32 %v3298_v31, %v3274_v12  ;;  %v3327_v7 = vpop.f32.mrf.mxu0 }
 0x4a6   : > { %v10059_v60 = vpop.f32.mrf.mxu1 }
 0x4a7   : > { %v10062_v11 = vadd.f32 %v3299_v24, %v9976_v54 }
 0x4a8   : > { %4080 = vmatmul.bf16.gmra.mxu2 %v9544_v1  ;;  %4128 = vmatmul.bf16.gmra.mxu0 %v9544_v1 }
 0x4ab   : > { %v3279_v25 = vpop.f32.mrf.mxu2 }
 0x4ac   : > { %v10066_v63 = vpop.f32.mrf.mxu3 }
 0x4ad   : > { %v10068_v9 = vpop.f32.mrf.mxu0 }
 0x4ae   : > { %v3351_v47 = vpop.f32.mrf.mxu1 }
 0x4af   : > { %v3352_v2 = vadd.f32 %v3351_v47, %v3327_v7 }
 0x4b1   : > { %v10070_v44 = vadd.f32 %v3352_v2, %v3078_v6  ;;  %6719 = vmatmul.msk.bf16.gmra.mxu3 %vm1329_vm2, %v9588_v14  ;;  %6722 = vmatmul.msk.bf16.gmra.mxu1 %vm1329_vm2, %v9588_v14 }
 0x4b3   : > { %v10076_v54 = vpop.f32.mrf.mxu2 }
 0x4b4   : > { %v3303_v55 = vpop.f32.mrf.mxu3 }
 0x4b5   : > { %v3304_v38 = vadd.f32 %v3303_v55, %v3279_v25  ;;  %v3623_v1 = vpop.f32.mrf.mxu0 }
 0x4b6   : > { %v10078_v0 = vpop.f32.mrf.mxu1 }
 0x4b7   : > { %v10080_v16 = vadd.f32 %v3304_v38, %v3030_v49 }
 0x4b8   : > { %4085 = vmatmul.bf16.gmra.mxu2 %v9594_v4  ;;  %4133 = vmatmul.bf16.gmra.mxu0 %v9594_v4 }
 0x4bb   : > { %v3575_v29 = vpop.f32.mrf.mxu2 }
 0x4bc   : > { %v10084_v62 = vpop.f32.mrf.mxu3 }
 0x4bd   : > { %v3625_v33 = vpop.f32.mrf.mxu0 }
 0x4be   : > { %v3647_v13 = vpop.f32.mrf.mxu1 }
 0x4bf   : > { %v3648_v41 = vadd.f32 %v3647_v13, %v3623_v1 }
 0x4c1   : > { %6720 = vmatmul.msk.bf16.gmra.mxu3 %vm1329_vm2, %v9622_v3  ;;  %6723 = vmatmul.msk.bf16.gmra.mxu1 %vm1329_vm2, %v9622_v3 }
 0x4c3   : > { %v3577_v14 = vpop.f32.mrf.mxu2 }
 0x4c4   : > { %v3599_v19 = vpop.f32.mrf.mxu3 }
 0x4c5   : > { %v3600_v21 = vadd.f32 %v3599_v19, %v3575_v29  ;;  %v3628_v46 = vpop.f32.mrf.mxu0 }
 0x4c6   : > { %v3649_v53 = vpop.f32.mrf.mxu1 }
 0x4c7   : > { %v3650_v55 = vadd.f32 %v3649_v53, %v3625_v33 }
 0x4cb   : > { %v3580_v22 = vpop.f32.mrf.mxu2 }
 0x4cc   : > { %v3601_v28 = vpop.f32.mrf.mxu3 }
 0x4cd   : > { %v3630_v4 = vpop.f32.mrf.mxu0 }
 0x4ce   : > { %v3652_v51 = vpop.f32.mrf.mxu1 }
 0x4cf   : > { %v3653_v6 = vadd.f32 %v3652_v51, %v3628_v46 }
 0x4d3   : > { %v3582_v45 = vpop.f32.mrf.mxu2 }
 0x4d4   : > { %v3604_v26 = vpop.f32.mrf.mxu3 }
 0x4d5   : > { %v3605_v15 = vadd.f32 %v3604_v26, %v3580_v22  ;;  %v3633_v49 = vpop.f32.mrf.mxu0  ;;  %v3602_v26 = vadd.f32 %v3601_v28, %v3577_v14 }
 0x4d6   : > { %v3654_v32 = vpop.f32.mrf.mxu1 }
 0x4d7   : > { %v3655_v33 = vadd.f32 %v3654_v32, %v3630_v4 }
 0x4db   : > { %v3585_v50 = vpop.f32.mrf.mxu2 }
 0x4dc   : > { %v3606_v17 = vpop.f32.mrf.mxu3 }
 0x4dd   : > { %v3635_v30 = vpop.f32.mrf.mxu0  ;;  %v3607_v28 = vadd.f32 %v3606_v17, %v3582_v45  ;;  %v2534_v45 = vld [vmem:[%s10555_s6] sm:$0x3] }
 0x4de   : > { %v3657_v20 = vpop.f32.mrf.mxu1 }
 0x4df   : > { %v10090_v3 = vadd.f32 %v3657_v20, %v3633_v49 }
 0x4e3   : > { %v10092_v58 = vpop.f32.mrf.mxu2 }
 0x4e4   : > { %v3609_v56 = vpop.f32.mrf.mxu3 }
 0x4e5   : > { %v10094_v40 = vadd.f32 %v3609_v56, %v3585_v50  ;;  %v3859_v35 = vpop.f32.mrf.mxu0 }
 0x4e6   : > { %v3659_v12 = vpop.f32.mrf.mxu1  ;;  %v3860_v34 = vadd.f32 %v3859_v35, %v3648_v41 }
 0x4e7   : > { %v10096_v5 = vadd.f32 %v3659_v12, %v3635_v30 }
 0x4eb   : > { %v3811_v31 = vpop.f32.mrf.mxu2 }
 0x4ec   : > { %v10098_v24 = vpop.f32.mrf.mxu3  ;;  %v3812_v7 = vadd.f32 %v3811_v31, %v3600_v21 }
 0x4ed   : > { %v3861_v25 = vpop.f32.mrf.mxu0 }
 0x4ee   : > { %v3883_v47 = vpop.f32.mrf.mxu1  ;;  %v3862_v13 = vadd.f32 %v3861_v25, %v3650_v55 }
 0x4ef   : > { %v3884_v2 = vadd.f32 %v3883_v47, %v3860_v34 }
 0x4f3   : > { %v3813_v38 = vpop.f32.mrf.mxu2 }
 0x4f4   : > { %v3835_v1 = vpop.f32.mrf.mxu3  ;;  %v3814_v41 = vadd.f32 %v3813_v38, %v3602_v26 }
 0x4f5   : > { %v3836_v29 = vadd.f32 %v3835_v1, %v3812_v7  ;;  %v3864_v19 = vpop.f32.mrf.mxu0 }
 0x4f6   : > { %v3885_v46 = vpop.f32.mrf.mxu1  ;;  %v3865_v22 = vadd.f32 %v3864_v19, %v3653_v6 }
 0x4f7   : > { %v3886_v51 = vadd.f32 %v3885_v46, %v3862_v13 }
 0x4fb   : > { %v3816_v49 = vpop.f32.mrf.mxu2 }
 0x4fc   : > { %v3837_v50 = vpop.f32.mrf.mxu3  ;;  %v3817_v30 = vadd.f32 %v3816_v49, %v3605_v15 }
 0x4fd   : > { %v10100_v20 = vadd.f32 %v3837_v50, %v3814_v41  ;;  %v3866_v21 = vpop.f32.mrf.mxu0 }
 0x4fe   : > { %v3888_v56 = vpop.f32.mrf.mxu1  ;;  %v3867_v31 = vadd.f32 %v3866_v21, %v3655_v33 }
 0x4ff   : > { %v10102_v35 = vadd.f32 %v3888_v56, %v3865_v22  ;;  %v10129_v22 = vperm.slane %v2534_v45, 1  ;;  %v10135_v56 = vperm.slane %v2534_v45, 0 }
 0x501   : > { %v4181_v50 = vadd.f32 %v10129_v22, %v10031_v59  ;;  %v3296_v59 = vadd.f32 %v10046_v23, %v10037_v27 }
 0x503   : > { %v3818_v53 = vpop.f32.mrf.mxu2 }
 0x504   : > { %v3840_v12 = vpop.f32.mrf.mxu3  ;;  %v3819_v25 = vadd.f32 %v3818_v53, %v3607_v28 }
 0x505   : > { %v10104_v34 = vadd.f32 %v3840_v12, %v3817_v30  ;;  %v10106_v7 = vpop.f32.mrf.mxu0  ;;  %v3344_v30 = vadd.f32 %v10039_v57, %v10028_v48 }
 0x506   : > { %v3890_v6 = vpop.f32.mrf.mxu1 }
 0x507   : > { %v10108_v14 = vadd.f32 %v3890_v6, %v3867_v31  ;;  %v4193_v31 = vmax.f32 %v4181_v50, 0.0  ;;  %v3359_v6 = vadd.f32 %v3344_v30, %v9871_v42  ;;  %v3358_v42 = vadd.f32 %v3296_v59, %v9918_v52 }
 0x508   : > { %v4185_v52 = vadd.f32 %v10129_v22, %v10051_v10  ;;  %v4184_v10 = vadd.f32 %v10135_v56, %v10062_v11 }
 0x50a   : > { %v4196_v11 = vmax.f32 %v4184_v10, 0.0 }
 0x50b   : > { %v10110_v15 = vpop.f32.mrf.mxu2 }
 0x50c   : > { %v3842_v47 = vpop.f32.mrf.mxu3 }
 0x50d   : > { %v10112_v55 = vadd.f32 %v3842_v47, %v3819_v25  ;;  %v10114_v38 = vpop.f32.mrf.mxu0  ;;  %v4180_v47 = vadd.f32 %v10135_v56, %v10042_v37 }
 0x50e   : > { %v10116_v4 = vpop.f32.mrf.mxu1 }
 0x513   : > { %v10118_v32 = vpop.f32.mrf.mxu2 }
 0x514   : > { %v10120_v1 = vpop.f32.mrf.mxu3 }
 0x515   : > { %v4124_v13 = vpop.f32.mrf.mxu0 }
 0x516   : > { %v10122_v19 = vpop.f32.mrf.mxu1 }
 0x51b   : > { %v4076_v17 = vpop.f32.mrf.mxu2 }
 0x51c   : > { %v10127_v46 = vpop.f32.mrf.mxu3 }
 0x51d   : > { %10568 = vst [vmem:[#allocation4_spill] sm:$0xff] %v10127_v46  ;;  %v4126_v41 = vpop.f32.mrf.mxu0 }
 0x51e   : > { %v4148_v26 = vpop.f32.mrf.mxu1 }
 0x51f   : > { %v4149_v49 = vadd.f32 %v4148_v26, %v4124_v13  ;;  %v4183_v26 = vadd.f32 %v10129_v22, %v3359_v6 }
 0x521   : > { %v4164_v21 = vadd.f32 %v4149_v49, %v3884_v2 }
 0x523   : > { %v4205_v33 = vadd.f32 %v10129_v22, %v4164_v21  ;;  %v4078_v12 = vpop.f32.mrf.mxu2  ;;  %v4192_v21 = vmax.f32 %v4180_v47, 0.0 }
 0x524   : > { %v4100_v53 = vpop.f32.mrf.mxu3 }
 0x525   : > { %v4217_v28 = vmax.f32 %v4205_v33, 0.0  ;;  %v4101_v25 = vadd.f32 %v4100_v53, %v4076_v17  ;;  %v4129_v45 = vpop.f32.mrf.mxu0  ;;  %v4195_v33 = vmax.f32 %v4183_v26, 0.0 }
 0x526   : > { %v4150_v13 = vpop.f32.mrf.mxu1 }
 0x527   : > { %v4163_v48 = vadd.f32 %v4101_v25, %v3836_v29  ;;  %v4151_v57 = vadd.f32 %v4150_v13, %v4126_v41  ;;  %v4229_v2 = vmax.f32 %v4193_v31, %v4217_v28  ;;  %v4182_v41 = vadd.f32 %v10135_v56, %v3358_v42 }
 0x529   : > { %v4204_v49 = vadd.f32 %v10135_v56, %v4163_v48  ;;  %v4166_v50 = vadd.f32 %v4151_v57, %v3886_v51  ;;  %v3349_v51 = vadd.f32 %v10059_v60, %v10048_v18  ;;  %v4194_v59 = vmax.f32 %v4182_v41, 0.0 }
 0x52b   : > { %v4216_v17 = vmax.f32 %v4204_v49, 0.0  ;;  %v4207_v30 = vadd.f32 %v10129_v22, %v4166_v50  ;;  %v4081_v29 = vpop.f32.mrf.mxu2 }
 0x52c   : > { %v4102_v37 = vpop.f32.mrf.mxu3 }
 0x52d   : > { %v4219_v53 = vmax.f32 %v4207_v30, 0.0  ;;  %v4103_v46 = vadd.f32 %v4102_v37, %v4078_v12  ;;  %v4228_v27 = vmax.f32 %v4192_v21, %v4216_v17  ;;  %v4131_v13 = vpop.f32.mrf.mxu0 }
 0x52e   : > { %v4153_v23 = vpop.f32.mrf.mxu1 }
 0x52f   : > { %v4165_v31 = vadd.f32 %v4103_v46, %v10100_v20  ;;  %v4154_v6 = vadd.f32 %v4153_v23, %v4129_v45  ;;  %v4231_v28 = vmax.f32 %v4195_v33, %v4219_v53  ;;  %v3363_v20 = vadd.f32 %v3349_v51, %v9985_v39 }
 0x530   : > { %v4197_v45 = vmax.f32 %v4185_v52, 0.0 }
 0x531   : > { %v4206_v25 = vadd.f32 %v10135_v56, %v4165_v31  ;;  %v4168_v47 = vadd.f32 %v4154_v6, %v10102_v35  ;;  %v10155_v12 = vpack.c.bf16 %v4231_v28, %v4229_v2  ;;  %v3301_v35 = vadd.f32 %v10066_v63, %v10057_v8 }
 0x532   : > { %v4187_v39 = vadd.f32 %v10129_v22, %v3363_v20 }
 0x533   : > { %v4218_v48 = vmax.f32 %v4206_v25, 0.0  ;;  %v4209_v57 = vadd.f32 %v10129_v22, %v4168_v47  ;;  %v4083_v17 = vpop.f32.mrf.mxu2  ;;  %v3362_v33 = vadd.f32 %v3301_v35, %v10014_v43  ;;  %v4189_v25 = vadd.f32 %v10129_v22, %v10070_v44 }
 0x534   : > { %v4105_v46 = vpop.f32.mrf.mxu3  ;;  %v4199_v63 = vmax.f32 %v4187_v39, 0.0  ;;  %v3354_v47 = vadd.f32 %v10078_v0, %v10068_v9  ;;  %v3872_v44 = vadd.f32 %v10114_v38, %v10096_v5 }
 0x535   : > { %v4221_v26 = vmax.f32 %v4209_v57, 0.0  ;;  %v4106_v18 = vadd.f32 %v4105_v46, %v4081_v29  ;;  %v4230_v60 = vmax.f32 %v4194_v59, %v4218_v48  ;;  %v4186_v6 = vadd.f32 %v10135_v56, %v3362_v33  ;;  %v10569_v33 = vld [vmem:[#allocation4_spill] sm:$0xff] }
 0x536   : > { %v4155_v2 = vpop.f32.mrf.mxu1  ;;  %v3822_v57 = vadd.f32 %v10110_v15, %v10094_v40  ;;  %v4201_v20 = vmax.f32 %v4189_v25, 0.0  ;;  %v3367_v46 = vadd.f32 %v3354_v47, %v10022_v61  ;;  %v3306_v40 = vadd.f32 %v10084_v62, %v10076_v54  ;;  %v7352_v25 = vld [vmem:[%s10557_s8 + $0x10] sm:$0xff]  ;;  %v7351_v47 = vld [vmem:[%s10557_s8 + $0x8] sm:$0xff] }
 0x537   : > { %v4167_v49 = vadd.f32 %v4106_v18, %v10104_v34  ;;  %v4156_v50 = vadd.f32 %v4155_v2, %v4131_v13  ;;  %v4233_v21 = vmax.f32 %v4197_v45, %v4221_v26  ;;  %v10164_v42 = vpack.c.bf16 %v4230_v60, %v4228_v27  ;;  %v4134_v34 = vpop.f32.mrf.mxu0 }
 0x538   : > { %v3870_v27 = vadd.f32 %v10106_v7, %v10090_v3  ;;  %v4198_v48 = vmax.f32 %v4186_v6, 0.0  ;;  %v3846_v9 = vadd.f32 %v10120_v1, %v3822_v57  ;;  %v4188_v60 = vadd.f32 %v10135_v56, %v10080_v16  ;;  %v7349_v6 = vld [vmem:[%s10556_s7 + $0x28] sm:$0xff] }
 0x539   : > { %v4208_v30 = vadd.f32 %v10135_v56, %v4167_v49  ;;  %v4170_v37 = vadd.f32 %v4156_v50, %v10108_v14  ;;  %v3896_v15 = vadd.f32 %v10122_v19, %v3872_v44  ;;  %v4191_v38 = vadd.f32 %v10129_v22, %v3367_v46 }
 0x53a   : > { %v3894_v14 = vadd.f32 %v10116_v4, %v3870_v27  ;;  %v3612_v1 = vadd.f32 %v10098_v24, %v10092_v58  ;;  %v4200_v16 = vmax.f32 %v4188_v60, 0.0  ;;  %v3366_v39 = vadd.f32 %v3306_v40, %v10026_v36  ;;  %v7365_v40 = vld [vmem:[%s10557_s8 + $0x78] sm:$0xff] }
 0x53b   : > { %v4220_v53 = vmax.f32 %v4208_v30, 0.0  ;;  %v4211_v8 = vadd.f32 %v10129_v22, %v4170_v37  ;;  %v4086_v59 = vpop.f32.mrf.mxu2 }
 0x53c   : > { %v4107_v23 = vpop.f32.mrf.mxu3  ;;  %v3824_v54 = vadd.f32 %v10118_v32, %v3612_v1  ;;  %v4190_v58 = vadd.f32 %v10135_v56, %v3366_v39  ;;  %v7363_v1 = vld [vmem:[%s10557_s8 + $0x68] sm:$0xff] }
 0x53d   : > { %v4223_v29 = vmax.f32 %v4211_v8, 0.0  ;;  %v4108_v41 = vadd.f32 %v4107_v23, %v4083_v17  ;;  %v4232_v31 = vmax.f32 %v4196_v11, %v4220_v53  ;;  %v4203_v17 = vmax.f32 %v4191_v38, 0.0 }
 0x53e   : > { %v4158_v28 = vpop.f32.mrf.mxu1  ;;  %v3848_v11 = vadd.f32 %v10569_v33, %v3824_v54  ;;  %v4202_v27 = vmax.f32 %v4190_v58, 0.0  ;;  %v7362_v54 = vld [vmem:[%s10557_s8 + $0x60] sm:$0xff]  ;;  %v7360_v58 = vld [vmem:[%s10557_s8 + $0x50] sm:$0xff] }
 0x53f   : > { %v4169_v43 = vadd.f32 %v4108_v41, %v10112_v55  ;;  %v4159_v51 = vadd.f32 %v4158_v28, %v4134_v34  ;;  %v4235_v52 = vmax.f32 %v4199_v63, %v4223_v29  ;;  %v4136_v10 = vpop.f32.mrf.mxu0  ;;  %v7344_v41 = vld [vmem:[%s10556_s7] sm:$0xff]  ;;  %v7357_v28 = vld [vmem:[%s10557_s8 + $0x38] sm:$0xff] }
 0x541   : > { %v4210_v3 = vadd.f32 %v10135_v56, %v4169_v43  ;;  %v4172_v7 = vadd.f32 %v4159_v51, %v3894_v14  ;;  %v4243_v13 = vpack.c.bf16 %v4235_v52, %v4233_v21  ;;  %v7356_v14 = vld [vmem:[%s10557_s8 + $0x30] sm:$0xff]  ;;  %v7355_v43 = vld [vmem:[%s10557_s8 + $0x28] sm:$0xff]  ;;  %v7354_v51 = vld [vmem:[%s10557_s8 + $0x20] sm:$0xff] }
 0x542   : > { %v7353_v52 = vld [vmem:[%s10557_s8 + $0x18] sm:$0xff] }
 0x543   : > { %v4222_v4 = vmax.f32 %v4210_v3, 0.0  ;;  %v4213_v55 = vadd.f32 %v10129_v22, %v4172_v7  ;;  %v4088_v30 = vpop.f32.mrf.mxu2  ;;  %v7350_v3 = vld [vmem:[%s10557_s8] sm:$0xff] }
 0x544   : > { %v4110_v45 = vpop.f32.mrf.mxu3 }
 0x545   : > { %v4225_v0 = vmax.f32 %v4213_v55, 0.0  ;;  %v4111_v26 = vadd.f32 %v4110_v45, %v4086_v59  ;;  %v4234_v18 = vmax.f32 %v4198_v48, %v4222_v4 }
 0x546   : > { %v4160_v35 = vpop.f32.mrf.mxu1 }
 0x547   : > { %v4237_v61 = vmax.f32 %v4201_v20, %v4225_v0  ;;  %v4171_v2 = vadd.f32 %v4111_v26, %v3846_v9  ;;  %v4161_v49 = vadd.f32 %v4160_v35, %v4136_v10  ;;  %v4242_v5 = vpack.c.bf16 %v4234_v18, %v4232_v31  ;;  %v7348_v31 = vld [vmem:[%s10556_s7 + $0x20] sm:$0xff]  ;;  %v7373_v10 = vld [vmem:[%s10557_s8 + $0xb8] sm:$0xff] }
 0x549   : > { %v4212_v50 = vadd.f32 %v10135_v56, %v4171_v2  ;;  %v4174_v21 = vadd.f32 %v4161_v49, %v3896_v15  ;;  %v7372_v49 = vld [vmem:[%s10557_s8 + $0xb0] sm:$0xff] }
 0x54b   : > { %v4224_v62 = vmax.f32 %v4212_v50, 0.0  ;;  %v4215_v19 = vadd.f32 %v10129_v22, %v4174_v21  ;;  %v7371_v21 = vld [vmem:[%s10557_s8 + $0xa8] sm:$0xff] }
 0x54c   : > { %v4112_v37 = vpop.f32.mrf.mxu3 }
 0x54d   : > { %v4236_v53 = vmax.f32 %v4200_v16, %v4224_v62  ;;  %v4227_v8 = vmax.f32 %v4215_v19, 0.0  ;;  %v4113_v63 = vadd.f32 %v4112_v37, %v4088_v30  ;;  %v7389_v16 = vld [vmem:[%s10557_s8 + $0x138] sm:$0xff]  ;;  %v7370_v19 = vld [vmem:[%s10557_s8 + $0xa0] sm:$0xff] }
 0x54f   : > { %v4239_v24 = vmax.f32 %v4203_v17, %v4227_v8  ;;  %v4173_v23 = vadd.f32 %v4113_v63, %v3848_v11  ;;  %v7388_v17 = vld [vmem:[%s10557_s8 + $0x130] sm:$0xff]  ;;  %v7361_v11 = vld [vmem:[%s10557_s8 + $0x58] sm:$0xff]  ;;  %v7387_v8 = vld [vmem:[%s10557_s8 + $0x128] sm:$0xff] }
 0x551   : > { %v4214_v34 = vadd.f32 %v10135_v56, %v4173_v23  ;;  %v4245_v36 = vpack.c.bf16 %v4239_v24, %v4237_v61  ;;  %v7347_v56 = vld [vmem:[%s10556_s7 + $0x18] sm:$0xff]  ;;  %v7364_v61 = vld [vmem:[%s10557_s8 + $0x70] sm:$0xff] }
 0x553   : > { %v4226_v32 = vmax.f32 %v4214_v34, 0.0  ;;  %4306 = vmatpush.bf16.msrb.mxu3 %v4245_v36  ;;  %4385 = vmatpush.bf16.msra.mxu1 %v4245_v36  ;;  %v7368_v34 = vld [vmem:[%s10557_s8 + $0x90] sm:$0xff]  ;;  %v7386_v36 = vld [vmem:[%s10557_s8 + $0x120] sm:$0xff] }
 0x555   : > { %v4238_v22 = vmax.f32 %v4202_v27, %v4226_v32 }
 0x557   : > { %4307 = vmatpush.bf16.msrb.mxu3 %v4243_v13  ;;  %4386 = vmatpush.bf16.msra.mxu1 %v4243_v13  ;;  %v4244_v29 = vpack.c.bf16 %v4238_v22, %v4236_v53  ;;  %v7369_v53 = vld [vmem:[%s10557_s8 + $0x98] sm:$0xff] }
 0x559   : > { %4282 = vmatpush.bf16.msrb.mxu2 %v4244_v29  ;;  %4361 = vmatpush.bf16.msra.mxu0 %v4244_v29  ;;  %v7359_v29 = vld [vmem:[%s10557_s8 + $0x48] sm:$0xff] }
 0x55b   : > { %4308 = vmatpush.bf16.msrb.mxu3 %v10155_v12  ;;  %4387 = vmatpush.bf16.msra.mxu1 %v10155_v12  ;;  %v7345_v12 = vld [vmem:[%s10556_s7 + $0x8] sm:$0xff] }
 0x55d   : > { %4283 = vmatpush.bf16.msrb.mxu2 %v4242_v5  ;;  %4362 = vmatpush.bf16.msra.mxu0 %v4242_v5 }
 0x55e   : > { %6739 = vmatmul.msk.bf16.vlgmr.msrb.gmra.mxu3 %vm4267_vm6, %v7344_v41  ;;  %6763 = vmatmul.msk.bf16.vlgmr.msra.gmra.mxu1 %vm4267_vm6, %v7347_v56 }
 0x55f   : > { %5049 = vmatpush.bf16.msra.mxu3 %v7365_v40  ;;  %v7402_v40 = vld [vmem:[%s10557_s8 + $0x1a0] sm:$0xff] }
 0x561   : > { %4284 = vmatpush.bf16.msrb.mxu2 %v10164_v42  ;;  %4363 = vmatpush.bf16.msra.mxu0 %v10164_v42  ;;  %v7346_v42 = vld [vmem:[%s10556_s7 + $0x10] sm:$0xff] }
 0x563   : > { %5050 = vmatpush.bf16.msra.mxu3 %v7364_v61  ;;  %v7420_v61 = vld [vmem:[%s10557_s8 + $0x230] sm:$0xff] }
 0x564   : > { %6736 = vmatmul.msk.bf16.vlgmr.msrb.gmra.mxu2 %vm4267_vm6, %v7344_v41  ;;  %6760 = vmatmul.msk.bf16.vlgmr.msra.gmra.mxu0 %vm4267_vm6, %v7347_v56  ;;  %v7367_v41 = vld [vmem:[%s10557_s8 + $0x88] sm:$0xff]  ;;  %v7358_v56 = vld [vmem:[%s10557_s8 + $0x40] sm:$0xff] }
 0x565   : > { %5036 = vmatpush.bf16.msra.mxu2 %v7357_v28  ;;  %5088 = vmatpush.bf16.msrb.mxu0 %v7389_v16  ;;  %v7398_v16 = vld [vmem:[%s10557_s8 + $0x180] sm:$0xff] }
 0x567   : > { %5051 = vmatpush.bf16.msra.mxu3 %v7363_v1  ;;  %v7394_v1 = vld [vmem:[%s10557_s8 + $0x160] sm:$0xff] }
 0x569   : > { %5037 = vmatpush.bf16.msra.mxu2 %v7356_v14  ;;  %5089 = vmatpush.bf16.msrb.mxu0 %v7388_v17  ;;  %v7416_v17 = vld [vmem:[%s10557_s8 + $0x210] sm:$0xff] }
 0x56b   : > { %5052 = vmatpush.bf16.msra.mxu3 %v7362_v54  ;;  %v7418_v54 = vld [vmem:[%s10557_s8 + $0x220] sm:$0xff] }
 0x56d   : > { %5038 = vmatpush.bf16.msra.mxu2 %v7355_v43  ;;  %5090 = vmatpush.bf16.msrb.mxu0 %v7387_v8  ;;  %v7405_v43 = vld [vmem:[%s10557_s8 + $0x1b8] sm:$0xff] }
 0x56e   : > { %6740 = vmatmul.msk.bf16.gmra.mxu3 %vm4267_vm6, %v7345_v12  ;;  %6764 = vmatmul.msk.bf16.gmra.mxu1 %vm4267_vm6, %v7348_v31 }
 0x56f   : > { %5053 = vmatpush.bf16.msra.mxu3 %v7361_v11  ;;  %v7415_v11 = vld [vmem:[%s10557_s8 + $0x208] sm:$0xff] }
 0x571   : > { %5039 = vmatpush.bf16.msra.mxu2 %v7354_v51  ;;  %5091 = vmatpush.bf16.msrb.mxu0 %v7386_v36 }
 0x573   : > { %5054 = vmatpush.bf16.msra.mxu3 %v7360_v58 }
 0x574   : > { %6737 = vmatmul.msk.bf16.gmra.mxu2 %vm4267_vm6, %v7345_v12  ;;  %6761 = vmatmul.msk.bf16.gmra.mxu0 %vm4267_vm6, %v7348_v31 }
 0x575   : > { %5040 = vmatpush.bf16.msra.mxu2 %v7353_v52  ;;  %v7380_v52 = vld [vmem:[%s10557_s8 + $0xf0] sm:$0xff] }
 0x577   : > { %5055 = vmatpush.bf16.msra.mxu3 %v7359_v29 }
 0x579   : > { %5041 = vmatpush.bf16.msra.mxu2 %v7352_v25  ;;  %v7379_v25 = vld [vmem:[%s10557_s8 + $0xe8] sm:$0xff] }
 0x57b   : > { %5056 = vmatpush.bf16.msra.mxu3 %v7358_v56  ;;  %v7409_v56 = vld [vmem:[%s10557_s8 + $0x1d8] sm:$0xff] }
 0x57d   : > { %5042 = vmatpush.bf16.msra.mxu2 %v7351_v47  ;;  %v7378_v47 = vld [vmem:[%s10557_s8 + $0xe0] sm:$0xff] }
 0x57e   : > { %6741 = vmatmul.msk.bf16.gmra.mxu3 %vm4267_vm6, %v7346_v42  ;;  %6765 = vmatmul.msk.bf16.gmra.mxu1 %vm4267_vm6, %v7349_v6 }
 0x581   : > { %5043 = vmatpush.bf16.msra.mxu2 %v7350_v3  ;;  %v7377_v3 = vld [vmem:[%s10557_s8 + $0xd8] sm:$0xff] }
 0x584   : > { %6738 = vmatmul.msk.bf16.gmra.mxu2 %vm4267_vm6, %v7346_v42  ;;  %6762 = vmatmul.msk.bf16.gmra.mxu0 %vm4267_vm6, %v7349_v6  ;;  %v7381_v42 = vld [vmem:[%s10557_s8 + $0xf8] sm:$0xff]  ;;  %v7366_v6 = vld [vmem:[%s10557_s8 + $0x80] sm:$0xff] }
 0x585   : > { %5062 = vmatpush.bf16.msrb.mxu2 %v7373_v10  ;;  %5075 = vmatpush.bf16.msrb.mxu3 %v7381_v42  ;;  %v7396_v10 = vld [vmem:[%s10557_s8 + $0x170] sm:$0xff] }
 0x589   : > { %5063 = vmatpush.bf16.msrb.mxu2 %v7372_v49  ;;  %5076 = vmatpush.bf16.msrb.mxu3 %v7380_v52  ;;  %v7400_v49 = vld [vmem:[%s10557_s8 + $0x190] sm:$0xff] }
 0x58d   : > { %5064 = vmatpush.bf16.msrb.mxu2 %v7371_v21  ;;  %5077 = vmatpush.bf16.msrb.mxu3 %v7379_v25  ;;  %v7393_v21 = vld [vmem:[%s10557_s8 + $0x158] sm:$0xff] }
 0x591   : > { %5065 = vmatpush.bf16.msrb.mxu2 %v7370_v19  ;;  %5078 = vmatpush.bf16.msrb.mxu3 %v7378_v47  ;;  %v7392_v19 = vld [vmem:[%s10557_s8 + $0x150] sm:$0xff] }
 0x595   : > { %5066 = vmatpush.bf16.msrb.mxu2 %v7369_v53  ;;  %5079 = vmatpush.bf16.msrb.mxu3 %v7377_v3 }
 0x599   : > { %5067 = vmatpush.bf16.msrb.mxu2 %v7368_v34  ;;  %v7411_v34 = vld [vmem:[%s10557_s8 + $0x1e8] sm:$0xff] }
 0x59d   : > { %5068 = vmatpush.bf16.msrb.mxu2 %v7367_v41 }
 0x5a1   : > { %5069 = vmatpush.bf16.msrb.mxu2 %v7366_v6  ;;  %v7408_v6 = vld [vmem:[%s10557_s8 + $0x1d0] sm:$0xff] }
 0x5db   : > { %v10261_v7 = vpop.f32.mrf.mxu1 }
 0x5e1   : > { %v4365_v13 = vpop.f32.mrf.mxu0  ;;  %v10263_v59 = vpop.f32.mrf.mxu3 }
 0x5e2   : > { %v4405_v48 = vmax.f32 %v10263_v59, %v10261_v7  ;;  %v7412_v7 = vld [vmem:[%s10557_s8 + $0x1f0] sm:$0xff] }
 0x5e3   : > { %v4391_v57 = vpop.f32.mrf.mxu1 }
 0x5e7   : > { %v4286_v4 = vpop.f32.mrf.mxu2 }
 0x5e8   : > { %v4404_v55 = vmax.f32 %v4286_v4, %v4365_v13  ;;  %v7376_v13 = vld [vmem:[%s10557_s8 + $0xd0] sm:$0xff] }
 0x5e9   : > { %v4367_v20 = vpop.f32.mrf.mxu0  ;;  %v4312_v46 = vpop.f32.mrf.mxu3  ;;  %5080 = vmatpush.bf16.msrb.mxu3 %v7376_v13  ;;  %v7384_v4 = vld [vmem:[%s10557_s8 + $0x110] sm:$0xff]  ;;  %v7429_v13 = vld [vmem:[%s10559_s10 + $0x38] sm:$0xff] }
 0x5ea   : > { %v4447_v44 = vpack.c.bf16 %v4404_v55, %v4404_v55  ;;  %v4407_v35 = vmax.f32 %v4312_v46, %v4391_v57  ;;  %v7385_v57 = vld [vmem:[%s10557_s8 + $0x118] sm:$0xff]  ;;  %v7404_v55 = vld [vmem:[%s10557_s8 + $0x1b0] sm:$0xff]  ;;  %v7383_v46 = vld [vmem:[%s10557_s8 + $0x108] sm:$0xff] }
 0x5eb   : > { %v10267_v45 = vpop.f32.mrf.mxu1  ;;  %5092 = vmatpush.bf16.msrb.mxu0 %v7385_v57  ;;  %v7428_v57 = vld [vmem:[%s10559_s10 + $0x30] sm:$0xff] }
 0x5ec   : > { %5044 = vmatmul.bf16.vlgmr.msra.gmra.mxu2 %v4447_v44  ;;  %v7403_v44 = vld [vmem:[%s10557_s8 + $0x1a8] sm:$0xff] }
 0x5ed   : > { %5114 = vmatpush.bf16.msra.mxu2 %v7405_v43 }
 0x5ef   : > { %v4288_v9 = vpop.f32.mrf.mxu2  ;;  %5093 = vmatpush.bf16.msrb.mxu0 %v7384_v4 }
 0x5f0   : > { %v4406_v0 = vmax.f32 %v4288_v9, %v4367_v20  ;;  %v7375_v20 = vld [vmem:[%s10557_s8 + $0xc8] sm:$0xff]  ;;  %v7374_v9 = vld [vmem:[%s10557_s8 + $0xc0] sm:$0xff] }
 0x5f1   : > { %v4370_v26 = vpop.f32.mrf.mxu0  ;;  %v10269_v18 = vpop.f32.mrf.mxu3  ;;  %5115 = vmatpush.bf16.msra.mxu2 %v7404_v55  ;;  %5081 = vmatpush.bf16.msrb.mxu3 %v7375_v20  ;;  %v7424_v55 = vld [vmem:[%s10559_s10 + $0x10] sm:$0xff]  ;;  %v7423_v20 = vld [vmem:[%s10559_s10 + $0x8] sm:$0xff] }
 0x5f2   : > { %4418 = vrot.lane.b32.xlu0 %v4406_v0, %s7488_s21  ;;  %v4409_v60 = vmax.f32 %v10269_v18, %v10267_v45  ;;  %v7382_v0 = vld [vmem:[%s10557_s8 + $0x100] sm:$0xff]  ;;  %v7407_v45 = vld [vmem:[%s10557_s8 + $0x1c8] sm:$0xff] }
 0x5f3   : > { %v10277_v15 = vpop.f32.mrf.mxu1  ;;  %5094 = vmatpush.bf16.msrb.mxu0 %v7383_v46 }
 0x5f5   : > { %5116 = vmatpush.bf16.msra.mxu2 %v7403_v44  ;;  %5082 = vmatpush.bf16.msrb.mxu3 %v7374_v9  ;;  %v7422_v9 = vld [vmem:[%s10559_s10] sm:$0xff] }
 0x5f7   : > { %v4291_v2 = vpop.f32.mrf.mxu2  ;;  %5095 = vmatpush.bf16.msrb.mxu0 %v7382_v0 }
 0x5f8   : > { %v10288_v5 = vmax.f32 %v4291_v2, %v4370_v26  ;;  %v7397_v26 = vld [vmem:[%s10557_s8 + $0x178] sm:$0xff]  ;;  %v7395_v2 = vld [vmem:[%s10557_s8 + $0x168] sm:$0xff] }
 0x5f9   : > { %v4317_v38 = vpop.f32.mrf.mxu3  ;;  %v4372_v50 = vpop.f32.mrf.mxu0  ;;  %5101 = vmatpush.bf16.msrb.mxu1 %v7397_v26  ;;  %5117 = vmatpush.bf16.msra.mxu2 %v7402_v40  ;;  %v7462_v26 = vld [vmem:[%s10558_s9] ss:$0 sm:$0xff] }
 0x5fa   : > { %4420 = vrot.lane.b32.xlu0 %v4407_v35, %s7488_s21  ;;  %v4411_v14 = vmax.f32 %v4317_v38, %v10277_v15  ;;  %v7421_v15 = vld [vmem:[%s10557_s8 + $0x238] sm:$0xff]  ;;  %v7419_v38 = vld [vmem:[%s10557_s8 + $0x228] sm:$0xff] }
 0x5fb   : > { %v10300_v39 = vpop.f32.mrf.mxu1  ;;  %5140 = vmatpush.bf16.msra.mxu0 %v7421_v15  ;;  %v7401_v35 = vld [vmem:[%s10557_s8 + $0x198] sm:$0xff] }
 0x5fd   : > { %5102 = vmatpush.bf16.msrb.mxu1 %v7396_v10  ;;  %5118 = vmatpush.bf16.msra.mxu2 %v7401_v35 }
 0x5ff   : > { %v4293_v62 = vpop.f32.mrf.mxu2  ;;  %5141 = vmatpush.bf16.msra.mxu0 %v7420_v61 }
 0x600   : > { %v4410_v30 = vmax.f32 %v4293_v62, %v4372_v50  ;;  %v7399_v50 = vld [vmem:[%s10557_s8 + $0x188] sm:$0xff]  ;;  %v7417_v62 = vld [vmem:[%s10557_s8 + $0x218] sm:$0xff] }
 0x601   : > { %v10311_v37 = vpop.f32.mrf.mxu3  ;;  %v4375_v63 = vpop.f32.mrf.mxu0  ;;  %5103 = vmatpush.bf16.msrb.mxu1 %v7395_v2  ;;  %5119 = vmatpush.bf16.msra.mxu2 %v7400_v49 }
 0x602   : > { %4428 = vrot.lane.b32.xlu1 %v4410_v30, %s7488_s21  ;;  %v4413_v33 = vmax.f32 %v10311_v37, %v10300_v39  ;;  %v7391_v30 = vld [vmem:[%s10557_s8 + $0x148] sm:$0xff]  ;;  %v7426_v37 = vld [vmem:[%s10559_s10 + $0x20] sm:$0xff] }
 0x603   : > { %v4401_v23 = vpop.f32.mrf.mxu1  ;;  %5142 = vmatpush.bf16.msra.mxu0 %v7419_v38  ;;  %v7427_v39 = vld [vmem:[%s10559_s10 + $0x28] sm:$0xff] }
 0x605   : > { %5104 = vmatpush.bf16.msrb.mxu1 %v7394_v1  ;;  %5120 = vmatpush.bf16.msra.mxu2 %v7399_v50 }
 0x607   : > { %v4296_v24 = vpop.f32.mrf.mxu2  ;;  %5143 = vmatpush.bf16.msra.mxu0 %v7418_v54 }
 0x608   : > { %v10334_v27 = vmax.f32 %v4296_v24, %v4375_v63  ;;  %v7413_v63 = vld [vmem:[%s10557_s8 + $0x1f8] sm:$0xff]  ;;  %v7390_v24 = vld [vmem:[%s10557_s8 + $0x140] sm:$0xff] }
 0x609   : > { %v4322_v32 = vpop.f32.mrf.mxu3  ;;  %v4377_v31 = vpop.f32.mrf.mxu0  ;;  %5105 = vmatpush.bf16.msrb.mxu1 %v7393_v21  ;;  %5121 = vmatpush.bf16.msra.mxu2 %v7398_v16 }
 0x60a   : > { %v4415_v22 = vmax.f32 %v4322_v32, %v4401_v23  ;;  %v7414_v23 = vld [vmem:[%s10557_s8 + $0x200] sm:$0xff]  ;;  %v4453_v18 = vpack.c.bf16 %v10334_v27, %v10334_v27 }
 0x60b   : > { %5144 = vmatpush.bf16.msra.mxu0 %v7417_v62 }
 0x60c   : > { %4439 = vrot.lane.b32.xlu2 %v4415_v22, %s7488_s21  ;;  %v7410_v22 = vld [vmem:[%s10557_s8 + $0x1e0] sm:$0xff] }
 0x60d   : > { %5106 = vmatpush.bf16.msrb.mxu1 %v7392_v19 }
 0x60f   : > { %v4298_v12 = vpop.f32.mrf.mxu2  ;;  %5145 = vmatpush.bf16.msra.mxu0 %v7416_v17 }
 0x610   : > { %v4414_v28 = vmax.f32 %v4298_v12, %v4377_v31  ;;  %v4450_v12 = vpack.c.bf16 %v10288_v5, %v10288_v5 }
 0x611   : > { %5107 = vmatpush.bf16.msrb.mxu1 %v7391_v30 }
 0x612   : > { %v7457_v51 = vpack.i.bf16 %v4411_v14, %v4414_v28 }
 0x613   : > { %5146 = vmatpush.bf16.msra.mxu0 %v7415_v11 }
 0x614   : > { %7458 = vrot.lane.b32.xlu1 %v7457_v51, %s7488_s21 }
 0x615   : > { %5108 = vmatpush.bf16.msrb.mxu1 %v7390_v24 }
 0x617   : > { %5147 = vmatpush.bf16.msra.mxu0 %v7414_v23  ;;  %v7463_v23 = vld [vmem:[%s10560_s11] ss:$0 sm:$0xff] }
 0x619   : > { %5223 = vmatpush.bf16.msra.mxu1 %v7429_v13 }
 0x61d   : > { %5224 = vmatpush.bf16.msra.mxu1 %v7428_v57 }
 0x621   : > { %5225 = vmatpush.bf16.msra.mxu1 %v7427_v39 }
 0x625   : > { %5226 = vmatpush.bf16.msra.mxu1 %v7426_v37 }
 0x664   : > { %v4419_v53 = vpop.permute.xlu0 %4418 }
 0x665   : > { %v4444_v8 = vsel %vm4422_vm7, %v4405_v48, %v4419_v53 }
 0x666   : > { %v4448_v58 = vpack.c.bf16 %v4444_v8, %v4444_v8  ;;  %v4440_v28 = vpop.permute.xlu2 %4439 }
 0x668   : > { %5057 = vmatmul.bf16.vlgmr.msra.gmra.mxu3 %v4448_v58 }
 0x669   : > { %5127 = vmatpush.bf16.msra.mxu3 %v7413_v63 }
 0x66c   : > { %v4421_v59 = vpop.permute.xlu0 %4420 }
 0x66d   : > { %v4423_v48 = vsel %vm4422_vm7, %v4419_v53, %v4421_v59  ;;  %5128 = vmatpush.bf16.msra.mxu3 %v7412_v7 }
 0x66e   : > { %v4449_v36 = vpack.c.bf16 %v4423_v48, %v4423_v48 }
 0x66f   : > { %v5045_v32 = vpop.f32.mrf.mxu2 }
 0x670   : > { %5070 = vmatmul.bf16.vlgmr.msrb.gmra.mxu2 %v4449_v36  ;;  %v5046_v35 = vadd.f32 %v7462_v26, %v5045_v32 }
 0x671   : > { %5129 = vmatpush.bf16.msra.mxu3 %v7411_v34 }
 0x674   : > { %v4429_v29 = vpop.permute.xlu1 %4428 }
 0x675   : > { %v4445_v41 = vsel %vm4422_vm7, %v4409_v60, %v4429_v29  ;;  %5130 = vmatpush.bf16.msra.mxu3 %v7410_v22  ;;  %v7406_v60 = vld [vmem:[%s10557_s8 + $0x1c0] sm:$0xff] }
 0x676   : > { %v4451_v31 = vpack.c.bf16 %v4445_v41, %v4445_v41 }
 0x677   : > { %v5047_v42 = vpop.f32.mrf.mxu2 }
 0x678   : > { %5083 = vmatmul.bf16.vlgmr.msrb.gmra.mxu3 %v4450_v12  ;;  %5096 = vmatmul.bf16.vlgmr.msrb.gmra.mxu0 %v4451_v31 }
 0x679   : > { %5131 = vmatpush.bf16.msra.mxu3 %v7409_v56 }
 0x67d   : > { %5132 = vmatpush.bf16.msra.mxu3 %v7408_v6 }
 0x680   : > { %5122 = vmatmul.bf16.vlgmr.msra.gmra.mxu2 %v4453_v18 }
 0x681   : > { %5133 = vmatpush.bf16.msra.mxu3 %v7407_v45 }
 0x685   : > { %5134 = vmatpush.bf16.msra.mxu3 %v7406_v60 }
 0x686   : > { %v7459_v5 = vpop.permute.xlu1 %7458 }
 0x687   : > { %v7461_v14 = vunpack.i.h.bf16 %v7459_v5  ;;  %v7460_v43 = vunpack.i.l.bf16 %v7459_v5 }
 0x689   : > { %v4432_v51 = vsel %vm4422_vm7, %v4429_v29, %v7461_v14  ;;  %v4446_v52 = vsel %vm4422_vm7, %v4413_v33, %v7460_v43  ;;  %v4441_v27 = vsel %vm4422_vm7, %v7460_v43, %v4440_v28  ;;  %v7425_v33 = vld [vmem:[%s10559_s10 + $0x18] sm:$0xff] }
 0x68a   : > { %v4452_v25 = vpack.c.bf16 %v4432_v51, %v4432_v51  ;;  %v4454_v47 = vpack.c.bf16 %v4446_v52, %v4446_v52  ;;  %v4455_v3 = vpack.c.bf16 %v4441_v27, %v4441_v27  ;;  %5227 = vmatpush.bf16.msra.mxu1 %v7425_v33 }
 0x68c   : > { %5109 = vmatmul.bf16.vlgmr.msrb.gmra.mxu1 %v4452_v25  ;;  %5135 = vmatmul.bf16.vlgmr.msra.gmra.mxu3 %v4454_v47 }
 0x68d   : > { %5148 = vmatmul.bf16.vlgmr.msra.gmra.mxu0 %v4455_v3 }
 0x68e   : > { %5228 = vmatpush.bf16.msra.mxu1 %v7424_v55 }
 0x692   : > { %5229 = vmatpush.bf16.msra.mxu1 %v7423_v20 }
 0x696   : > { %5230 = vmatpush.bf16.msra.mxu1 %v7422_v9 }
 0x6eb   : > { %v5058_v4 = vpop.f32.mrf.mxu3 }
 0x6ec   : > { %v5059_v61 = vadd.f32 %v5058_v4, %v5046_v35 }
 0x6f3   : > { %v5060_v46 = vpop.f32.mrf.mxu3  ;;  %v5071_v44 = vpop.f32.mrf.mxu2 }
 0x6f4   : > { %v5072_v2 = vadd.f32 %v5071_v44, %v5059_v61 }
 0x6f5   : > { %v5097_v0 = vpop.f32.mrf.mxu0 }
 0x6fb   : > { %v5073_v40 = vpop.f32.mrf.mxu2  ;;  %v5084_v15 = vpop.f32.mrf.mxu3 }
 0x6fc   : > { %v5085_v1 = vadd.f32 %v5084_v15, %v5072_v2 }
 0x6fd   : > { %v5099_v10 = vpop.f32.mrf.mxu0 }
 0x6fe   : > { %v5098_v50 = vadd.f32 %v5097_v0, %v5085_v1 }
 0x703   : > { %v5086_v49 = vpop.f32.mrf.mxu3  ;;  %v5123_v38 = vpop.f32.mrf.mxu2 }
 0x709   : > { %v5110_v21 = vpop.f32.mrf.mxu1 }
 0x70a   : > { %v5111_v16 = vadd.f32 %v5110_v21, %v5098_v50  ;;  %v5149_v54 = vpop.f32.mrf.mxu0 }
 0x70b   : > { %v5125_v62 = vpop.f32.mrf.mxu2 }
 0x70c   : > { %v5124_v19 = vadd.f32 %v5123_v38, %v5111_v16 }
 0x70f   : > { %v5136_v17 = vpop.f32.mrf.mxu3 }
 0x710   : > { %v5137_v30 = vadd.f32 %v5136_v17, %v5124_v19 }
 0x711   : > { %v5112_v11 = vpop.f32.mrf.mxu1 }
 0x712   : > { %v5150_v53 = vadd.f32 %v5149_v54, %v5137_v30  ;;  %v5151_v8 = vpop.f32.mrf.mxu0 }
 0x714   : > { %v5153_v63 = vmax.f32 %v5150_v53, 0.0 }
 0x716   : > { %v5154_v58 = vpack.c.bf16 %v5153_v63, %v5153_v63 }
 0x717   : > { %v5138_v24 = vpop.f32.mrf.mxu3 }
 0x718   : > { %5231 = vmatmul.bf16.vlgmr.msra.gmra.mxu1 %v5154_v58 }
 0x795   : > { %v5232_v7 = vpop.f32.mrf.mxu1 }
 0x796   : > { %v5233_v59 = vadd.f32 %v7463_v23, %v5232_v7 }
 0x798   : > { %5236 = vst [vmem:[%s612_s15] sm:$0xff] %v5233_v59 }
 0x79d   : > { %v5234_v48 = vpop.f32.mrf.mxu1 }
 0x79e PF: > { %p19_p9 = scmp.ge.s32.totalorder %s7571_s25, 4   ;;  %s10572_s21 = smov %s7482_s22 }
 0x79f   : > { %s10573_s22 = smov %s7580_s28  ;;  %s10574_s23 = smov %s7571_s25 }
 0x7a0   :  { %21 = sbr.rel (!%p19_p9) target bundleno = 2 (0x2), region = 157 }

</bundles_post_ra>
